<compile_context>
chip_gen: v6e
topology: v6e:2x2x1
jax: 0.10.0
libtpu: 0.0.40
codegen_flags: <defaults>
</compile_context>

<pallas_src>
import functools

import jax
import jax.numpy as jnp
from jax.experimental import pallas as pl
from jax.experimental.pallas import tpu as pltpu


# --------------------------------------------------------------------------
# Fused Pallas kernel: full Refine forward for one batch element
# --------------------------------------------------------------------------

def _refine_kernel(H, W,
                   x_ref,
                   w_in_ref, b_in_ref,
                   w_p1_ref, b_p1_ref,
                   w_p2_ref, b_p2_ref,
                   w_d1_ref, b_d1_ref,
                   w_d2_ref, b_d2_ref,
                   w_last_ref, b_last_ref,
                   o_ref):
    # x_ref      : (1, C, N)  with N = H*W  (lane-dense, channels on sublanes)
    # w_* (3x3)  : (Cout, 9*Cin)  im2col-folded;  w_d1: (Cr, C); w_d2: (C, Cr)
    # b_*        : (Cout, 1)
    # o_ref      : (1, Co, N)
    C = x_ref.shape[1]
    N = H * W

    x = x_ref[0]                                           # (C, N) f32

    # ---- static spatial-validity masks for the 9 taps (shared by all convs) ----
    n = jax.lax.broadcasted_iota(jnp.int32, (1, N), 1)     # flat index
    col = n % W                                            # column index
    offsets = [(ky, kx) for ky in (-1, 0, 1) for kx in (-1, 0, 1)]
    masks = []
    for ky, kx in offsets:
        row_ok = jnp.logical_and(n >= -ky * W, n < (H - ky) * W)   # 0 <= h+ky < H
        col_ok = jnp.logical_and(col >= -kx, col < W - kx)         # 0 <= w+kx < W
        masks.append(jnp.logical_and(row_ok, col_ok))

    def leaky(t):
        return jnp.where(t >= 0, t, 0.1 * t)

    def conv3x3(v, w_ref, b_ref):
        # v: (C, N) -> (Cout, N) via ONE im2col matmul (K = 9*C).
        taps = []
        for t_idx, (ky, kx) in enumerate(offsets):
            off = ky * W + kx
            if off == 0:
                taps.append(v)                               # center tap: no shift
            else:
                shifted = pltpu.roll(v, (-off) % N, axis=1)  # shifted[n] = v[n+off]
                taps.append(jnp.where(masks[t_idx], shifted, 0.0))
        patch = jnp.concatenate(taps, axis=0)                # (9C, N)
        return jnp.dot(w_ref[...], patch,
                       preferred_element_type=jnp.float32) + b_ref[...]

    # out = conv_in(x)
    out = conv3x3(x, w_in_ref, b_in_ref)

    # CALayer.process: conv3x3 -> LeakyReLU(0.1) -> conv3x3
    y = conv3x3(out, w_p1_ref, b_p1_ref)
    y = leaky(y)
    y = conv3x3(y, w_p2_ref, b_p2_ref)

    # AdaptiveAvgPool2d(1): spatial mean over lanes -> (C, 1)
    yp = jnp.sum(y, axis=1, keepdims=True) * (1.0 / N)

    # conv_du: 1x1 -> LeakyReLU(0.1) -> 1x1 -> Sigmoid (on the pooled vector)
    t = jnp.dot(w_d1_ref[...], yp, preferred_element_type=jnp.float32) + b_d1_ref[...]
    t = leaky(t)
    u = jnp.dot(w_d2_ref[...], t, preferred_element_type=jnp.float32) + b_d2_ref[...]
    z = 1.0 / (1.0 + jnp.exp(-u))                          # sigmoid (exp on EUP)

    # CALayer return: z * pooled_y + skip  (torch code gates the POOLED y)
    ca = out + z * yp                                      # (C,1) broadcast over lanes

    # conv_last
    res = conv3x3(ca, w_last_ref, b_last_ref)              # (Co, N)
    o_ref[0] = res.astype(o_ref.dtype)


# --------------------------------------------------------------------------
# Wrapper (NCHW in / NCHW out — no transposes, only free contiguous reshapes)
# --------------------------------------------------------------------------

def refine_forward(x, params):
    """Forward of the PyTorch `Refine` module. x: (B, C, H, W) float32."""
    B, C, H, W = x.shape
    N = H * W
    Co = params["w_last"].shape[-1]
    Cr = params["w_d1"].shape[0]

    x_flat = x.reshape(B, C, N)                            # channels-first, lane-dense

    def w3x3(w_hwio):
        # (3,3,Cin,Cout) -> (Cout, 9*Cin); row (tap*Cin + ci) matches the in-kernel
        # im2col patch ordering (tap-major ky,kx then input channel).
        cin, cout = w_hwio.shape[2], w_hwio.shape[3]
        return jnp.transpose(w_hwio.reshape(9 * cin, cout))

    def colv(b):
        return b.reshape(-1, 1)                            # bias as (Cout, 1) column

    def const_spec(shape):
        return pl.BlockSpec(shape, lambda i: tuple(0 for _ in shape))

    kernel = functools.partial(_refine_kernel, H, W)

    out_flat = pl.pallas_call(
        kernel,
        out_shape=jax.ShapeDtypeStruct((B, Co, N), x.dtype),
        grid=(B,),
        in_specs=[
            pl.BlockSpec((1, C, N), lambda i: (i, 0, 0)),   # x
            const_spec((C, 9 * C)), const_spec((C, 1)),     # conv_in
            const_spec((C, 9 * C)), const_spec((C, 1)),     # process conv 1
            const_spec((C, 9 * C)), const_spec((C, 1)),     # process conv 2
            const_spec((Cr, C)),    const_spec((Cr, 1)),    # conv_du squeeze
            const_spec((C, Cr)),    const_spec((C, 1)),     # conv_du excite
            const_spec((Co, 9 * C)), const_spec((Co, 1)),   # conv_last
        ],
        out_specs=pl.BlockSpec((1, Co, N), lambda i: (i, 0, 0)),
        compiler_params=pltpu.CompilerParams(
            dimension_semantics=("parallel",)),
    )(x_flat,
      w3x3(params["w_in"]), colv(params["b_in"]),
      w3x3(params["w_p1"]), colv(params["b_p1"]),
      w3x3(params["w_p2"]), colv(params["b_p2"]),
      params["w_d1"], colv(params["b_d1"]),
      params["w_d2"], colv(params["b_d2"]),
      w3x3(params["w_last"]), colv(params["b_last"]))

    return out_flat.reshape(B, Co, H, W)


# --------------------------------------------------------------------------
# Deterministic parameter init (mirrors torch Conv2d fan-in bounds; 3x3 stored HWIO)
# --------------------------------------------------------------------------

def init_params(key, n_feat, out_channel, reduction=4):
    cr = n_feat // reduction
    ks = jax.random.split(key, 12)

    def u(k, shape, bound):
        return jax.random.uniform(k, shape, jnp.float32, -bound, bound)

    b3 = 1.0 / (n_feat * 9) ** 0.5    # 3x3 convs: fan_in = 9 * n_feat
    b1 = 1.0 / n_feat ** 0.5          # 1x1 squeeze: fan_in = n_feat
    br = 1.0 / cr ** 0.5              # 1x1 excite:  fan_in = n_feat // reduction

    return {
        "w_in":   u(ks[0], (3, 3, n_feat, n_feat), b3),
        "b_in":   u(ks[1], (n_feat,), b3),
        "w_p1":   u(ks[2], (3, 3, n_feat, n_feat), b3),
        "b_p1":   u(ks[3], (n_feat,), b3),
        "w_p2":   u(ks[4], (3, 3, n_feat, n_feat), b3),
        "b_p2":   u(ks[5], (n_feat,), b3),
        "w_d1":   u(ks[6], (cr, n_feat), b1),      # (out, in)
        "b_d1":   u(ks[7], (cr,), b1),
        "w_d2":   u(ks[8], (n_feat, cr), br),      # (out, in)
        "b_d2":   u(ks[9], (n_feat,), br),
        "w_last": u(ks[10], (3, 3, n_feat, out_channel), b3),
        "b_last": u(ks[11], (out_channel,), b3),
    }


# --------------------------------------------------------------------------
# Pure-JAX reference (for numerical verification of the Pallas path)
# --------------------------------------------------------------------------

def _conv3x3_ref(x_nchw, w_hwio, b):
    w_oihw = jnp.transpose(w_hwio, (3, 2, 0, 1))
    y = jax.lax.conv_general_dilated(
        x_nchw, w_oihw, window_strides=(1, 1), padding=((1, 1), (1, 1)),
        dimension_numbers=("NCHW", "OIHW", "NCHW"))
    return y + b.reshape(1, -1, 1, 1)


def reference_forward(x, params):
    leaky = lambda t: jnp.where(t >= 0, t, 0.1 * t)
    out = _conv3x3_ref(x, params["w_in"], params["b_in"])            # conv_in
    y = _conv3x3_ref(out, params["w_p1"], params["b_p1"])            # process
    y = leaky(y)
    y = _conv3x3_ref(y, params["w_p2"], params["b_p2"])
    yp = jnp.mean(y, axis=(2, 3), keepdims=True)                     # avg_pool
    t = jnp.einsum("bcij,dc->bdij", yp, params["w_d1"]) \
        + params["b_d1"].reshape(1, -1, 1, 1)
    t = leaky(t)
    u = jnp.einsum("bcij,dc->bdij", t, params["w_d2"]) \
        + params["b_d2"].reshape(1, -1, 1, 1)
    z = jax.nn.sigmoid(u)
    ca = z * yp + out                                                # CALayer
    return _conv3x3_ref(ca, params["w_last"], params["b_last"])      # conv_last


# --------------------------------------------------------------------------

if __name__ == "__main__":
    B, C, H, W = 2, 32, 16, 16        # n_feat = 32, reduction = 4
    OUT_CHANNEL = 32

    key = jax.random.PRNGKey(0)
    kx, kparam = jax.random.split(key, 2)
    x = jax.random.normal(kx, (B, C, H, W), jnp.float32)
    params = init_params(kparam, C, OUT_CHANNEL, reduction=4)

    fwd = jax.jit(refine_forward)
    y_out = fwd(x, params)
    jax.block_until_ready(y_out)

    assert y_out.shape == (B, OUT_CHANNEL, H, W)

    y_ref = reference_forward(x, params)
    assert jnp.allclose(y_out, y_ref, rtol=1e-3, atol=1e-3), \
        float(jnp.max(jnp.abs(y_out - y_ref)))

    print("KERNEL_OK")
</pallas_src>

<mosaic_0001>
module attributes {stable_mosaic.version = 11 : i64} {
  func.func @_refine_kernel(%arg0: i32, %arg1: memref<1x32x256xf32, #tpu.memory_space<vmem>>, %arg2: memref<32x288xf32, #tpu.memory_space<vmem>>, %arg3: memref<32x1xf32, #tpu.memory_space<vmem>>, %arg4: memref<32x288xf32, #tpu.memory_space<vmem>>, %arg5: memref<32x1xf32, #tpu.memory_space<vmem>>, %arg6: memref<32x288xf32, #tpu.memory_space<vmem>>, %arg7: memref<32x1xf32, #tpu.memory_space<vmem>>, %arg8: memref<8x32xf32, #tpu.memory_space<vmem>>, %arg9: memref<8x1xf32, #tpu.memory_space<vmem>>, %arg10: memref<32x8xf32, #tpu.memory_space<vmem>>, %arg11: memref<32x1xf32, #tpu.memory_space<vmem>>, %arg12: memref<32x288xf32, #tpu.memory_space<vmem>>, %arg13: memref<32x1xf32, #tpu.memory_space<vmem>>, %arg14: memref<1x32x256xf32, #tpu.memory_space<vmem>>) attributes {dimension_semantics = [#tpu.dimension_semantics<parallel>], iteration_bounds = array<i64: 2>, scalar_prefetch = 0 : i64, scratch_operands = 0 : i64, tpu.core_type = #tpu.core_type<tc>, window_params = [{transform_indices = @transform_0, window_bounds = array<i64: 1, 32, 256>}, {pipeline_mode = #tpu.pipeline_mode<synchronous>, transform_indices = @transform_1, window_bounds = array<i64: 32, 288>}, {pipeline_mode = #tpu.pipeline_mode<synchronous>, transform_indices = @transform_2, window_bounds = array<i64: 32, 1>}, {pipeline_mode = #tpu.pipeline_mode<synchronous>, transform_indices = @transform_3, window_bounds = array<i64: 32, 288>}, {pipeline_mode = #tpu.pipeline_mode<synchronous>, transform_indices = @transform_4, window_bounds = array<i64: 32, 1>}, {pipeline_mode = #tpu.pipeline_mode<synchronous>, transform_indices = @transform_5, window_bounds = array<i64: 32, 288>}, {pipeline_mode = #tpu.pipeline_mode<synchronous>, transform_indices = @transform_6, window_bounds = array<i64: 32, 1>}, {pipeline_mode = #tpu.pipeline_mode<synchronous>, transform_indices = @transform_7, window_bounds = array<i64: 8, 32>}, {pipeline_mode = #tpu.pipeline_mode<synchronous>, transform_indices = @transform_8, window_bounds = array<i64: 8, 1>}, {pipeline_mode = #tpu.pipeline_mode<synchronous>, transform_indices = @transform_9, window_bounds = array<i64: 32, 8>}, {pipeline_mode = #tpu.pipeline_mode<synchronous>, transform_indices = @transform_10, window_bounds = array<i64: 32, 1>}, {pipeline_mode = #tpu.pipeline_mode<synchronous>, transform_indices = @transform_11, window_bounds = array<i64: 32, 288>}, {pipeline_mode = #tpu.pipeline_mode<synchronous>, transform_indices = @transform_12, window_bounds = array<i64: 32, 1>}, {transform_indices = @transform_13, window_bounds = array<i64: 1, 32, 256>}]} {
    %c0 = arith.constant 0 : index
    %c0_0 = arith.constant 0 : index
    %c0_1 = arith.constant 0 : index
    %0 = vector.load %arg1[%c0, %c0_0, %c0_1] : memref<1x32x256xf32, #tpu.memory_space<vmem>>, vector<1x32x256xf32>
    %1 = vector.shape_cast %0 : vector<1x32x256xf32> to vector<32x256xf32>
    %2 = tpu.iota {dimensions = array<i32: 1>} : vector<1x256xi32>
    %c16_i32 = arith.constant 16 : i32
    %c0_i32 = arith.constant 0 : i32
    %3 = arith.cmpi eq, %c16_i32, %c0_i32 : i32
    %c1_i32 = arith.constant 1 : i32
    %4 = arith.select %3, %c1_i32, %c16_i32 : i32
    %5 = vector.broadcast %4 : i32 to vector<1x256xi32>
    %6 = arith.remsi %2, %5 : vector<1x256xi32>
    %c0_i32_2 = arith.constant 0 : i32
    %7 = vector.broadcast %c0_i32_2 : i32 to vector<1x256xi32>
    %8 = arith.cmpi ne, %6, %7 : vector<1x256xi32>
    %c0_i32_3 = arith.constant 0 : i32
    %9 = vector.broadcast %c0_i32_3 : i32 to vector<1x256xi32>
    %10 = arith.cmpi slt, %6, %9 : vector<1x256xi32>
    %c0_i32_4 = arith.constant 0 : i32
    %11 = arith.cmpi slt, %4, %c0_i32_4 : i32
    %12 = vector.broadcast %11 : i1 to vector<1x256xi1>
    %13 = vector.broadcast %12 : vector<1x256xi1> to vector<1x256xi1>
    %14 = arith.xori %10, %13 : vector<1x256xi1>
    %15 = arith.andi %14, %8 : vector<1x256xi1>
    %16 = vector.broadcast %4 : i32 to vector<1x256xi32>
    %17 = arith.addi %6, %16 : vector<1x256xi32>
    %18 = arith.select %15, %17, %6 : vector<1x256xi1>, vector<1x256xi32>
    %c16_i32_5 = arith.constant 16 : i32
    %19 = vector.broadcast %c16_i32_5 : i32 to vector<1x256xi32>
    %20 = arith.cmpi sge, %2, %19 : vector<1x256xi32>
    %c272_i32 = arith.constant 272 : i32
    %21 = vector.broadcast %c272_i32 : i32 to vector<1x256xi32>
    %22 = arith.cmpi slt, %2, %21 : vector<1x256xi32>
    %23 = arith.andi %20, %22 : vector<1x256xi1>
    %c1_i32_6 = arith.constant 1 : i32
    %24 = vector.broadcast %c1_i32_6 : i32 to vector<1x256xi32>
    %25 = arith.cmpi sge, %18, %24 : vector<1x256xi32>
    %c17_i32 = arith.constant 17 : i32
    %26 = vector.broadcast %c17_i32 : i32 to vector<1x256xi32>
    %27 = arith.cmpi slt, %18, %26 : vector<1x256xi32>
    %28 = arith.andi %25, %27 : vector<1x256xi1>
    %29 = arith.andi %23, %28 : vector<1x256xi1>
    %c16_i32_7 = arith.constant 16 : i32
    %30 = vector.broadcast %c16_i32_7 : i32 to vector<1x256xi32>
    %31 = arith.cmpi sge, %2, %30 : vector<1x256xi32>
    %c272_i32_8 = arith.constant 272 : i32
    %32 = vector.broadcast %c272_i32_8 : i32 to vector<1x256xi32>
    %33 = arith.cmpi slt, %2, %32 : vector<1x256xi32>
    %34 = arith.andi %31, %33 : vector<1x256xi1>
    %c0_i32_9 = arith.constant 0 : i32
    %35 = vector.broadcast %c0_i32_9 : i32 to vector<1x256xi32>
    %36 = arith.cmpi sge, %18, %35 : vector<1x256xi32>
    %c16_i32_10 = arith.constant 16 : i32
    %37 = vector.broadcast %c16_i32_10 : i32 to vector<1x256xi32>
    %38 = arith.cmpi slt, %18, %37 : vector<1x256xi32>
    %39 = arith.andi %36, %38 : vector<1x256xi1>
    %40 = arith.andi %34, %39 : vector<1x256xi1>
    %c16_i32_11 = arith.constant 16 : i32
    %41 = vector.broadcast %c16_i32_11 : i32 to vector<1x256xi32>
    %42 = arith.cmpi sge, %2, %41 : vector<1x256xi32>
    %c272_i32_12 = arith.constant 272 : i32
    %43 = vector.broadcast %c272_i32_12 : i32 to vector<1x256xi32>
    %44 = arith.cmpi slt, %2, %43 : vector<1x256xi32>
    %45 = arith.andi %42, %44 : vector<1x256xi1>
    %c-1_i32 = arith.constant -1 : i32
    %46 = vector.broadcast %c-1_i32 : i32 to vector<1x256xi32>
    %47 = arith.cmpi sge, %18, %46 : vector<1x256xi32>
    %c15_i32 = arith.constant 15 : i32
    %48 = vector.broadcast %c15_i32 : i32 to vector<1x256xi32>
    %49 = arith.cmpi slt, %18, %48 : vector<1x256xi32>
    %50 = arith.andi %47, %49 : vector<1x256xi1>
    %51 = arith.andi %45, %50 : vector<1x256xi1>
    %c0_i32_13 = arith.constant 0 : i32
    %52 = vector.broadcast %c0_i32_13 : i32 to vector<1x256xi32>
    %53 = arith.cmpi sge, %2, %52 : vector<1x256xi32>
    %c256_i32 = arith.constant 256 : i32
    %54 = vector.broadcast %c256_i32 : i32 to vector<1x256xi32>
    %55 = arith.cmpi slt, %2, %54 : vector<1x256xi32>
    %56 = arith.andi %53, %55 : vector<1x256xi1>
    %c1_i32_14 = arith.constant 1 : i32
    %57 = vector.broadcast %c1_i32_14 : i32 to vector<1x256xi32>
    %58 = arith.cmpi sge, %18, %57 : vector<1x256xi32>
    %c17_i32_15 = arith.constant 17 : i32
    %59 = vector.broadcast %c17_i32_15 : i32 to vector<1x256xi32>
    %60 = arith.cmpi slt, %18, %59 : vector<1x256xi32>
    %61 = arith.andi %58, %60 : vector<1x256xi1>
    %62 = arith.andi %56, %61 : vector<1x256xi1>
    %c0_i32_16 = arith.constant 0 : i32
    %63 = vector.broadcast %c0_i32_16 : i32 to vector<1x256xi32>
    %64 = arith.cmpi sge, %2, %63 : vector<1x256xi32>
    %c256_i32_17 = arith.constant 256 : i32
    %65 = vector.broadcast %c256_i32_17 : i32 to vector<1x256xi32>
    %66 = arith.cmpi slt, %2, %65 : vector<1x256xi32>
    %67 = arith.andi %64, %66 : vector<1x256xi1>
    %c-1_i32_18 = arith.constant -1 : i32
    %68 = vector.broadcast %c-1_i32_18 : i32 to vector<1x256xi32>
    %69 = arith.cmpi sge, %18, %68 : vector<1x256xi32>
    %c15_i32_19 = arith.constant 15 : i32
    %70 = vector.broadcast %c15_i32_19 : i32 to vector<1x256xi32>
    %71 = arith.cmpi slt, %18, %70 : vector<1x256xi32>
    %72 = arith.andi %69, %71 : vector<1x256xi1>
    %73 = arith.andi %67, %72 : vector<1x256xi1>
    %c-16_i32 = arith.constant -16 : i32
    %74 = vector.broadcast %c-16_i32 : i32 to vector<1x256xi32>
    %75 = arith.cmpi sge, %2, %74 : vector<1x256xi32>
    %c240_i32 = arith.constant 240 : i32
    %76 = vector.broadcast %c240_i32 : i32 to vector<1x256xi32>
    %77 = arith.cmpi slt, %2, %76 : vector<1x256xi32>
    %78 = arith.andi %75, %77 : vector<1x256xi1>
    %c1_i32_20 = arith.constant 1 : i32
    %79 = vector.broadcast %c1_i32_20 : i32 to vector<1x256xi32>
    %80 = arith.cmpi sge, %18, %79 : vector<1x256xi32>
    %c17_i32_21 = arith.constant 17 : i32
    %81 = vector.broadcast %c17_i32_21 : i32 to vector<1x256xi32>
    %82 = arith.cmpi slt, %18, %81 : vector<1x256xi32>
    %83 = arith.andi %80, %82 : vector<1x256xi1>
    %84 = arith.andi %78, %83 : vector<1x256xi1>
    %c-16_i32_22 = arith.constant -16 : i32
    %85 = vector.broadcast %c-16_i32_22 : i32 to vector<1x256xi32>
    %86 = arith.cmpi sge, %2, %85 : vector<1x256xi32>
    %c240_i32_23 = arith.constant 240 : i32
    %87 = vector.broadcast %c240_i32_23 : i32 to vector<1x256xi32>
    %88 = arith.cmpi slt, %2, %87 : vector<1x256xi32>
    %89 = arith.andi %86, %88 : vector<1x256xi1>
    %c0_i32_24 = arith.constant 0 : i32
    %90 = vector.broadcast %c0_i32_24 : i32 to vector<1x256xi32>
    %91 = arith.cmpi sge, %18, %90 : vector<1x256xi32>
    %c16_i32_25 = arith.constant 16 : i32
    %92 = vector.broadcast %c16_i32_25 : i32 to vector<1x256xi32>
    %93 = arith.cmpi slt, %18, %92 : vector<1x256xi32>
    %94 = arith.andi %91, %93 : vector<1x256xi1>
    %95 = arith.andi %89, %94 : vector<1x256xi1>
    %c-16_i32_26 = arith.constant -16 : i32
    %96 = vector.broadcast %c-16_i32_26 : i32 to vector<1x256xi32>
    %97 = arith.cmpi sge, %2, %96 : vector<1x256xi32>
    %c240_i32_27 = arith.constant 240 : i32
    %98 = vector.broadcast %c240_i32_27 : i32 to vector<1x256xi32>
    %99 = arith.cmpi slt, %2, %98 : vector<1x256xi32>
    %100 = arith.andi %97, %99 : vector<1x256xi1>
    %c-1_i32_28 = arith.constant -1 : i32
    %101 = vector.broadcast %c-1_i32_28 : i32 to vector<1x256xi32>
    %102 = arith.cmpi sge, %18, %101 : vector<1x256xi32>
    %c15_i32_29 = arith.constant 15 : i32
    %103 = vector.broadcast %c15_i32_29 : i32 to vector<1x256xi32>
    %104 = arith.cmpi slt, %18, %103 : vector<1x256xi32>
    %105 = arith.andi %102, %104 : vector<1x256xi1>
    %106 = arith.andi %100, %105 : vector<1x256xi1>
    %c17_i32_30 = arith.constant 17 : i32
    %107 = tpu.dynamic_rotate %1 by %c17_i32_30 dim 1 : vector<32x256xf32>, i32 -> vector<32x256xf32>
    %cst = arith.constant 0.000000e+00 : f32
    %108 = vector.shape_cast %29 : vector<1x256xi1> to vector<1x256xi1>
    %109 = vector.broadcast %108 : vector<1x256xi1> to vector<32x256xi1>
    %110 = vector.broadcast %cst : f32 to vector<32x256xf32>
    %111 = arith.select %109, %107, %110 : vector<32x256xi1>, vector<32x256xf32>
    %c16_i32_31 = arith.constant 16 : i32
    %112 = tpu.dynamic_rotate %1 by %c16_i32_31 dim 1 : vector<32x256xf32>, i32 -> vector<32x256xf32>
    %cst_32 = arith.constant 0.000000e+00 : f32
    %113 = vector.shape_cast %40 : vector<1x256xi1> to vector<1x256xi1>
    %114 = vector.broadcast %113 : vector<1x256xi1> to vector<32x256xi1>
    %115 = vector.broadcast %cst_32 : f32 to vector<32x256xf32>
    %116 = arith.select %114, %112, %115 : vector<32x256xi1>, vector<32x256xf32>
    %c15_i32_33 = arith.constant 15 : i32
    %117 = tpu.dynamic_rotate %1 by %c15_i32_33 dim 1 : vector<32x256xf32>, i32 -> vector<32x256xf32>
    %cst_34 = arith.constant 0.000000e+00 : f32
    %118 = vector.shape_cast %51 : vector<1x256xi1> to vector<1x256xi1>
    %119 = vector.broadcast %118 : vector<1x256xi1> to vector<32x256xi1>
    %120 = vector.broadcast %cst_34 : f32 to vector<32x256xf32>
    %121 = arith.select %119, %117, %120 : vector<32x256xi1>, vector<32x256xf32>
    %c1_i32_35 = arith.constant 1 : i32
    %122 = tpu.dynamic_rotate %1 by %c1_i32_35 dim 1 : vector<32x256xf32>, i32 -> vector<32x256xf32>
    %cst_36 = arith.constant 0.000000e+00 : f32
    %123 = vector.shape_cast %62 : vector<1x256xi1> to vector<1x256xi1>
    %124 = vector.broadcast %123 : vector<1x256xi1> to vector<32x256xi1>
    %125 = vector.broadcast %cst_36 : f32 to vector<32x256xf32>
    %126 = arith.select %124, %122, %125 : vector<32x256xi1>, vector<32x256xf32>
    %c255_i32 = arith.constant 255 : i32
    %127 = tpu.dynamic_rotate %1 by %c255_i32 dim 1 : vector<32x256xf32>, i32 -> vector<32x256xf32>
    %cst_37 = arith.constant 0.000000e+00 : f32
    %128 = vector.shape_cast %73 : vector<1x256xi1> to vector<1x256xi1>
    %129 = vector.broadcast %128 : vector<1x256xi1> to vector<32x256xi1>
    %130 = vector.broadcast %cst_37 : f32 to vector<32x256xf32>
    %131 = arith.select %129, %127, %130 : vector<32x256xi1>, vector<32x256xf32>
    %c241_i32 = arith.constant 241 : i32
    %132 = tpu.dynamic_rotate %1 by %c241_i32 dim 1 : vector<32x256xf32>, i32 -> vector<32x256xf32>
    %cst_38 = arith.constant 0.000000e+00 : f32
    %133 = vector.shape_cast %84 : vector<1x256xi1> to vector<1x256xi1>
    %134 = vector.broadcast %133 : vector<1x256xi1> to vector<32x256xi1>
    %135 = vector.broadcast %cst_38 : f32 to vector<32x256xf32>
    %136 = arith.select %134, %132, %135 : vector<32x256xi1>, vector<32x256xf32>
    %c240_i32_39 = arith.constant 240 : i32
    %137 = tpu.dynamic_rotate %1 by %c240_i32_39 dim 1 : vector<32x256xf32>, i32 -> vector<32x256xf32>
    %cst_40 = arith.constant 0.000000e+00 : f32
    %138 = vector.shape_cast %95 : vector<1x256xi1> to vector<1x256xi1>
    %139 = vector.broadcast %138 : vector<1x256xi1> to vector<32x256xi1>
    %140 = vector.broadcast %cst_40 : f32 to vector<32x256xf32>
    %141 = arith.select %139, %137, %140 : vector<32x256xi1>, vector<32x256xf32>
    %c239_i32 = arith.constant 239 : i32
    %142 = tpu.dynamic_rotate %1 by %c239_i32 dim 1 : vector<32x256xf32>, i32 -> vector<32x256xf32>
    %cst_41 = arith.constant 0.000000e+00 : f32
    %143 = vector.shape_cast %106 : vector<1x256xi1> to vector<1x256xi1>
    %144 = vector.broadcast %143 : vector<1x256xi1> to vector<32x256xi1>
    %145 = vector.broadcast %cst_41 : f32 to vector<32x256xf32>
    %146 = arith.select %144, %142, %145 : vector<32x256xi1>, vector<32x256xf32>
    %147 = tpu.concatenate %111, %116, %121, %126, %1, %131, %136, %141, %146 in 0 : vector<32x256xf32>, vector<32x256xf32>, vector<32x256xf32>, vector<32x256xf32>, vector<32x256xf32>, vector<32x256xf32>, vector<32x256xf32>, vector<32x256xf32>, vector<32x256xf32> -> vector<288x256xf32>
    %c0_42 = arith.constant 0 : index
    %c0_43 = arith.constant 0 : index
    %148 = vector.load %arg2[%c0_42, %c0_43] : memref<32x288xf32, #tpu.memory_space<vmem>>, vector<32x288xf32>
    %cst_44 = arith.constant dense<0.000000e+00> : vector<32x256xf32>
    %149 = tpu.matmul %148, %147, %cst_44 {dimension_numbers = #tpu.dot_dimension_numbers<[1], [0], [0], [1], [0, 0, 1, 1], [], []>} : vector<32x288xf32>, vector<288x256xf32>, vector<32x256xf32> -> vector<32x256xf32>
    %c0_45 = arith.constant 0 : index
    %c0_46 = arith.constant 0 : index
    %150 = vector.load %arg3[%c0_45, %c0_46] : memref<32x1xf32, #tpu.memory_space<vmem>>, vector<32x1xf32>
    %151 = vector.broadcast %150 : vector<32x1xf32> to vector<32x256xf32>
    %152 = arith.addf %149, %151 : vector<32x256xf32>
    %c17_i32_47 = arith.constant 17 : i32
    %153 = tpu.dynamic_rotate %152 by %c17_i32_47 dim 1 : vector<32x256xf32>, i32 -> vector<32x256xf32>
    %cst_48 = arith.constant 0.000000e+00 : f32
    %154 = vector.shape_cast %29 : vector<1x256xi1> to vector<1x256xi1>
    %155 = vector.broadcast %154 : vector<1x256xi1> to vector<32x256xi1>
    %156 = vector.broadcast %cst_48 : f32 to vector<32x256xf32>
    %157 = arith.select %155, %153, %156 : vector<32x256xi1>, vector<32x256xf32>
    %c16_i32_49 = arith.constant 16 : i32
    %158 = tpu.dynamic_rotate %152 by %c16_i32_49 dim 1 : vector<32x256xf32>, i32 -> vector<32x256xf32>
    %cst_50 = arith.constant 0.000000e+00 : f32
    %159 = vector.shape_cast %40 : vector<1x256xi1> to vector<1x256xi1>
    %160 = vector.broadcast %159 : vector<1x256xi1> to vector<32x256xi1>
    %161 = vector.broadcast %cst_50 : f32 to vector<32x256xf32>
    %162 = arith.select %160, %158, %161 : vector<32x256xi1>, vector<32x256xf32>
    %c15_i32_51 = arith.constant 15 : i32
    %163 = tpu.dynamic_rotate %152 by %c15_i32_51 dim 1 : vector<32x256xf32>, i32 -> vector<32x256xf32>
    %cst_52 = arith.constant 0.000000e+00 : f32
    %164 = vector.shape_cast %51 : vector<1x256xi1> to vector<1x256xi1>
    %165 = vector.broadcast %164 : vector<1x256xi1> to vector<32x256xi1>
    %166 = vector.broadcast %cst_52 : f32 to vector<32x256xf32>
    %167 = arith.select %165, %163, %166 : vector<32x256xi1>, vector<32x256xf32>
    %c1_i32_53 = arith.constant 1 : i32
    %168 = tpu.dynamic_rotate %152 by %c1_i32_53 dim 1 : vector<32x256xf32>, i32 -> vector<32x256xf32>
    %cst_54 = arith.constant 0.000000e+00 : f32
    %169 = vector.shape_cast %62 : vector<1x256xi1> to vector<1x256xi1>
    %170 = vector.broadcast %169 : vector<1x256xi1> to vector<32x256xi1>
    %171 = vector.broadcast %cst_54 : f32 to vector<32x256xf32>
    %172 = arith.select %170, %168, %171 : vector<32x256xi1>, vector<32x256xf32>
    %c255_i32_55 = arith.constant 255 : i32
    %173 = tpu.dynamic_rotate %152 by %c255_i32_55 dim 1 : vector<32x256xf32>, i32 -> vector<32x256xf32>
    %cst_56 = arith.constant 0.000000e+00 : f32
    %174 = vector.shape_cast %73 : vector<1x256xi1> to vector<1x256xi1>
    %175 = vector.broadcast %174 : vector<1x256xi1> to vector<32x256xi1>
    %176 = vector.broadcast %cst_56 : f32 to vector<32x256xf32>
    %177 = arith.select %175, %173, %176 : vector<32x256xi1>, vector<32x256xf32>
    %c241_i32_57 = arith.constant 241 : i32
    %178 = tpu.dynamic_rotate %152 by %c241_i32_57 dim 1 : vector<32x256xf32>, i32 -> vector<32x256xf32>
    %cst_58 = arith.constant 0.000000e+00 : f32
    %179 = vector.shape_cast %84 : vector<1x256xi1> to vector<1x256xi1>
    %180 = vector.broadcast %179 : vector<1x256xi1> to vector<32x256xi1>
    %181 = vector.broadcast %cst_58 : f32 to vector<32x256xf32>
    %182 = arith.select %180, %178, %181 : vector<32x256xi1>, vector<32x256xf32>
    %c240_i32_59 = arith.constant 240 : i32
    %183 = tpu.dynamic_rotate %152 by %c240_i32_59 dim 1 : vector<32x256xf32>, i32 -> vector<32x256xf32>
    %cst_60 = arith.constant 0.000000e+00 : f32
    %184 = vector.shape_cast %95 : vector<1x256xi1> to vector<1x256xi1>
    %185 = vector.broadcast %184 : vector<1x256xi1> to vector<32x256xi1>
    %186 = vector.broadcast %cst_60 : f32 to vector<32x256xf32>
    %187 = arith.select %185, %183, %186 : vector<32x256xi1>, vector<32x256xf32>
    %c239_i32_61 = arith.constant 239 : i32
    %188 = tpu.dynamic_rotate %152 by %c239_i32_61 dim 1 : vector<32x256xf32>, i32 -> vector<32x256xf32>
    %cst_62 = arith.constant 0.000000e+00 : f32
    %189 = vector.shape_cast %106 : vector<1x256xi1> to vector<1x256xi1>
    %190 = vector.broadcast %189 : vector<1x256xi1> to vector<32x256xi1>
    %191 = vector.broadcast %cst_62 : f32 to vector<32x256xf32>
    %192 = arith.select %190, %188, %191 : vector<32x256xi1>, vector<32x256xf32>
    %193 = tpu.concatenate %157, %162, %167, %172, %152, %177, %182, %187, %192 in 0 : vector<32x256xf32>, vector<32x256xf32>, vector<32x256xf32>, vector<32x256xf32>, vector<32x256xf32>, vector<32x256xf32>, vector<32x256xf32>, vector<32x256xf32>, vector<32x256xf32> -> vector<288x256xf32>
    %c0_63 = arith.constant 0 : index
    %c0_64 = arith.constant 0 : index
    %194 = vector.load %arg4[%c0_63, %c0_64] : memref<32x288xf32, #tpu.memory_space<vmem>>, vector<32x288xf32>
    %cst_65 = arith.constant dense<0.000000e+00> : vector<32x256xf32>
    %195 = tpu.matmul %194, %193, %cst_65 {dimension_numbers = #tpu.dot_dimension_numbers<[1], [0], [0], [1], [0, 0, 1, 1], [], []>} : vector<32x288xf32>, vector<288x256xf32>, vector<32x256xf32> -> vector<32x256xf32>
    %c0_66 = arith.constant 0 : index
    %c0_67 = arith.constant 0 : index
    %196 = vector.load %arg5[%c0_66, %c0_67] : memref<32x1xf32, #tpu.memory_space<vmem>>, vector<32x1xf32>
    %197 = vector.broadcast %196 : vector<32x1xf32> to vector<32x256xf32>
    %198 = arith.addf %195, %197 : vector<32x256xf32>
    %cst_68 = arith.constant 0.000000e+00 : f32
    %199 = vector.broadcast %cst_68 : f32 to vector<32x256xf32>
    %200 = arith.cmpf oge, %198, %199 : vector<32x256xf32>
    %cst_69 = arith.constant 1.000000e-01 : f32
    %201 = vector.broadcast %cst_69 : f32 to vector<32x256xf32>
    %202 = arith.mulf %201, %198 : vector<32x256xf32>
    %203 = arith.select %200, %198, %202 : vector<32x256xi1>, vector<32x256xf32>
    %c17_i32_70 = arith.constant 17 : i32
    %204 = tpu.dynamic_rotate %203 by %c17_i32_70 dim 1 : vector<32x256xf32>, i32 -> vector<32x256xf32>
    %cst_71 = arith.constant 0.000000e+00 : f32
    %205 = vector.shape_cast %29 : vector<1x256xi1> to vector<1x256xi1>
    %206 = vector.broadcast %205 : vector<1x256xi1> to vector<32x256xi1>
    %207 = vector.broadcast %cst_71 : f32 to vector<32x256xf32>
    %208 = arith.select %206, %204, %207 : vector<32x256xi1>, vector<32x256xf32>
    %c16_i32_72 = arith.constant 16 : i32
    %209 = tpu.dynamic_rotate %203 by %c16_i32_72 dim 1 : vector<32x256xf32>, i32 -> vector<32x256xf32>
    %cst_73 = arith.constant 0.000000e+00 : f32
    %210 = vector.shape_cast %40 : vector<1x256xi1> to vector<1x256xi1>
    %211 = vector.broadcast %210 : vector<1x256xi1> to vector<32x256xi1>
    %212 = vector.broadcast %cst_73 : f32 to vector<32x256xf32>
    %213 = arith.select %211, %209, %212 : vector<32x256xi1>, vector<32x256xf32>
    %c15_i32_74 = arith.constant 15 : i32
    %214 = tpu.dynamic_rotate %203 by %c15_i32_74 dim 1 : vector<32x256xf32>, i32 -> vector<32x256xf32>
    %cst_75 = arith.constant 0.000000e+00 : f32
    %215 = vector.shape_cast %51 : vector<1x256xi1> to vector<1x256xi1>
    %216 = vector.broadcast %215 : vector<1x256xi1> to vector<32x256xi1>
    %217 = vector.broadcast %cst_75 : f32 to vector<32x256xf32>
    %218 = arith.select %216, %214, %217 : vector<32x256xi1>, vector<32x256xf32>
    %c1_i32_76 = arith.constant 1 : i32
    %219 = tpu.dynamic_rotate %203 by %c1_i32_76 dim 1 : vector<32x256xf32>, i32 -> vector<32x256xf32>
    %cst_77 = arith.constant 0.000000e+00 : f32
    %220 = vector.shape_cast %62 : vector<1x256xi1> to vector<1x256xi1>
    %221 = vector.broadcast %220 : vector<1x256xi1> to vector<32x256xi1>
    %222 = vector.broadcast %cst_77 : f32 to vector<32x256xf32>
    %223 = arith.select %221, %219, %222 : vector<32x256xi1>, vector<32x256xf32>
    %c255_i32_78 = arith.constant 255 : i32
    %224 = tpu.dynamic_rotate %203 by %c255_i32_78 dim 1 : vector<32x256xf32>, i32 -> vector<32x256xf32>
    %cst_79 = arith.constant 0.000000e+00 : f32
    %225 = vector.shape_cast %73 : vector<1x256xi1> to vector<1x256xi1>
    %226 = vector.broadcast %225 : vector<1x256xi1> to vector<32x256xi1>
    %227 = vector.broadcast %cst_79 : f32 to vector<32x256xf32>
    %228 = arith.select %226, %224, %227 : vector<32x256xi1>, vector<32x256xf32>
    %c241_i32_80 = arith.constant 241 : i32
    %229 = tpu.dynamic_rotate %203 by %c241_i32_80 dim 1 : vector<32x256xf32>, i32 -> vector<32x256xf32>
    %cst_81 = arith.constant 0.000000e+00 : f32
    %230 = vector.shape_cast %84 : vector<1x256xi1> to vector<1x256xi1>
    %231 = vector.broadcast %230 : vector<1x256xi1> to vector<32x256xi1>
    %232 = vector.broadcast %cst_81 : f32 to vector<32x256xf32>
    %233 = arith.select %231, %229, %232 : vector<32x256xi1>, vector<32x256xf32>
    %c240_i32_82 = arith.constant 240 : i32
    %234 = tpu.dynamic_rotate %203 by %c240_i32_82 dim 1 : vector<32x256xf32>, i32 -> vector<32x256xf32>
    %cst_83 = arith.constant 0.000000e+00 : f32
    %235 = vector.shape_cast %95 : vector<1x256xi1> to vector<1x256xi1>
    %236 = vector.broadcast %235 : vector<1x256xi1> to vector<32x256xi1>
    %237 = vector.broadcast %cst_83 : f32 to vector<32x256xf32>
    %238 = arith.select %236, %234, %237 : vector<32x256xi1>, vector<32x256xf32>
    %c239_i32_84 = arith.constant 239 : i32
    %239 = tpu.dynamic_rotate %203 by %c239_i32_84 dim 1 : vector<32x256xf32>, i32 -> vector<32x256xf32>
    %cst_85 = arith.constant 0.000000e+00 : f32
    %240 = vector.shape_cast %106 : vector<1x256xi1> to vector<1x256xi1>
    %241 = vector.broadcast %240 : vector<1x256xi1> to vector<32x256xi1>
    %242 = vector.broadcast %cst_85 : f32 to vector<32x256xf32>
    %243 = arith.select %241, %239, %242 : vector<32x256xi1>, vector<32x256xf32>
    %244 = tpu.concatenate %208, %213, %218, %223, %203, %228, %233, %238, %243 in 0 : vector<32x256xf32>, vector<32x256xf32>, vector<32x256xf32>, vector<32x256xf32>, vector<32x256xf32>, vector<32x256xf32>, vector<32x256xf32>, vector<32x256xf32>, vector<32x256xf32> -> vector<288x256xf32>
    %c0_86 = arith.constant 0 : index
    %c0_87 = arith.constant 0 : index
    %245 = vector.load %arg6[%c0_86, %c0_87] : memref<32x288xf32, #tpu.memory_space<vmem>>, vector<32x288xf32>
    %cst_88 = arith.constant dense<0.000000e+00> : vector<32x256xf32>
    %246 = tpu.matmul %245, %244, %cst_88 {dimension_numbers = #tpu.dot_dimension_numbers<[1], [0], [0], [1], [0, 0, 1, 1], [], []>} : vector<32x288xf32>, vector<288x256xf32>, vector<32x256xf32> -> vector<32x256xf32>
    %c0_89 = arith.constant 0 : index
    %c0_90 = arith.constant 0 : index
    %247 = vector.load %arg7[%c0_89, %c0_90] : memref<32x1xf32, #tpu.memory_space<vmem>>, vector<32x1xf32>
    %248 = vector.broadcast %247 : vector<32x1xf32> to vector<32x256xf32>
    %249 = arith.addf %246, %248 : vector<32x256xf32>
    %cst_91 = arith.constant dense<0.000000e+00> : vector<32xf32>
    %250 = vector.multi_reduction <add>, %249, %cst_91 [1] : vector<32x256xf32> to vector<32xf32>
    %251 = vector.shape_cast %250 : vector<32xf32> to vector<32x1xf32>
    %cst_92 = arith.constant 3.906250e-03 : f32
    %252 = vector.broadcast %cst_92 : f32 to vector<32x1xf32>
    %253 = arith.mulf %251, %252 : vector<32x1xf32>
    %c0_93 = arith.constant 0 : index
    %c0_94 = arith.constant 0 : index
    %254 = vector.load %arg8[%c0_93, %c0_94] : memref<8x32xf32, #tpu.memory_space<vmem>>, vector<8x32xf32>
    %cst_95 = arith.constant dense<0.000000e+00> : vector<8x1xf32>
    %255 = tpu.matmul %254, %253, %cst_95 {dimension_numbers = #tpu.dot_dimension_numbers<[1], [0], [0], [1], [0, 0, 1, 1], [], []>} : vector<8x32xf32>, vector<32x1xf32>, vector<8x1xf32> -> vector<8x1xf32>
    %c0_96 = arith.constant 0 : index
    %c0_97 = arith.constant 0 : index
    %256 = vector.load %arg9[%c0_96, %c0_97] : memref<8x1xf32, #tpu.memory_space<vmem>>, vector<8x1xf32>
    %257 = arith.addf %255, %256 : vector<8x1xf32>
    %cst_98 = arith.constant 0.000000e+00 : f32
    %258 = vector.broadcast %cst_98 : f32 to vector<8x1xf32>
    %259 = arith.cmpf oge, %257, %258 : vector<8x1xf32>
    %cst_99 = arith.constant 1.000000e-01 : f32
    %260 = vector.broadcast %cst_99 : f32 to vector<8x1xf32>
    %261 = arith.mulf %260, %257 : vector<8x1xf32>
    %262 = arith.select %259, %257, %261 : vector<8x1xi1>, vector<8x1xf32>
    %c0_100 = arith.constant 0 : index
    %c0_101 = arith.constant 0 : index
    %263 = vector.load %arg10[%c0_100, %c0_101] : memref<32x8xf32, #tpu.memory_space<vmem>>, vector<32x8xf32>
    %cst_102 = arith.constant dense<0.000000e+00> : vector<32x1xf32>
    %264 = tpu.matmul %263, %262, %cst_102 {dimension_numbers = #tpu.dot_dimension_numbers<[1], [0], [0], [1], [0, 0, 1, 1], [], []>} : vector<32x8xf32>, vector<8x1xf32>, vector<32x1xf32> -> vector<32x1xf32>
    %c0_103 = arith.constant 0 : index
    %c0_104 = arith.constant 0 : index
    %265 = vector.load %arg11[%c0_103, %c0_104] : memref<32x1xf32, #tpu.memory_space<vmem>>, vector<32x1xf32>
    %266 = arith.addf %264, %265 : vector<32x1xf32>
    %cst_105 = arith.constant 0.000000e+00 : f32
    %267 = vector.broadcast %cst_105 : f32 to vector<32x1xf32>
    %268 = arith.subf %267, %266 : vector<32x1xf32>
    %269 = math.exp %268 : vector<32x1xf32>
    %cst_106 = arith.constant 1.000000e+00 : f32
    %270 = vector.broadcast %cst_106 : f32 to vector<32x1xf32>
    %271 = arith.addf %270, %269 : vector<32x1xf32>
    %cst_107 = arith.constant 1.000000e+00 : f32
    %272 = vector.broadcast %cst_107 : f32 to vector<32x1xf32>
    %273 = arith.divf %272, %271 : vector<32x1xf32>
    %274 = arith.mulf %273, %253 : vector<32x1xf32>
    %275 = vector.broadcast %274 : vector<32x1xf32> to vector<32x256xf32>
    %276 = arith.addf %152, %275 : vector<32x256xf32>
    %c17_i32_108 = arith.constant 17 : i32
    %277 = tpu.dynamic_rotate %276 by %c17_i32_108 dim 1 : vector<32x256xf32>, i32 -> vector<32x256xf32>
    %cst_109 = arith.constant 0.000000e+00 : f32
    %278 = vector.shape_cast %29 : vector<1x256xi1> to vector<1x256xi1>
    %279 = vector.broadcast %278 : vector<1x256xi1> to vector<32x256xi1>
    %280 = vector.broadcast %cst_109 : f32 to vector<32x256xf32>
    %281 = arith.select %279, %277, %280 : vector<32x256xi1>, vector<32x256xf32>
    %c16_i32_110 = arith.constant 16 : i32
    %282 = tpu.dynamic_rotate %276 by %c16_i32_110 dim 1 : vector<32x256xf32>, i32 -> vector<32x256xf32>
    %cst_111 = arith.constant 0.000000e+00 : f32
    %283 = vector.shape_cast %40 : vector<1x256xi1> to vector<1x256xi1>
    %284 = vector.broadcast %283 : vector<1x256xi1> to vector<32x256xi1>
    %285 = vector.broadcast %cst_111 : f32 to vector<32x256xf32>
    %286 = arith.select %284, %282, %285 : vector<32x256xi1>, vector<32x256xf32>
    %c15_i32_112 = arith.constant 15 : i32
    %287 = tpu.dynamic_rotate %276 by %c15_i32_112 dim 1 : vector<32x256xf32>, i32 -> vector<32x256xf32>
    %cst_113 = arith.constant 0.000000e+00 : f32
    %288 = vector.shape_cast %51 : vector<1x256xi1> to vector<1x256xi1>
    %289 = vector.broadcast %288 : vector<1x256xi1> to vector<32x256xi1>
    %290 = vector.broadcast %cst_113 : f32 to vector<32x256xf32>
    %291 = arith.select %289, %287, %290 : vector<32x256xi1>, vector<32x256xf32>
    %c1_i32_114 = arith.constant 1 : i32
    %292 = tpu.dynamic_rotate %276 by %c1_i32_114 dim 1 : vector<32x256xf32>, i32 -> vector<32x256xf32>
    %cst_115 = arith.constant 0.000000e+00 : f32
    %293 = vector.shape_cast %62 : vector<1x256xi1> to vector<1x256xi1>
    %294 = vector.broadcast %293 : vector<1x256xi1> to vector<32x256xi1>
    %295 = vector.broadcast %cst_115 : f32 to vector<32x256xf32>
    %296 = arith.select %294, %292, %295 : vector<32x256xi1>, vector<32x256xf32>
    %c255_i32_116 = arith.constant 255 : i32
    %297 = tpu.dynamic_rotate %276 by %c255_i32_116 dim 1 : vector<32x256xf32>, i32 -> vector<32x256xf32>
    %cst_117 = arith.constant 0.000000e+00 : f32
    %298 = vector.shape_cast %73 : vector<1x256xi1> to vector<1x256xi1>
    %299 = vector.broadcast %298 : vector<1x256xi1> to vector<32x256xi1>
    %300 = vector.broadcast %cst_117 : f32 to vector<32x256xf32>
    %301 = arith.select %299, %297, %300 : vector<32x256xi1>, vector<32x256xf32>
    %c241_i32_118 = arith.constant 241 : i32
    %302 = tpu.dynamic_rotate %276 by %c241_i32_118 dim 1 : vector<32x256xf32>, i32 -> vector<32x256xf32>
    %cst_119 = arith.constant 0.000000e+00 : f32
    %303 = vector.shape_cast %84 : vector<1x256xi1> to vector<1x256xi1>
    %304 = vector.broadcast %303 : vector<1x256xi1> to vector<32x256xi1>
    %305 = vector.broadcast %cst_119 : f32 to vector<32x256xf32>
    %306 = arith.select %304, %302, %305 : vector<32x256xi1>, vector<32x256xf32>
    %c240_i32_120 = arith.constant 240 : i32
    %307 = tpu.dynamic_rotate %276 by %c240_i32_120 dim 1 : vector<32x256xf32>, i32 -> vector<32x256xf32>
    %cst_121 = arith.constant 0.000000e+00 : f32
    %308 = vector.shape_cast %95 : vector<1x256xi1> to vector<1x256xi1>
    %309 = vector.broadcast %308 : vector<1x256xi1> to vector<32x256xi1>
    %310 = vector.broadcast %cst_121 : f32 to vector<32x256xf32>
    %311 = arith.select %309, %307, %310 : vector<32x256xi1>, vector<32x256xf32>
    %c239_i32_122 = arith.constant 239 : i32
    %312 = tpu.dynamic_rotate %276 by %c239_i32_122 dim 1 : vector<32x256xf32>, i32 -> vector<32x256xf32>
    %cst_123 = arith.constant 0.000000e+00 : f32
    %313 = vector.shape_cast %106 : vector<1x256xi1> to vector<1x256xi1>
    %314 = vector.broadcast %313 : vector<1x256xi1> to vector<32x256xi1>
    %315 = vector.broadcast %cst_123 : f32 to vector<32x256xf32>
    %316 = arith.select %314, %312, %315 : vector<32x256xi1>, vector<32x256xf32>
    %317 = tpu.concatenate %281, %286, %291, %296, %276, %301, %306, %311, %316 in 0 : vector<32x256xf32>, vector<32x256xf32>, vector<32x256xf32>, vector<32x256xf32>, vector<32x256xf32>, vector<32x256xf32>, vector<32x256xf32>, vector<32x256xf32>, vector<32x256xf32> -> vector<288x256xf32>
    %c0_124 = arith.constant 0 : index
    %c0_125 = arith.constant 0 : index
    %318 = vector.load %arg12[%c0_124, %c0_125] : memref<32x288xf32, #tpu.memory_space<vmem>>, vector<32x288xf32>
    %cst_126 = arith.constant dense<0.000000e+00> : vector<32x256xf32>
    %319 = tpu.matmul %318, %317, %cst_126 {dimension_numbers = #tpu.dot_dimension_numbers<[1], [0], [0], [1], [0, 0, 1, 1], [], []>} : vector<32x288xf32>, vector<288x256xf32>, vector<32x256xf32> -> vector<32x256xf32>
    %c0_127 = arith.constant 0 : index
    %c0_128 = arith.constant 0 : index
    %320 = vector.load %arg13[%c0_127, %c0_128] : memref<32x1xf32, #tpu.memory_space<vmem>>, vector<32x1xf32>
    %321 = vector.broadcast %320 : vector<32x1xf32> to vector<32x256xf32>
    %322 = arith.addf %319, %321 : vector<32x256xf32>
    %c0_129 = arith.constant 0 : index
    %c0_130 = arith.constant 0 : index
    %c0_131 = arith.constant 0 : index
    %323 = vector.load %arg14[%c0_129, %c0_130, %c0_131] : memref<1x32x256xf32, #tpu.memory_space<vmem>>, vector<1x32x256xf32>
    %324 = vector.shape_cast %323 : vector<1x32x256xf32> to vector<32x256xf32>
    %325 = vector.shape_cast %322 : vector<32x256xf32> to vector<1x32x256xf32>
    tpu.vector_store %arg14[%c0_129, %c0_130, %c0_131], %325 {strides = array<i32>} : memref<1x32x256xf32, #tpu.memory_space<vmem>>, vector<1x32x256xf32>,
    return
  }
  func.func @transform_0(%arg0: i32) -> (i32, i32, i32) {
    %c0_i32 = arith.constant 0 : i32
    %c0_i32_0 = arith.constant 0 : i32
    %c0_i32_1 = arith.constant 0 : i32
    return %arg0, %c0_i32, %c0_i32_0 : i32, i32, i32
  }
  func.func @transform_1(%arg0: i32) -> (i32, i32) {
    %c0_i32 = arith.constant 0 : i32
    %c0_i32_0 = arith.constant 0 : i32
    %c0_i32_1 = arith.constant 0 : i32
    return %c0_i32, %c0_i32_0 : i32, i32
  }
  func.func @transform_2(%arg0: i32) -> (i32, i32) {
    %c0_i32 = arith.constant 0 : i32
    %c0_i32_0 = arith.constant 0 : i32
    %c0_i32_1 = arith.constant 0 : i32
    return %c0_i32, %c0_i32_0 : i32, i32
  }
  func.func @transform_3(%arg0: i32) -> (i32, i32) {
    %c0_i32 = arith.constant 0 : i32
    %c0_i32_0 = arith.constant 0 : i32
    %c0_i32_1 = arith.constant 0 : i32
    return %c0_i32, %c0_i32_0 : i32, i32
  }
  func.func @transform_4(%arg0: i32) -> (i32, i32) {
    %c0_i32 = arith.constant 0 : i32
    %c0_i32_0 = arith.constant 0 : i32
    %c0_i32_1 = arith.constant 0 : i32
    return %c0_i32, %c0_i32_0 : i32, i32
  }
  func.func @transform_5(%arg0: i32) -> (i32, i32) {
    %c0_i32 = arith.constant 0 : i32
    %c0_i32_0 = arith.constant 0 : i32
    %c0_i32_1 = arith.constant 0 : i32
    return %c0_i32, %c0_i32_0 : i32, i32
  }
  func.func @transform_6(%arg0: i32) -> (i32, i32) {
    %c0_i32 = arith.constant 0 : i32
    %c0_i32_0 = arith.constant 0 : i32
    %c0_i32_1 = arith.constant 0 : i32
    return %c0_i32, %c0_i32_0 : i32, i32
  }
  func.func @transform_7(%arg0: i32) -> (i32, i32) {
    %c0_i32 = arith.constant 0 : i32
    %c0_i32_0 = arith.constant 0 : i32
    %c0_i32_1 = arith.constant 0 : i32
    return %c0_i32, %c0_i32_0 : i32, i32
  }
  func.func @transform_8(%arg0: i32) -> (i32, i32) {
    %c0_i32 = arith.constant 0 : i32
    %c0_i32_0 = arith.constant 0 : i32
    %c0_i32_1 = arith.constant 0 : i32
    return %c0_i32, %c0_i32_0 : i32, i32
  }
  func.func @transform_9(%arg0: i32) -> (i32, i32) {
    %c0_i32 = arith.constant 0 : i32
    %c0_i32_0 = arith.constant 0 : i32
    %c0_i32_1 = arith.constant 0 : i32
    return %c0_i32, %c0_i32_0 : i32, i32
  }
  func.func @transform_10(%arg0: i32) -> (i32, i32) {
    %c0_i32 = arith.constant 0 : i32
    %c0_i32_0 = arith.constant 0 : i32
    %c0_i32_1 = arith.constant 0 : i32
    return %c0_i32, %c0_i32_0 : i32, i32
  }
  func.func @transform_11(%arg0: i32) -> (i32, i32) {
    %c0_i32 = arith.constant 0 : i32
    %c0_i32_0 = arith.constant 0 : i32
    %c0_i32_1 = arith.constant 0 : i32
    return %c0_i32, %c0_i32_0 : i32, i32
  }
  func.func @transform_12(%arg0: i32) -> (i32, i32) {
    %c0_i32 = arith.constant 0 : i32
    %c0_i32_0 = arith.constant 0 : i32
    %c0_i32_1 = arith.constant 0 : i32
    return %c0_i32, %c0_i32_0 : i32, i32
  }
  func.func @transform_13(%arg0: i32) -> (i32, i32, i32) {
    %c0_i32 = arith.constant 0 : i32
    %c0_i32_0 = arith.constant 0 : i32
    %c0_i32_1 = arith.constant 0 : i32
    return %arg0, %c0_i32, %c0_i32_0 : i32, i32, i32
  }
}

</mosaic_0001>

<bundles_post_ra>
// kernel: refine_forward.1
= control target key start
LH: loop header
LB: loop body
LE: loop exit
PB: predicated region body
PF: predicated region fallthrough
CT: control target
= control target key end

     0   :  { %s3253_s25 = smov 0   ;;  %s5454_s0 = inlined_call_operand.vmem [shape: f32[2,32,256], index: 0, kind: input, shape index: {}]   ;;  %s5455_s1 = inlined_call_operand.vmem [shape: f32[32,288], index: 1, kind: input, shape index: {}]   ;;  %s5456_s2 = inlined_call_operand.vmem [shape: f32[32,1], index: 2, kind: input, shape index: {}]   ;;  %s5457_s3 = inlined_call_operand.vmem [shape: f32[32,288], index: 3, kind: input, shape index: {}]   ;;  %s5458_s4 = inlined_call_operand.vmem [shape: f32[32,1], index: 4, kind: input, shape index: {}]   ;;  %s5459_s5 = inlined_call_operand.vmem [shape: f32[32,288], index: 5, kind: input, shape index: {}]   ;;  %s5460_s6 = inlined_call_operand.vmem [shape: f32[32,1], index: 6, kind: input, shape index: {}]   ;;  %s5461_s7 = inlined_call_operand.vmem [shape: f32[8,32], index: 7, kind: input, shape index: {}]   ;;  %s5462_s8 = inlined_call_operand.vmem [shape: f32[8,1], index: 8, kind: input, shape index: {}]   ;;  %s5463_s9 = inlined_call_operand.vmem [shape: f32[32,8], index: 9, kind: input, shape index: {}]   ;;  %s5464_s10 = inlined_call_operand.vmem [shape: f32[32,1], index: 10, kind: input, shape index: {}]   ;;  %s5465_s11 = inlined_call_operand.vmem [shape: f32[32,288], index: 11, kind: input, shape index: {}]   ;;  %s5466_s12 = inlined_call_operand.vmem [shape: f32[32,1], index: 12, kind: input, shape index: {}]   ;;  %s5467_s13 = inlined_call_operand.vmem [shape: f32[2,32,256], index: 13, kind: output, shape index: {}]  }
   0x1 LB: > { %s2840_s26 = sadd.s32 4294967295, %s3170_s25   ;;  %p2844_p0 = scmp.ge.s32.totalorder %s3170_s25, 1  ;;  %s3170_s25 = sphi %s3253_s25, %s23_s25  }
   0x2   : > { %p387_p1 = scmp.lt.s32.totalorder %s3170_s25, 3 }
   0x4   : > { %p388_p2 = pnand %p2844_p0, %p387_p1 }
   0x5   : > { %p431_p3 = scmp.lt.s32.totalorder (!%p388_p2), %s2840_s26, 1  ;;  %s3172_s14 = smov (!%p388_p2), 1  }
   0x6   : > { %391 = sbr.rel (%p388_p2) target bundleno = 2514 (0x9d2), region = 72  ;;  %s3173_s15 = smov (!%p388_p2), 15  }
   0x7   : > { %s3174_s16 = smov (!%p388_p2), 16   ;;  %s3175_s17 = smov (!%p388_p2), 17  }
   0x8   : > { %s3176_s18 = smov (!%p388_p2), 112   ;;  %s3177_s19 = smov (!%p388_p2), 113  }
   0x9   : > { %s3178_s20 = smov (!%p388_p2), 127   ;;  %s5479_s23 = smov (!%p388_p2), 111  }
   0xb   : > { %s5635_s26 = smov (!%p431_p3, %s2840_s26), 1  ;;  %v449_v8 = vlaneseq  ;;  %v825_v10 = vld [vmem:[%s5455_s1 + $0x8] sm:$0xff]  ;;  %v5476_v16 = vmov 0.0   ;;  %v839_v34 = vld [vmem:[%s5456_s2 + $0x18] sm:$0xff]  ;;  %v3181_v35 = vmov 0   ;;  %v838_v36 = vld [vmem:[%s5456_s2 + $0x10] sm:$0xff] }
   0xc   : > { %s5478_s27 = sshll.u32 %s5635_s26, 6  ;;  %937 = vmatprep.mubr.f32.mxu0 %v825_v10  ;;  %1026 = vmatprep.mubr.f32.mxu1 %v5476_v16  ;;  %v836_v41 = vld [vmem:[%s5456_s2] sm:$0xff]  ;;  %v837_v44 = vld [vmem:[%s5456_s2 + $0x8] sm:$0xff] }
   0xd   : > { %s435_s30 = scalar_lea.vmem %s5454_s0, %s5478_s27  ;;  %v3393_v9 = vand.u32 127, %v449_v8  ;;  %3146 = vset.pattern.permute.xlu0 %v3181_v35  ;;  %3147 = vset.pattern.permute.xlu1 %v3181_v35  ;;  %v2560_v29 = vld [vmem:[%s5465_s11 + $0x48] sm:$0xff] }
   0xe   : > { %v3269_v0 = vld [vmem:[%s435_s30 + $0x30] sm:$0xff]  ;;  %v3271_v1 = vld [vmem:[%s435_s30 + $0x20] sm:$0xff]  ;;  %v3277_v2 = vld [vmem:[%s435_s30 + $0x38] sm:$0xff] }
   0xf   : > { %645 = vrot.lane.b32.xlu0 %v3269_v0, %s3172_s14  ;;  %643 = vrot.lane.b32.xlu1 %v3271_v1, %s3172_s14  ;;  %v3279_v3 = vld [vmem:[%s435_s30 + $0x28] sm:$0xff]  ;;  %v3285_v4 = vld [vmem:[%s435_s30 + $0x18] sm:$0xff]  ;;  %v3403_v11 = vadd.s32 128, %v3393_v9  ;;  %v456_v15 = vand.u32 15, %v3393_v9  ;;  %vm5475_vm0 = vcmp.lt.s32.totalorder %v3393_v9, 1  ;;  %vm5471_vm4 = vcmp.ge.s32.totalorder %v3393_v9, 16 }
  0x10   : > { %v3287_v5 = vld [vmem:[%s435_s30 + $0x10] sm:$0xff]  ;;  %v3293_v6 = vld [vmem:[%s435_s30 + $0x8] sm:$0xff]  ;;  %v3295_v7 = vld [vmem:[%s435_s30] sm:$0xff]  ;;  %vm5474_vm5 = vcmp.lt.s32.totalorder %v3393_v9, 15  ;;  %vm5472_vm8 = vcmp.lt.s32.totalorder %v3393_v9, 16  ;;  %vm5473_vm9 = vcmp.lt.s32.totalorder %v3393_v9, 17 }
  0x11   : > { %v463_v12 = vand.u32 15, %v3403_v11  ;;  %vm3421_vm2 = vcmp.ge.s32.totalorder %v456_v15, 1  ;;  %vm3457_vm3 = vcmp.lt.s32.totalorder %v456_v15, 15  ;;  %vm5469_vm11 = vcmp.lt.s32.totalorder %v3393_v9, 112 }
  0x12   : > { %vm3485_vm7 = vmand %vm5471_vm4, %vm3457_vm3  ;;  %vm519_vm12 = vcmp.lt.s32.totalorder %v3403_v11, 240  ;;  %vm5468_vm13 = vcmp.lt.s32.totalorder %v3393_v9, 113  ;;  %vm5470_vm15 = vcmp.lt.s32.totalorder %v3393_v9, 127 }
  0x13   : > { %653 = vrot.lane.b32.xlu0 %v3277_v2, %s3172_s14  ;;  %651 = vrot.lane.b32.xlu1 %v3279_v3, %s3172_s14  ;;  %vm3417_vm1 = vcmp.ge.s32.totalorder %v463_v12, 1  ;;  %vm3477_vm6 = vcmp.lt.s32.totalorder %v463_v12, 15  ;;  %vm3557_vm10 = vmand %vm5471_vm4, %vm3421_vm2 }
  0x14   : > { %vm3624_vm14 = vmand %vm519_vm12, %vm3417_vm1 }
  0x17   : > { %649 = vrot.lane.b32.xlu1 %v3285_v4, %s3172_s14  ;;  %641 = vrot.lane.b32.xlu0 %v3287_v5, %s3172_s14 }
  0x1b   : > { %647 = vrot.lane.b32.xlu1 %v3293_v6, %s3172_s14  ;;  %639 = vrot.lane.b32.xlu0 %v3295_v7, %s3172_s14 }
  0x1f   : > { %616 = vrot.lane.b32.xlu1 %v3277_v2, %s3173_s15  ;;  %608 = vrot.lane.b32.xlu0 %v3269_v0, %s3173_s15 }
  0x23   : > { %614 = vrot.lane.b32.xlu1 %v3279_v3, %s3173_s15  ;;  %606 = vrot.lane.b32.xlu0 %v3271_v1, %s3173_s15 }
  0x27   : > { %612 = vrot.lane.b32.xlu1 %v3285_v4, %s3173_s15  ;;  %604 = vrot.lane.b32.xlu0 %v3287_v5, %s3173_s15 }
  0x2b   : > { %610 = vrot.lane.b32.xlu1 %v3293_v6, %s3173_s15  ;;  %602 = vrot.lane.b32.xlu0 %v3295_v7, %s3173_s15 }
  0x2f   : > { %579 = vrot.lane.b32.xlu1 %v3277_v2, %s3174_s16  ;;  %571 = vrot.lane.b32.xlu0 %v3269_v0, %s3174_s16 }
  0x33   : > { %577 = vrot.lane.b32.xlu1 %v3279_v3, %s3174_s16  ;;  %569 = vrot.lane.b32.xlu0 %v3271_v1, %s3174_s16 }
  0x37   : > { %575 = vrot.lane.b32.xlu1 %v3285_v4, %s3174_s16  ;;  %567 = vrot.lane.b32.xlu0 %v3287_v5, %s3174_s16 }
  0x3b   : > { %573 = vrot.lane.b32.xlu1 %v3293_v6, %s3174_s16  ;;  %565 = vrot.lane.b32.xlu0 %v3295_v7, %s3174_s16 }
  0x3f   : > { %542 = vrot.lane.b32.xlu1 %v3277_v2, %s3175_s17  ;;  %534 = vrot.lane.b32.xlu0 %v3269_v0, %s3175_s17 }
  0x43   : > { %540 = vrot.lane.b32.xlu1 %v3279_v3, %s3175_s17  ;;  %532 = vrot.lane.b32.xlu0 %v3271_v1, %s3175_s17 }
  0x47   : > { %538 = vrot.lane.b32.xlu1 %v3285_v4, %s3175_s17  ;;  %530 = vrot.lane.b32.xlu0 %v3287_v5, %s3175_s17 }
  0x4b   : > { %536 = vrot.lane.b32.xlu1 %v3293_v6, %s3175_s17  ;;  %528 = vrot.lane.b32.xlu0 %v3295_v7, %s3175_s17 }
  0x4f   : > { %764 = vrot.lane.b32.xlu1 %v3277_v2, %s3176_s18  ;;  %756 = vrot.lane.b32.xlu0 %v3269_v0, %s3176_s18 }
  0x53   : > { %762 = vrot.lane.b32.xlu1 %v3279_v3, %s3176_s18  ;;  %754 = vrot.lane.b32.xlu0 %v3271_v1, %s3176_s18 }
  0x57   : > { %760 = vrot.lane.b32.xlu1 %v3285_v4, %s3176_s18  ;;  %752 = vrot.lane.b32.xlu0 %v3287_v5, %s3176_s18 }
  0x5b   : > { %758 = vrot.lane.b32.xlu1 %v3293_v6, %s3176_s18  ;;  %750 = vrot.lane.b32.xlu0 %v3295_v7, %s3176_s18 }
  0x5f   : > { %727 = vrot.lane.b32.xlu1 %v3277_v2, %s3177_s19  ;;  %719 = vrot.lane.b32.xlu0 %v3269_v0, %s3177_s19 }
  0x63   : > { %725 = vrot.lane.b32.xlu1 %v3279_v3, %s3177_s19  ;;  %717 = vrot.lane.b32.xlu0 %v3271_v1, %s3177_s19 }
  0x67   : > { %723 = vrot.lane.b32.xlu1 %v3285_v4, %s3177_s19  ;;  %715 = vrot.lane.b32.xlu0 %v3287_v5, %s3177_s19 }
  0x6b   : > { %721 = vrot.lane.b32.xlu1 %v3293_v6, %s3177_s19  ;;  %713 = vrot.lane.b32.xlu0 %v3295_v7, %s3177_s19 }
  0x6f   : > { %690 = vrot.lane.b32.xlu1 %v3277_v2, %s3178_s20  ;;  %682 = vrot.lane.b32.xlu0 %v3269_v0, %s3178_s20 }
  0x73   : > { %688 = vrot.lane.b32.xlu1 %v3279_v3, %s3178_s20  ;;  %680 = vrot.lane.b32.xlu0 %v3271_v1, %s3178_s20 }
  0x77   : > { %686 = vrot.lane.b32.xlu1 %v3285_v4, %s3178_s20  ;;  %678 = vrot.lane.b32.xlu0 %v3287_v5, %s3178_s20 }
  0x7b   : > { %684 = vrot.lane.b32.xlu1 %v3293_v6, %s3178_s20  ;;  %676 = vrot.lane.b32.xlu0 %v3295_v7, %s3178_s20 }
  0x7f   : > { %801 = vrot.lane.b32.xlu1 %v3277_v2, %s5479_s23  ;;  %793 = vrot.lane.b32.xlu0 %v3269_v0, %s5479_s23 }
  0x81   : > { %v646_v13 = vpop.permute.xlu0 %645  ;;  %v644_v14 = vpop.permute.xlu1 %643 }
  0x83   : > { %799 = vrot.lane.b32.xlu1 %v3279_v3, %s5479_s23  ;;  %791 = vrot.lane.b32.xlu0 %v3271_v1, %s5479_s23 }
  0x85   : > { %v654_v18 = vpop.permute.xlu0 %653  ;;  %v652_v19 = vpop.permute.xlu1 %651 }
  0x86   : > { %v659_v21 = vsel %vm5475_vm0, %v646_v13, %v654_v18  ;;  %v663_v22 = vsel %vm5475_vm0, %v654_v18, %v646_v13  ;;  %v658_v23 = vsel %vm5475_vm0, %v644_v14, %v652_v19  ;;  %v662_v26 = vsel %vm5475_vm0, %v652_v19, %v644_v14 }
  0x87   : > { %2849 = vmatprep.subr.msk.mxu0 %vm3417_vm1, %v659_v21  ;;  %797 = vrot.lane.b32.xlu1 %v3285_v4, %s5479_s23 }
  0x88   : > { %789 = vrot.lane.b32.xlu0 %v3287_v5, %s5479_s23  ;;  %2850 = vmatpush1.msk.msra.mxu0 %vm3421_vm2, %v663_v22 }
  0x89   : > { %2851 = vmatprep.subr.msk.mxu0 %vm3417_vm1, %v658_v23  ;;  %v650_v24 = vpop.permute.xlu1 %649  ;;  %v642_v25 = vpop.permute.xlu0 %641 }
  0x8a   : > { %2852 = vmatpush1.msk.msra.mxu0 %vm3421_vm2, %v662_v26  ;;  %v657_v27 = vsel %vm5475_vm0, %v642_v25, %v650_v24  ;;  %v661_v28 = vsel %vm5475_vm0, %v650_v24, %v642_v25 }
  0x8b   : > { %2853 = vmatprep.subr.msk.mxu0 %vm3417_vm1, %v657_v27  ;;  %795 = vrot.lane.b32.xlu1 %v3293_v6, %s5479_s23 }
  0x8c   : > { %787 = vrot.lane.b32.xlu0 %v3295_v7, %s5479_s23  ;;  %2854 = vmatpush1.msk.msra.mxu0 %vm3421_vm2, %v661_v28 }
  0x8d   : > { %v648_v30 = vpop.permute.xlu1 %647  ;;  %v640_v31 = vpop.permute.xlu0 %639 }
  0x8e   : > { %v656_v32 = vsel %vm5475_vm0, %v640_v31, %v648_v30  ;;  %v660_v33 = vsel %vm5475_vm0, %v648_v30, %v640_v31 }
  0x8f   : > { %2855 = vmatprep.subr.msk.mxu0 %vm3417_vm1, %v656_v32  ;;  %852 = vperm.xlu1 %3147, %v838_v36  }
  0x90   : > { %2856 = vmatpush1.msk.msra.mxu0 %vm3421_vm2, %v660_v33  ;;  %857 = vperm.xlu0 %3146, %v839_v34  }
  0x91   : > { %v617_v38 = vpop.permute.xlu1 %616  ;;  %v609_v39 = vpop.permute.xlu0 %608 }
  0x92   : > { %v622_v42 = vsel %vm5474_vm5, %v609_v39, %v617_v38  ;;  %v626_v43 = vsel %vm5474_vm5, %v617_v38, %v609_v39 }
  0x93   : > { %2857 = vmatprep.subr.msk.mxu0 %vm3477_vm6, %v622_v42  ;;  %847 = vperm.xlu1 %3147, %v837_v44  }
  0x94   : > { %2858 = vmatpush1.msk.msra.mxu0 %vm3485_vm7, %v626_v43  ;;  %842 = vperm.xlu0 %3146, %v836_v41  }
  0x95   : > { %v615_v45 = vpop.permute.xlu1 %614  ;;  %v607_v46 = vpop.permute.xlu0 %606 }
  0x96   : > { %v621_v47 = vsel %vm5474_vm5, %v607_v46, %v615_v45  ;;  %v625_v48 = vsel %vm5474_vm5, %v615_v45, %v607_v46 }
  0x97   : > { %2859 = vmatprep.subr.msk.mxu0 %vm3477_vm6, %v621_v47 }
  0x98   : > { %2860 = vmatpush1.msk.msra.mxu0 %vm3485_vm7, %v625_v48 }
  0x99   : > { %v613_v49 = vpop.permute.xlu1 %612  ;;  %v605_v50 = vpop.permute.xlu0 %604 }
  0x9a   : > { %v620_v51 = vsel %vm5474_vm5, %v605_v50, %v613_v49  ;;  %v624_v52 = vsel %vm5474_vm5, %v613_v49, %v605_v50 }
  0x9b   : > { %2861 = vmatprep.subr.msk.mxu0 %vm3477_vm6, %v620_v51 }
  0x9c   : > { %2862 = vmatpush1.msk.msra.mxu0 %vm3485_vm7, %v624_v52 }
  0x9d   : > { %v611_v53 = vpop.permute.xlu1 %610  ;;  %v603_v54 = vpop.permute.xlu0 %602 }
  0x9e   : > { %v619_v55 = vsel %vm5474_vm5, %v603_v54, %v611_v53  ;;  %v623_v56 = vsel %vm5474_vm5, %v611_v53, %v603_v54 }
  0x9f   : > { %2863 = vmatprep.subr.msk.mxu0 %vm3477_vm6, %v619_v55 }
  0xa0   : > { %2864 = vmatpush1.msk.msra.mxu0 %vm3485_vm7, %v623_v56 }
  0xa1   : > { %v580_v57 = vpop.permute.xlu1 %579  ;;  %v572_v58 = vpop.permute.xlu0 %571 }
  0xa2   : > { %v585_v59 = vsel %vm5472_vm8, %v572_v58, %v580_v57  ;;  %v589_v60 = vsel %vm5472_vm8, %v580_v57, %v572_v58 }
  0xa3   : > { %889 = vmatprep.subr.mxu0 %v585_v59 }
  0xa4   : > { %2865 = vmatpush1.msk.msra.mxu0 %vm5471_vm4, %v589_v60 }
  0xa5   : > { %v578_v61 = vpop.permute.xlu1 %577  ;;  %v570_v62 = vpop.permute.xlu0 %569 }
  0xa6   : > { %v584_v63 = vsel %vm5472_vm8, %v570_v62, %v578_v61  ;;  %v588_v8 = vsel %vm5472_vm8, %v578_v61, %v570_v62 }
  0xa7   : > { %891 = vmatprep.subr.mxu0 %v584_v63 }
  0xa8   : > { %2866 = vmatpush1.msk.msra.mxu0 %vm5471_vm4, %v588_v8 }
  0xa9   : > { %v576_v10 = vpop.permute.xlu1 %575  ;;  %v568_v12 = vpop.permute.xlu0 %567 }
  0xaa   : > { %v583_v13 = vsel %vm5472_vm8, %v568_v12, %v576_v10  ;;  %v587_v14 = vsel %vm5472_vm8, %v576_v10, %v568_v12 }
  0xab   : > { %893 = vmatprep.subr.mxu0 %v583_v13 }
  0xac   : > { %2867 = vmatpush1.msk.msra.mxu0 %vm5471_vm4, %v587_v14 }
  0xad   : > { %v574_v15 = vpop.permute.xlu1 %573  ;;  %v566_v18 = vpop.permute.xlu0 %565 }
  0xae   : > { %v582_v19 = vsel %vm5472_vm8, %v566_v18, %v574_v15  ;;  %v586_v21 = vsel %vm5472_vm8, %v574_v15, %v566_v18 }
  0xaf   : > { %895 = vmatprep.subr.mxu0 %v582_v19 }
  0xb0   : > { %2868 = vmatpush1.msk.msra.mxu0 %vm5471_vm4, %v586_v21 }
  0xb1   : > { %v543_v22 = vpop.permute.xlu1 %542  ;;  %v535_v23 = vpop.permute.xlu0 %534 }
  0xb2   : > { %v548_v25 = vsel %vm5473_vm9, %v535_v23, %v543_v22  ;;  %v552_v26 = vsel %vm5473_vm9, %v543_v22, %v535_v23 }
  0xb3   : > { %2869 = vmatprep.subr.msk.mxu0 %vm3417_vm1, %v548_v25 }
  0xb4   : > { %2870 = vmatpush1.msk.msra.mxu0 %vm3557_vm10, %v552_v26 }
  0xb5   : > { %v541_v27 = vpop.permute.xlu1 %540  ;;  %v533_v28 = vpop.permute.xlu0 %532 }
  0xb6   : > { %v547_v30 = vsel %vm5473_vm9, %v533_v28, %v541_v27  ;;  %v551_v31 = vsel %vm5473_vm9, %v541_v27, %v533_v28 }
  0xb7   : > { %2871 = vmatprep.subr.msk.mxu0 %vm3417_vm1, %v547_v30 }
  0xb8   : > { %2872 = vmatpush1.msk.msra.mxu0 %vm3557_vm10, %v551_v31 }
  0xb9   : > { %v539_v32 = vpop.permute.xlu1 %538  ;;  %v531_v33 = vpop.permute.xlu0 %530 }
  0xba   : > { %v546_v34 = vsel %vm5473_vm9, %v531_v33, %v539_v32  ;;  %v550_v35 = vsel %vm5473_vm9, %v539_v32, %v531_v33 }
  0xbb   : > { %2873 = vmatprep.subr.msk.mxu0 %vm3417_vm1, %v546_v34 }
  0xbc   : > { %2874 = vmatpush1.msk.msra.mxu0 %vm3557_vm10, %v550_v35 }
  0xbd   : > { %v537_v36 = vpop.permute.xlu1 %536  ;;  %v529_v38 = vpop.permute.xlu0 %528 }
  0xbe   : > { %v545_v39 = vsel %vm5473_vm9, %v529_v38, %v537_v36  ;;  %v549_v41 = vsel %vm5473_vm9, %v537_v36, %v529_v38 }
  0xbf   : > { %2875 = vmatprep.subr.msk.mxu0 %vm3417_vm1, %v545_v39 }
  0xc0   : > { %2876 = vmatpush1.msk.msra.mxu0 %vm3557_vm10, %v549_v41 }
  0xc1   : > { %v765_v42 = vpop.permute.xlu1 %764  ;;  %v757_v43 = vpop.permute.xlu0 %756 }
  0xc2   : > { %v774_v44 = vsel %vm5469_vm11, %v765_v42, %v757_v43  ;;  %v770_v45 = vsel %vm5469_vm11, %v757_v43, %v765_v42 }
  0xc3   : > { %2877 = vmatprep.subr.msk.mxu0 %vm519_vm12, %v774_v44  ;;  %v2556_v44 = vld [vmem:[%s5465_s11 + $0x28] sm:$0xff] }
  0xc4   : > { %906 = vmatpush2.msra.mxu0 %v770_v45 }
  0xc5   : > { %v763_v46 = vpop.permute.xlu1 %762  ;;  %v755_v47 = vpop.permute.xlu0 %754 }
  0xc6   : > { %v773_v48 = vsel %vm5469_vm11, %v763_v46, %v755_v47  ;;  %v769_v49 = vsel %vm5469_vm11, %v755_v47, %v763_v46 }
  0xc7   : > { %2878 = vmatprep.subr.msk.mxu0 %vm519_vm12, %v773_v48 }
  0xc8   : > { %908 = vmatpush2.msra.mxu0 %v769_v49 }
  0xc9   : > { %v761_v50 = vpop.permute.xlu1 %760  ;;  %v753_v51 = vpop.permute.xlu0 %752 }
  0xca   : > { %v772_v52 = vsel %vm5469_vm11, %v761_v50, %v753_v51  ;;  %v768_v53 = vsel %vm5469_vm11, %v753_v51, %v761_v50  ;;  %v824_v50 = vld [vmem:[%s5455_s1] sm:$0xff] }
  0xcb   : > { %2879 = vmatprep.subr.msk.mxu0 %vm519_vm12, %v772_v52 }
  0xcc   : > { %910 = vmatpush2.msra.mxu0 %v768_v53 }
  0xcd   : > { %v759_v54 = vpop.permute.xlu1 %758  ;;  %v751_v55 = vpop.permute.xlu0 %750 }
  0xce   : > { %v771_v56 = vsel %vm5469_vm11, %v759_v54, %v751_v55  ;;  %v767_v57 = vsel %vm5469_vm11, %v751_v55, %v759_v54  ;;  %vm3698_vm11 = vmand %vm519_vm12, %vm3477_vm6  ;;  %v830_v55 = vld [vmem:[%s5455_s1 + $0x30] sm:$0xff] }
  0xcf   : > { %2880 = vmatprep.subr.msk.mxu0 %vm519_vm12, %v771_v56 }
  0xd0   : > { %912 = vmatpush2.msra.mxu0 %v767_v57 }
  0xd1   : > { %v728_v59 = vpop.permute.xlu1 %727  ;;  %v720_v60 = vpop.permute.xlu0 %719 }
  0xd2   : > { %v737_v61 = vsel %vm5468_vm13, %v728_v59, %v720_v60  ;;  %v733_v62 = vsel %vm5468_vm13, %v720_v60, %v728_v59  ;;  %v826_v59 = vld [vmem:[%s5455_s1 + $0x10] sm:$0xff] }
  0xd3   : > { %2881 = vmatprep.subr.msk.mxu0 %vm3624_vm14, %v737_v61  ;;  %v834_v60 = vld [vmem:[%s5455_s1 + $0x50] sm:$0xff]  ;;  %v833_v61 = vld [vmem:[%s5455_s1 + $0x48] sm:$0xff] }
  0xd4   : > { %2882 = vmatpush2.msk.msra.mxu0 %vm3421_vm2, %v733_v62  ;;  %v829_v62 = vld [vmem:[%s5455_s1 + $0x28] sm:$0xff] }
  0xd5   : > { %v726_v63 = vpop.permute.xlu1 %725  ;;  %v718_v8 = vpop.permute.xlu0 %717 }
  0xd6   : > { %v736_v10 = vsel %vm5468_vm13, %v726_v63, %v718_v8  ;;  %v732_v12 = vsel %vm5468_vm13, %v718_v8, %v726_v63  ;;  %v832_v63 = vld [vmem:[%s5455_s1 + $0x40] sm:$0xff]  ;;  %v835_v8 = vld [vmem:[%s5455_s1 + $0x58] sm:$0xff] }
  0xd7   : > { %2883 = vmatprep.subr.msk.mxu0 %vm3624_vm14, %v736_v10 }
  0xd8   : > { %2884 = vmatpush2.msk.msra.mxu0 %vm3421_vm2, %v732_v12 }
  0xd9   : > { %v724_v13 = vpop.permute.xlu1 %723  ;;  %v716_v14 = vpop.permute.xlu0 %715 }
  0xda   : > { %v735_v15 = vsel %vm5468_vm13, %v724_v13, %v716_v14  ;;  %v731_v18 = vsel %vm5468_vm13, %v716_v14, %v724_v13 }
  0xdb   : > { %2885 = vmatprep.subr.msk.mxu0 %vm3624_vm14, %v735_v15 }
  0xdc   : > { %2886 = vmatpush2.msk.msra.mxu0 %vm3421_vm2, %v731_v18 }
  0xdd   : > { %v722_v19 = vpop.permute.xlu1 %721  ;;  %v714_v21 = vpop.permute.xlu0 %713 }
  0xde   : > { %v734_v22 = vsel %vm5468_vm13, %v722_v19, %v714_v21  ;;  %v730_v23 = vsel %vm5468_vm13, %v714_v21, %v722_v19  ;;  %vm803_vm13 = vcmp.lt.s32.totalorder %v3393_v9, 111 }
  0xdf   : > { %2887 = vmatprep.subr.msk.mxu0 %vm3624_vm14, %v734_v22 }
  0xe0   : > { %2888 = vmatpush2.msk.msra.mxu0 %vm3421_vm2, %v730_v23 }
  0xe1   : > { %v691_v25 = vpop.permute.xlu1 %690  ;;  %v683_v26 = vpop.permute.xlu0 %682 }
  0xe2   : > { %v700_v27 = vsel %vm5470_vm15, %v691_v25, %v683_v26  ;;  %v696_v28 = vsel %vm5470_vm15, %v683_v26, %v691_v25 }
  0xe3   : > { %2889 = vmatprep.subr.msk.mxu0 %vm3477_vm6, %v700_v27 }
  0xe4   : > { %2890 = vmatpush2.msk.msra.mxu0 %vm3457_vm3, %v696_v28 }
  0xe5   : > { %v689_v30 = vpop.permute.xlu1 %688  ;;  %v681_v31 = vpop.permute.xlu0 %680 }
  0xe6   : > { %v699_v32 = vsel %vm5470_vm15, %v689_v30, %v681_v31  ;;  %v695_v33 = vsel %vm5470_vm15, %v681_v31, %v689_v30 }
  0xe7   : > { %2891 = vmatprep.subr.msk.mxu0 %vm3477_vm6, %v699_v32 }
  0xe8   : > { %2892 = vmatpush2.msk.msra.mxu0 %vm3457_vm3, %v695_v33 }
  0xe9   : > { %v687_v34 = vpop.permute.xlu1 %686  ;;  %v679_v35 = vpop.permute.xlu0 %678 }
  0xea   : > { %v698_v36 = vsel %vm5470_vm15, %v687_v34, %v679_v35  ;;  %v694_v38 = vsel %vm5470_vm15, %v679_v35, %v687_v34 }
  0xeb   : > { %2893 = vmatprep.subr.msk.mxu0 %vm3477_vm6, %v698_v36 }
  0xec   : > { %2894 = vmatpush2.msk.msra.mxu0 %vm3457_vm3, %v694_v38 }
  0xed   : > { %v685_v39 = vpop.permute.xlu1 %684  ;;  %v677_v41 = vpop.permute.xlu0 %676 }
  0xee   : > { %v697_v42 = vsel %vm5470_vm15, %v685_v39, %v677_v41  ;;  %v693_v43 = vsel %vm5470_vm15, %v677_v41, %v685_v39  ;;  %vm860_vm15 = vcmask 261120  }
  0xef   : > { %2895 = vmatprep.subr.msk.mxu0 %vm3477_vm6, %v697_v42 }
  0xf0   : > { %2896 = vmatpush2.msk.msra.mxu0 %vm3457_vm3, %v693_v43 }
  0xf1   : > { %v802_v45 = vpop.permute.xlu1 %801  ;;  %929 = vmatprep.subr.mxu0 %v3277_v2  ;;  %v794_v46 = vpop.permute.xlu0 %793 }
  0xf2   : > { %930 = vmatpush2.msra.mxu0 %v3269_v0  ;;  %v811_v47 = vsel %vm803_vm13, %v802_v45, %v794_v46  ;;  %v807_v48 = vsel %vm803_vm13, %v794_v46, %v802_v45 }
  0xf3   : > { %931 = vmatprep.subr.mxu0 %v3279_v3  ;;  %2897 = vmatprep.subr.msk.mxu1 %vm3698_vm11, %v811_v47 }
  0xf4   : > { %932 = vmatpush2.msra.mxu0 %v3271_v1  ;;  %2898 = vmatpush1.msk.msra.mxu1 %vm3457_vm3, %v807_v48  ;;  %v828_v1 = vld [vmem:[%s5455_s1 + $0x20] sm:$0xff] }
  0xf5   : > { %v800_v2 = vpop.permute.xlu1 %799  ;;  %933 = vmatprep.subr.mxu0 %v3285_v4  ;;  %v792_v0 = vpop.permute.xlu0 %791 }
  0xf6   : > { %934 = vmatpush2.msra.mxu0 %v3287_v5  ;;  %v810_v49 = vsel %vm803_vm13, %v800_v2, %v792_v0  ;;  %v806_v3 = vsel %vm803_vm13, %v792_v0, %v800_v2 }
  0xf7   : > { %935 = vmatprep.subr.mxu0 %v3293_v6  ;;  %2899 = vmatprep.subr.msk.mxu1 %vm3698_vm11, %v810_v49  ;;  %v827_v6 = vld [vmem:[%s5455_s1 + $0x18] sm:$0xff] }
  0xf8   : > { %936 = vmatpush2.msra.mxu0 %v3295_v7  ;;  %2900 = vmatpush1.msk.msra.mxu1 %vm3457_vm3, %v806_v3  ;;  %v831_v7 = vld [vmem:[%s5455_s1 + $0x38] sm:$0xff] }
  0xf9   : > { %v798_v4 = vpop.permute.xlu1 %797  ;;  %938 = vmatmul.mubr.f32.vlgmr.msra.gmra.mxu0 %v824_v50 }
  0xfa   : > { %v790_v5 = vpop.permute.xlu0 %789  ;;  %943 = vmatprep.mubr.f32.mxu0 %v828_v1 }
  0xfb   : > { %v809_v51 = vsel %vm803_vm13, %v798_v4, %v790_v5  ;;  %v805_v52 = vsel %vm803_vm13, %v790_v5, %v798_v4  ;;  %v1308_v4 = vld [vmem:[%s5457_s3 + $0x8] sm:$0xff] }
  0xfc   : > { %2901 = vmatprep.subr.msk.mxu1 %vm3698_vm11, %v809_v51 }
  0xfd   : > { %2902 = vmatpush1.msk.msra.mxu1 %vm3457_vm3, %v805_v52  ;;  %v796_v53 = vpop.permute.xlu1 %795  ;;  %944 = vmatmul.mubr.f32.gmra.mxu0 %v827_v6 }
  0xfe   : > { %v788_v54 = vpop.permute.xlu0 %787  ;;  %949 = vmatprep.mubr.f32.mxu0 %v831_v7 }
  0xff   : > { %v808_v56 = vsel %vm803_vm13, %v796_v53, %v788_v54  ;;  %v804_v57 = vsel %vm803_vm13, %v788_v54, %v796_v53  ;;  %v1322_v54 = vld [vmem:[%s5458_s4 + $0x18] sm:$0xff] }
 0x100   : > { %2903 = vmatprep.subr.msk.mxu1 %vm3698_vm11, %v808_v56  ;;  %v1321_v56 = vld [vmem:[%s5458_s4 + $0x10] sm:$0xff] }
 0x101   : > { %2904 = vmatpush1.msk.msra.mxu1 %vm3457_vm3, %v804_v57  ;;  %950 = vmatmul.mubr.f32.gmra.mxu0 %v830_v55 }
 0x102   : > { %2905 = vmatmul.mubr.msk.f32.vlgmr.msra.gmra.mxu1 %vm860_vm15, %v826_v59  ;;  %955 = vmatprep.mubr.f32.mxu0 %v834_v60  ;;  %v1320_v59 = vld [vmem:[%s5458_s4 + $0x8] sm:$0xff] }
 0x103   : > { %1032 = vmatprep.mubr.f32.mxu1 %v5476_v16 }
 0x105   : > { %956 = vmatmul.mubr.f32.gmra.mxu0 %v833_v61  ;;  %v1319_v61 = vld [vmem:[%s5458_s4] sm:$0xff] }
 0x106   : > { %2906 = vmatmul.mubr.msk.f32.gmra.mxu1 %vm860_vm15, %v829_v62  ;;  %2014 = vmatprep.mubr.f32.mxu0 %v5476_v16 }
 0x107   : > { %1038 = vmatprep.mubr.f32.mxu1 %v5476_v16 }
 0x10a   : > { %2907 = vmatmul.mubr.msk.f32.gmra.mxu1 %vm860_vm15, %v832_v63  ;;  %v853_v25 = vpop.permute.xlu1 %852 }
 0x10b   : > { %1044 = vmatprep.mubr.f32.mxu1 %v5476_v16  ;;  %v858_v10 = vpop.permute.xlu0 %857 }
 0x10e   : > { %2908 = vmatmul.mubr.msk.f32.gmra.mxu1 %vm860_vm15, %v835_v8  ;;  %v848_v27 = vpop.permute.xlu1 %847 }
 0x10f   : > { %v843_v13 = vpop.permute.xlu0 %842  ;;  %1419 = vmatprep.mubr.f32.mxu1 %v1308_v4 }
 0x1b9   : > { %v939_v12 = vpop.f32.mrf.mxu0 }
 0x1ba   : > { %v940_v14 = vadd.f32 %v939_v12, %v843_v13 }
 0x1bb   : > { %v941_v15 = vpop.f32.mrf.mxu0 }
 0x1bc   : > { %v942_v21 = vadd.f32 %v941_v15, %v843_v13 }
 0x1bd   : > { %v945_v26 = vpop.f32.mrf.mxu0 }
 0x1be   : > { %v946_v28 = vadd.f32 %v945_v26, %v848_v27 }
 0x1bf   : > { %v947_v30 = vpop.f32.mrf.mxu0 }
 0x1c0   : > { %v948_v32 = vadd.f32 %v947_v30, %v848_v27 }
 0x1c1   : > { %v951_v36 = vpop.f32.mrf.mxu0 }
 0x1c2   : > { %v1028_v18 = vpop.f32.mrf.mxu1  ;;  %v952_v38 = vadd.f32 %v951_v36, %v853_v25 }
 0x1c3   : > { %v3783_v19 = vadd.f32 %v1028_v18, %v940_v14  ;;  %v953_v39 = vpop.f32.mrf.mxu0 }
 0x1c4   : > { %v1030_v22 = vpop.f32.mrf.mxu1  ;;  %v954_v42 = vadd.f32 %v953_v39, %v853_v25 }
 0x1c5   : > { %v3785_v23 = vadd.f32 %v1030_v22, %v942_v21  ;;  %1147 = vrot.lane.b32.xlu1 %v3783_v19, %s3172_s14  ;;  %v957_v47 = vpop.f32.mrf.mxu0 }
 0x1c6   : > { %v1034_v31 = vpop.f32.mrf.mxu1  ;;  %v958_v0 = vadd.f32 %v957_v47, %v858_v10 }
 0x1c7   : > { %1155 = vrot.lane.b32.xlu0 %v3785_v23, %s3172_s14  ;;  %v3801_v33 = vadd.f32 %v1034_v31, %v946_v28  ;;  %v959_v2 = vpop.f32.mrf.mxu0 }
 0x1c8   : > { %v1036_v34 = vpop.f32.mrf.mxu1  ;;  %v960_v3 = vadd.f32 %v959_v2, %v858_v10 }
 0x1c9   : > { %1115 = vrot.lane.b32.xlu1 %v3783_v19, %s3173_s15  ;;  %v3805_v35 = vadd.f32 %v1036_v34, %v948_v32 }
 0x1ca   : > { %v1040_v41 = vpop.f32.mrf.mxu1 }
 0x1cb   : > { %1123 = vrot.lane.b32.xlu0 %v3785_v23, %s3173_s15  ;;  %v3821_v43 = vadd.f32 %v1040_v41, %v952_v38 }
 0x1cc   : > { %v1042_v45 = vpop.f32.mrf.mxu1 }
 0x1cd   : > { %1083 = vrot.lane.b32.xlu1 %v3783_v19, %s3174_s16  ;;  %v3825_v46 = vadd.f32 %v1042_v45, %v954_v42 }
 0x1ce   : > { %v1046_v48 = vpop.f32.mrf.mxu1 }
 0x1cf   : > { %1091 = vrot.lane.b32.xlu0 %v3785_v23, %s3174_s16  ;;  %v3845_v50 = vadd.f32 %v1046_v48, %v958_v0 }
 0x1d0   : > { %v1048_v49 = vpop.f32.mrf.mxu1 }
 0x1d1   : > { %1051 = vrot.lane.b32.xlu1 %v3783_v19, %s3175_s17  ;;  %v3849_v1 = vadd.f32 %v1048_v49, %v960_v3 }
 0x1d3   : > { %1059 = vrot.lane.b32.xlu0 %v3785_v23, %s3175_s17 }
 0x1d5   : > { %1149 = vrot.lane.b32.xlu1 %v3801_v33, %s3172_s14 }
 0x1d7   : > { %1157 = vrot.lane.b32.xlu0 %v3805_v35, %s3172_s14 }
 0x1d9   : > { %1117 = vrot.lane.b32.xlu1 %v3801_v33, %s3173_s15 }
 0x1db   : > { %1125 = vrot.lane.b32.xlu0 %v3805_v35, %s3173_s15 }
 0x1dd   : > { %1085 = vrot.lane.b32.xlu1 %v3801_v33, %s3174_s16 }
 0x1df   : > { %1093 = vrot.lane.b32.xlu0 %v3805_v35, %s3174_s16 }
 0x1e1   : > { %1053 = vrot.lane.b32.xlu1 %v3801_v33, %s3175_s17 }
 0x1e3   : > { %1061 = vrot.lane.b32.xlu0 %v3805_v35, %s3175_s17 }
 0x1e5   : > { %1151 = vrot.lane.b32.xlu1 %v3821_v43, %s3172_s14 }
 0x1e7   : > { %1159 = vrot.lane.b32.xlu0 %v3825_v46, %s3172_s14 }
 0x1e9   : > { %1119 = vrot.lane.b32.xlu1 %v3821_v43, %s3173_s15 }
 0x1eb   : > { %1127 = vrot.lane.b32.xlu0 %v3825_v46, %s3173_s15 }
 0x1ed   : > { %1087 = vrot.lane.b32.xlu1 %v3821_v43, %s3174_s16 }
 0x1ef   : > { %1095 = vrot.lane.b32.xlu0 %v3825_v46, %s3174_s16 }
 0x1f1   : > { %1055 = vrot.lane.b32.xlu1 %v3821_v43, %s3175_s17 }
 0x1f3   : > { %1063 = vrot.lane.b32.xlu0 %v3825_v46, %s3175_s17 }
 0x1f5   : > { %1247 = vrot.lane.b32.xlu1 %v3821_v43, %s3176_s18 }
 0x1f7   : > { %1255 = vrot.lane.b32.xlu0 %v3825_v46, %s3176_s18 }
 0x1f9   : > { %1153 = vrot.lane.b32.xlu1 %v3845_v50, %s3172_s14 }
 0x1fb   : > { %1161 = vrot.lane.b32.xlu0 %v3849_v1, %s3172_s14 }
 0x1fd   : > { %1245 = vrot.lane.b32.xlu1 %v3801_v33, %s3176_s18 }
 0x1ff   : > { %1253 = vrot.lane.b32.xlu0 %v3805_v35, %s3176_s18 }
 0x201   : > { %1121 = vrot.lane.b32.xlu1 %v3845_v50, %s3173_s15 }
 0x203   : > { %1129 = vrot.lane.b32.xlu0 %v3849_v1, %s3173_s15 }
 0x205   : > { %1089 = vrot.lane.b32.xlu1 %v3845_v50, %s3174_s16 }
 0x207   : > { %1251 = vrot.lane.b32.xlu0 %v3785_v23, %s3176_s18 }
 0x209   : > { %1057 = vrot.lane.b32.xlu1 %v3845_v50, %s3175_s17 }
 0x20b   : > { %1097 = vrot.lane.b32.xlu0 %v3849_v1, %s3174_s16 }
 0x20d   : > { %1249 = vrot.lane.b32.xlu1 %v3845_v50, %s3176_s18 }
 0x20f   : > { %1223 = vrot.lane.b32.xlu0 %v3825_v46, %s3177_s19 }
 0x211   : > { %1243 = vrot.lane.b32.xlu1 %v3783_v19, %s3176_s18 }
 0x213   : > { %1065 = vrot.lane.b32.xlu0 %v3849_v1, %s3175_s17 }
 0x215   : > { %1217 = vrot.lane.b32.xlu1 %v3845_v50, %s3177_s19 }
 0x217   : > { %1221 = vrot.lane.b32.xlu0 %v3805_v35, %s3177_s19 }
 0x219   : > { %1215 = vrot.lane.b32.xlu1 %v3821_v43, %s3177_s19 }
 0x21b   : > { %1257 = vrot.lane.b32.xlu0 %v3849_v1, %s3176_s18 }
 0x21d   : > { %1213 = vrot.lane.b32.xlu1 %v3801_v33, %s3177_s19 }
 0x21f   : > { %1219 = vrot.lane.b32.xlu0 %v3785_v23, %s3177_s19 }
 0x221   : > { %1211 = vrot.lane.b32.xlu1 %v3783_v19, %s3177_s19 }
 0x223   : > { %1225 = vrot.lane.b32.xlu0 %v3849_v1, %s3177_s19 }
 0x225   : > { %1185 = vrot.lane.b32.xlu1 %v3845_v50, %s3178_s20 }
 0x227   : > { %1191 = vrot.lane.b32.xlu0 %v3825_v46, %s3178_s20 }
 0x229   : > { %1183 = vrot.lane.b32.xlu1 %v3821_v43, %s3178_s20 }
 0x22b   : > { %1193 = vrot.lane.b32.xlu0 %v3849_v1, %s3178_s20 }
 0x22d   : > { %1181 = vrot.lane.b32.xlu1 %v3801_v33, %s3178_s20 }
 0x22f   : > { %1189 = vrot.lane.b32.xlu0 %v3805_v35, %s3178_s20 }
 0x231   : > { %1179 = vrot.lane.b32.xlu1 %v3783_v19, %s3178_s20 }
 0x233   : > { %1187 = vrot.lane.b32.xlu0 %v3785_v23, %s3178_s20 }
 0x235   : > { %1281 = vrot.lane.b32.xlu1 %v3845_v50, %s5479_s23 }
 0x237   : > { %1287 = vrot.lane.b32.xlu0 %v3825_v46, %s5479_s23  ;;  %v1148_v5 = vpop.permute.xlu1 %1147 }
 0x239   : > { %v1156_v6 = vpop.permute.xlu0 %1155  ;;  %1279 = vrot.lane.b32.xlu1 %v3821_v43, %s5479_s23 }
 0x23a   : > { %v1163_v0 = vsel %vm5475_vm0, %v1148_v5, %v1156_v6  ;;  %v1167_v49 = vsel %vm5475_vm0, %v1156_v6, %v1148_v5 }
 0x23b   : > { %1289 = vrot.lane.b32.xlu0 %v3849_v1, %s5479_s23  ;;  %v3922_v51 = vpop.permute.xlu1 %1115 }
 0x23d   : > { %v3924_v52 = vpop.permute.xlu0 %1123  ;;  %1277 = vrot.lane.b32.xlu1 %v3801_v33, %s5479_s23 }
 0x23f   : > { %1285 = vrot.lane.b32.xlu0 %v3805_v35, %s5479_s23  ;;  %v3930_v7 = vpop.permute.xlu1 %1083 }
 0x241   : > { %v3932_v53 = vpop.permute.xlu0 %1091  ;;  %1275 = vrot.lane.b32.xlu1 %v3783_v19, %s5479_s23 }
 0x243   : > { %1283 = vrot.lane.b32.xlu0 %v3785_v23, %s5479_s23  ;;  %v3941_v55 = vpop.permute.xlu1 %1051 }
 0x245   : > { %v3946_v57 = vpop.permute.xlu0 %1059  ;;  %1340 = vperm.xlu1 %3147, %v1322_v54  }
 0x247   : > { %1335 = vperm.xlu0 %3146, %v1321_v56   ;;  %v1150_v60 = vpop.permute.xlu1 %1149 }
 0x249   : > { %v1158_v62 = vpop.permute.xlu0 %1157  ;;  %1330 = vperm.xlu1 %3147, %v1320_v59  }
 0x24a   : > { %v1164_v47 = vsel %vm5475_vm0, %v1150_v60, %v1158_v62  ;;  %v1168_v48 = vsel %vm5475_vm0, %v1158_v62, %v1150_v60 }
 0x24b   : > { %1325 = vperm.xlu0 %3146, %v1319_v61   ;;  %v1118_v63 = vpop.permute.xlu1 %1117 }
 0x24d   : > { %v1126_v8 = vpop.permute.xlu0 %1125 }
 0x24e   : > { %v1132_v60 = vsel %vm5474_vm5, %v1118_v63, %v1126_v8  ;;  %v1136_v61 = vsel %vm5474_vm5, %v1126_v8, %v1118_v63 }
 0x24f   : > { %v3954_v10 = vpop.permute.xlu1 %1085 }
 0x251   : > { %v3956_v12 = vpop.permute.xlu0 %1093 }
 0x253   : > { %v3958_v13 = vpop.permute.xlu1 %1053 }
 0x255   : > { %v3960_v14 = vpop.permute.xlu0 %1061 }
 0x257   : > { %v1152_v15 = vpop.permute.xlu1 %1151 }
 0x259   : > { %v1160_v18 = vpop.permute.xlu0 %1159 }
 0x25a   : > { %v1165_v41 = vsel %vm5475_vm0, %v1152_v15, %v1160_v18  ;;  %v1169_v42 = vsel %vm5475_vm0, %v1160_v18, %v1152_v15  ;;  %v1131_v15 = vsel %vm5474_vm5, %v3922_v51, %v3924_v52  ;;  %v1135_v18 = vsel %vm5474_vm5, %v3924_v52, %v3922_v51 }
 0x25b   : > { %v1120_v21 = vpop.permute.xlu1 %1119 }
 0x25d   : > { %v1128_v22 = vpop.permute.xlu0 %1127 }
 0x25e   : > { %v1133_v5 = vsel %vm5474_vm5, %v1120_v21, %v1128_v22  ;;  %v1137_v6 = vsel %vm5474_vm5, %v1128_v22, %v1120_v21 }
 0x25f   : > { %v1088_v25 = vpop.permute.xlu1 %1087 }
 0x261   : > { %v1096_v26 = vpop.permute.xlu0 %1095 }
 0x262   : > { %v1101_v51 = vsel %vm5472_vm8, %v1088_v25, %v1096_v26  ;;  %v1105_v52 = vsel %vm5472_vm8, %v1096_v26, %v1088_v25  ;;  %v1099_v25 = vsel %vm5472_vm8, %v3930_v7, %v3932_v53  ;;  %v1103_v26 = vsel %vm5472_vm8, %v3932_v53, %v3930_v7 }
 0x263   : > { %v3962_v27 = vpop.permute.xlu1 %1055 }
 0x265   : > { %v3964_v28 = vpop.permute.xlu0 %1063 }
 0x266   : > { %v1069_v7 = vsel %vm5473_vm9, %v3962_v27, %v3964_v28  ;;  %v1073_v53 = vsel %vm5473_vm9, %v3964_v28, %v3962_v27  ;;  %v1067_v28 = vsel %vm5473_vm9, %v3941_v55, %v3946_v57 }
 0x267   : > { %v3966_v30 = vpop.permute.xlu1 %1247 }
 0x269   : > { %v3968_v31 = vpop.permute.xlu0 %1255 }
 0x26b   : > { %v1154_v32 = vpop.permute.xlu1 %1153 }
 0x26d   : > { %v1162_v34 = vpop.permute.xlu0 %1161 }
 0x26e   : > { %v1170_v36 = vsel %vm5475_vm0, %v1162_v34, %v1154_v32  ;;  %v1166_v38 = vsel %vm5475_vm0, %v1154_v32, %v1162_v34  ;;  %v1100_v34 = vsel %vm5472_vm8, %v3954_v10, %v3956_v12 }
 0x26f   : > { %2909 = vmatprep.subr.msk.mxu1 %vm3417_vm1, %v1166_v38  ;;  %v3976_v39 = vpop.permute.xlu1 %1245 }
 0x270   : > { %2910 = vmatpush1.msk.msra.mxu1 %vm3421_vm2, %v1170_v36  ;;  %v1104_v36 = vsel %vm5472_vm8, %v3956_v12, %v3954_v10 }
 0x271   : > { %v3984_v45 = vpop.permute.xlu0 %1253  ;;  %2911 = vmatprep.subr.msk.mxu1 %vm3417_vm1, %v1165_v41 }
 0x272   : > { %2912 = vmatpush1.msk.msra.mxu1 %vm3421_vm2, %v1169_v42 }
 0x273   : > { %2913 = vmatprep.subr.msk.mxu1 %vm3417_vm1, %v1164_v47  ;;  %v1122_v2 = vpop.permute.xlu1 %1121 }
 0x274   : > { %2914 = vmatpush1.msk.msra.mxu1 %vm3421_vm2, %v1168_v48  ;;  %v1068_v48 = vsel %vm5473_vm9, %v3958_v13, %v3960_v14 }
 0x275   : > { %v1130_v3 = vpop.permute.xlu0 %1129  ;;  %2915 = vmatprep.subr.msk.mxu1 %vm3417_vm1, %v1163_v0  ;;  %v1071_v0 = vsel %vm5473_vm9, %v3946_v57, %v3941_v55 }
 0x276   : > { %v1138_v4 = vsel %vm5474_vm5, %v1130_v3, %v1122_v2  ;;  %2916 = vmatpush1.msk.msra.mxu1 %vm3421_vm2, %v1167_v49  ;;  %v1134_v54 = vsel %vm5474_vm5, %v1122_v2, %v1130_v3  ;;  %v1072_v2 = vsel %vm5473_vm9, %v3960_v14, %v3958_v13 }
 0x277   : > { %2917 = vmatprep.subr.msk.mxu1 %vm3477_vm6, %v1134_v54  ;;  %v1090_v56 = vpop.permute.xlu1 %1089 }
 0x278   : > { %2918 = vmatpush1.msk.msra.mxu1 %vm3485_vm7, %v1138_v4 }
 0x279   : > { %v4018_v59 = vpop.permute.xlu0 %1251  ;;  %2919 = vmatprep.subr.msk.mxu1 %vm3477_vm6, %v1133_v5 }
 0x27a   : > { %2920 = vmatpush1.msk.msra.mxu1 %vm3485_vm7, %v1137_v6 }
 0x27b   : > { %2921 = vmatprep.subr.msk.mxu1 %vm3477_vm6, %v1132_v60  ;;  %v1058_v62 = vpop.permute.xlu1 %1057 }
 0x27c   : > { %2922 = vmatpush1.msk.msra.mxu1 %vm3485_vm7, %v1136_v61 }
 0x27d   : > { %v1098_v21 = vpop.permute.xlu0 %1097  ;;  %2923 = vmatprep.subr.msk.mxu1 %vm3477_vm6, %v1131_v15 }
 0x27e   : > { %v1106_v63 = vsel %vm5472_vm8, %v1098_v21, %v1090_v56  ;;  %2924 = vmatpush1.msk.msra.mxu1 %vm3485_vm7, %v1135_v18  ;;  %v1102_v8 = vsel %vm5472_vm8, %v1090_v56, %v1098_v21 }
 0x27f   : > { %1371 = vmatprep.subr.mxu1 %v1102_v8  ;;  %v1250_v22 = vpop.permute.xlu1 %1249 }
 0x280   : > { %2925 = vmatpush1.msk.msra.mxu1 %vm5471_vm4, %v1106_v63 }
 0x281   : > { %v1224_v32 = vpop.permute.xlu0 %1223  ;;  %1373 = vmatprep.subr.mxu1 %v1101_v51 }
 0x282   : > { %2926 = vmatpush1.msk.msra.mxu1 %vm5471_vm4, %v1105_v52 }
 0x283   : > { %1375 = vmatprep.subr.mxu1 %v1100_v34  ;;  %v1244_v38 = vpop.permute.xlu1 %1243 }
 0x284   : > { %2927 = vmatpush1.msk.msra.mxu1 %vm5471_vm4, %v1104_v36 }
 0x285   : > { %v1066_v41 = vpop.permute.xlu0 %1065  ;;  %1377 = vmatprep.subr.mxu1 %v1099_v25 }
 0x286   : > { %v1074_v10 = vsel %vm5473_vm9, %v1066_v41, %v1058_v62  ;;  %2928 = vmatpush1.msk.msra.mxu1 %vm5471_vm4, %v1103_v26  ;;  %v1070_v12 = vsel %vm5473_vm9, %v1058_v62, %v1066_v41  ;;  %vm5497_vm4 = vcmp.lt.s32.totalorder %v3393_v9, 112 }
 0x287   : > { %2929 = vmatprep.subr.msk.mxu1 %vm3417_vm1, %v1070_v12  ;;  %v1218_v42 = vpop.permute.xlu1 %1217  ;;  %vm5498_vm8 = vmmov %vm5497_vm4  ;;  %v1261_v4 = vsel %vm5497_vm4, %v3966_v30, %v3968_v31  ;;  %v1259_v6 = vsel %vm5497_vm4, %v1244_v38, %v4018_v59 }
 0x288   : > { %2930 = vmatpush1.msk.msra.mxu1 %vm3557_vm10, %v1074_v10  ;;  %vm5499_vm9 = vmmov %vm5497_vm4 }
 0x289   : > { %v1222_v47 = vpop.permute.xlu0 %1221  ;;  %2931 = vmatprep.subr.msk.mxu1 %vm3417_vm1, %v1069_v7  ;;  %v1265_v55 = vsel %vm5499_vm9, %v3968_v31, %v3966_v30  ;;  %vm5501_vm9 = vmmov %vm5497_vm4 }
 0x28a   : > { %2932 = vmatpush1.msk.msra.mxu1 %vm3557_vm10, %v1073_v53  ;;  %v1260_v5 = vsel %vm5501_vm9, %v3976_v39, %v3984_v45  ;;  %vm5502_vm5 = vmmov %vm5497_vm4 }
 0x28b   : > { %2933 = vmatprep.subr.msk.mxu1 %vm3417_vm1, %v1068_v48  ;;  %v1216_v27 = vpop.permute.xlu1 %1215  ;;  %v1263_v30 = vsel %vm5502_vm5, %v4018_v59, %v1244_v38 }
 0x28c   : > { %2934 = vmatpush1.msk.msra.mxu1 %vm3557_vm10, %v1072_v2  ;;  %v1307_v2 = vld [vmem:[%s5457_s3] sm:$0xff] }
 0x28d   : > { %v1258_v49 = vpop.permute.xlu0 %1257  ;;  %2935 = vmatprep.subr.msk.mxu1 %vm3417_vm1, %v1067_v28  ;;  %v1311_v28 = vld [vmem:[%s5457_s3 + $0x20] sm:$0xff] }
 0x28e   : > { %2936 = vmatpush1.msk.msra.mxu1 %vm3557_vm10, %v1071_v0  ;;  %v1266_v13 = vsel %vm5497_vm4, %v1258_v49, %v1250_v22  ;;  %v1262_v14 = vsel %vm5498_vm8, %v1250_v22, %v1258_v49  ;;  %vm5500_vm8 = vmmov %vm5497_vm4 }
 0x28f   : > { %2937 = vmatprep.subr.msk.mxu1 %vm519_vm12, %v1266_v13  ;;  %v1214_v3 = vpop.permute.xlu1 %1213  ;;  %v1264_v54 = vsel %vm5500_vm8, %v3984_v45, %v3976_v39  ;;  %vm5503_vm8 = vcmp.lt.s32.totalorder %v3393_v9, 113 }
 0x290   : > { %1388 = vmatpush2.msra.mxu1 %v1262_v14  ;;  %vm5504_vm0 = vmmov %vm5503_vm8 }
 0x291   : > { %v1220_v57 = vpop.permute.xlu0 %1219  ;;  %2938 = vmatprep.subr.msk.mxu1 %vm519_vm12, %v1265_v55  ;;  %vm5505_vm5 = vmmov %vm5504_vm0  ;;  %v1232_v15 = vsel %vm5504_vm0, %v1222_v47, %v1214_v3 }
 0x292   : > { %1390 = vmatpush2.msra.mxu1 %v1261_v4  ;;  %v1233_v61 = vsel %vm5505_vm5, %v1224_v32, %v1216_v27  ;;  %vm5506_vm9 = vmmov %vm5504_vm0 }
 0x293   : > { %2939 = vmatprep.subr.msk.mxu1 %vm519_vm12, %v1264_v54  ;;  %v1212_v56 = vpop.permute.xlu1 %1211  ;;  %v1229_v59 = vsel %vm5506_vm9, %v1216_v27, %v1224_v32  ;;  %vm5507_vm4 = vmmov %vm5504_vm0  ;;  %vm5510_vm9 = vcmp.lt.s32.totalorder %v3393_v9, 127 }
 0x294   : > { %1392 = vmatpush2.msra.mxu1 %v1260_v5  ;;  %v1228_v18 = vsel %vm5507_vm4, %v1214_v3, %v1222_v47  ;;  %vm5509_vm5 = vmmov %vm5504_vm0  ;;  %v1310_v3 = vld [vmem:[%s5457_s3 + $0x18] sm:$0xff] }
 0x295   : > { %v1226_v31 = vpop.permute.xlu0 %1225  ;;  %2940 = vmatprep.subr.msk.mxu1 %vm519_vm12, %v1263_v30  ;;  %v1227_v8 = vsel %vm5509_vm5, %v1212_v56, %v1220_v57 }
 0x296   : > { %v1230_v60 = vsel %vm5503_vm8, %v1218_v42, %v1226_v31  ;;  %1394 = vmatpush2.msra.mxu1 %v1259_v6  ;;  %v1234_v39 = vsel %vm5504_vm0, %v1226_v31, %v1218_v42  ;;  %vm5508_vm8 = vmmov %vm5504_vm0  ;;  %v1313_v6 = vld [vmem:[%s5457_s3 + $0x30] sm:$0xff] }
 0x297   : > { %2941 = vmatprep.subr.msk.mxu1 %vm3624_vm14, %v1234_v39  ;;  %v1186_v45 = vpop.permute.xlu1 %1185  ;;  %v1231_v63 = vsel %vm5508_vm8, %v1220_v57, %v1212_v56  ;;  %vm5511_vm0 = vmmov %vm5510_vm9  ;;  %v1314_v57 = vld [vmem:[%s5457_s3 + $0x38] sm:$0xff]  ;;  %v1316_v39 = vld [vmem:[%s5457_s3 + $0x48] sm:$0xff] }
 0x298   : > { %2942 = vmatpush2.msk.msra.mxu1 %vm3421_vm2, %v1230_v60  ;;  %vm5512_vm4 = vmmov %vm5511_vm0  ;;  %v1317_v60 = vld [vmem:[%s5457_s3 + $0x50] sm:$0xff] }
 0x299   : > { %v1192_v62 = vpop.permute.xlu0 %1191  ;;  %2943 = vmatprep.subr.msk.mxu1 %vm3624_vm14, %v1233_v61  ;;  %vm5513_vm8 = vmmov %vm5511_vm0  ;;  %v1312_v61 = vld [vmem:[%s5457_s3 + $0x28] sm:$0xff] }
 0x29a   : > { %2944 = vmatpush2.msk.msra.mxu1 %vm3421_vm2, %v1229_v59  ;;  %vm5514_vm5 = vmmov %vm5511_vm0  ;;  %v1315_v59 = vld [vmem:[%s5457_s3 + $0x40] sm:$0xff] }
 0x29b   : > { %2945 = vmatprep.subr.msk.mxu1 %vm3624_vm14, %v1232_v15  ;;  %v1184_v21 = vpop.permute.xlu1 %1183 }
 0x29c   : > { %2946 = vmatpush2.msk.msra.mxu1 %vm3421_vm2, %v1228_v18  ;;  %v1201_v34 = vsel %vm5512_vm4, %v1192_v62, %v1184_v21  ;;  %v1197_v36 = vsel %vm5513_vm8, %v1184_v21, %v1192_v62  ;;  %vm5516_vm4 = vmmov %vm5511_vm0  ;;  %v1318_v62 = vld [vmem:[%s5457_s3 + $0x58] sm:$0xff] }
 0x29d   : > { %v1194_v22 = vpop.permute.xlu0 %1193  ;;  %2947 = vmatprep.subr.msk.mxu1 %vm3624_vm14, %v1231_v63 }
 0x29e   : > { %v1198_v51 = vsel %vm5510_vm9, %v1186_v45, %v1194_v22  ;;  %2948 = vmatpush2.msk.msra.mxu1 %vm3421_vm2, %v1227_v8  ;;  %v1202_v52 = vsel %vm5511_vm0, %v1194_v22, %v1186_v45  ;;  %vm5515_vm9 = vmmov %vm5511_vm0  ;;  %v1309_v45 = vld [vmem:[%s5457_s3 + $0x10] sm:$0xff] }
 0x29f   : > { %2949 = vmatprep.subr.msk.mxu1 %vm3477_vm6, %v1202_v52  ;;  %v1182_v32 = vpop.permute.xlu1 %1181 }
 0x2a0   : > { %2950 = vmatpush2.msk.msra.mxu1 %vm3457_vm3, %v1198_v51 }
 0x2a1   : > { %v1190_v38 = vpop.permute.xlu0 %1189  ;;  %2951 = vmatprep.subr.msk.mxu1 %vm3477_vm6, %v1201_v34 }
 0x2a2   : > { %v1196_v25 = vsel %vm5514_vm5, %v1182_v32, %v1190_v38  ;;  %2952 = vmatpush2.msk.msra.mxu1 %vm3457_vm3, %v1197_v36  ;;  %v1200_v26 = vsel %vm5515_vm9, %v1190_v38, %v1182_v32 }
 0x2a3   : > { %2953 = vmatprep.subr.msk.mxu1 %vm3477_vm6, %v1200_v26  ;;  %v1180_v41 = vpop.permute.xlu1 %1179 }
 0x2a4   : > { %2954 = vmatpush2.msk.msra.mxu1 %vm3457_vm3, %v1196_v25 }
 0x2a5   : > { %v1188_v10 = vpop.permute.xlu0 %1187 }
 0x2a6   : > { %v1195_v12 = vsel %vm5511_vm0, %v1180_v41, %v1188_v10  ;;  %v1199_v42 = vsel %vm5516_vm4, %v1188_v10, %v1180_v41 }
 0x2a7   : > { %2955 = vmatprep.subr.msk.mxu1 %vm3477_vm6, %v1199_v42  ;;  %v1282_v7 = vpop.permute.xlu1 %1281 }
 0x2a8   : > { %2956 = vmatpush2.msk.msra.mxu1 %vm3457_vm3, %v1195_v12 }
 0x2a9   : > { %v1288_v53 = vpop.permute.xlu0 %1287  ;;  %1411 = vmatprep.subr.mxu1 %v3849_v1 }
 0x2aa   : > { %1412 = vmatpush2.msra.mxu1 %v3845_v50 }
 0x2ab   : > { %1413 = vmatprep.subr.mxu1 %v3825_v46  ;;  %v1280_v47 = vpop.permute.xlu1 %1279 }
 0x2ac   : > { %1414 = vmatpush2.msra.mxu1 %v3821_v43  ;;  %v1297_v14 = vsel %vm803_vm13, %v1288_v53, %v1280_v47  ;;  %v1293_v55 = vsel %vm803_vm13, %v1280_v47, %v1288_v53 }
 0x2ad   : > { %v1290_v48 = vpop.permute.xlu0 %1289  ;;  %1415 = vmatprep.subr.mxu1 %v3805_v35 }
 0x2ae   : > { %1416 = vmatpush2.msra.mxu1 %v3801_v33  ;;  %v1298_v0 = vsel %vm803_vm13, %v1290_v48, %v1282_v7  ;;  %v1294_v49 = vsel %vm803_vm13, %v1282_v7, %v1290_v48 }
 0x2af   : > { %1417 = vmatprep.subr.mxu1 %v3785_v23  ;;  %v1278_v27 = vpop.permute.xlu1 %1277 }
 0x2b0   : > { %1418 = vmatpush2.msra.mxu1 %v3783_v19 }
 0x2b1   : > { %v1286_v13 = vpop.permute.xlu0 %1285  ;;  %1420 = vmatmul.mubr.f32.vlgmr.msra.gmra.mxu1 %v1307_v2  ;;  %2957 = vmatprep.subr.msk.mxu1 %vm3698_vm11, %v1298_v0 }
 0x2b2   : > { %2958 = vmatpush1.msk.msra.mxu1 %vm3457_vm3, %v1294_v49  ;;  %1425 = vmatprep.mubr.f32.mxu1 %v1311_v28  ;;  %v1296_v4 = vsel %vm803_vm13, %v1286_v13, %v1278_v27  ;;  %v1292_v54 = vsel %vm803_vm13, %v1278_v27, %v1286_v13 }
 0x2b3   : > { %2959 = vmatprep.subr.msk.mxu1 %vm3698_vm11, %v1297_v14  ;;  %v1276_v56 = vpop.permute.xlu1 %1275 }
 0x2b4   : > { %2960 = vmatpush1.msk.msra.mxu1 %vm3457_vm3, %v1293_v55 }
 0x2b5   : > { %v1284_v5 = vpop.permute.xlu0 %1283  ;;  %1426 = vmatmul.mubr.f32.gmra.mxu1 %v1310_v3  ;;  %2961 = vmatprep.subr.msk.mxu1 %vm3698_vm11, %v1296_v4 }
 0x2b6   : > { %v1291_v30 = vsel %vm803_vm13, %v1276_v56, %v1284_v5  ;;  %2962 = vmatpush1.msk.msra.mxu1 %vm3457_vm3, %v1292_v54  ;;  %v1295_v31 = vsel %vm803_vm13, %v1284_v5, %v1276_v56  ;;  %1431 = vmatprep.mubr.f32.mxu1 %v1314_v57 }
 0x2b7   : > { %2963 = vmatprep.subr.msk.mxu1 %vm3698_vm11, %v1295_v31 }
 0x2b8   : > { %2964 = vmatpush1.msk.msra.mxu1 %vm3457_vm3, %v1291_v30 }
 0x2b9   : > { %1432 = vmatmul.mubr.f32.gmra.mxu1 %v1313_v6 }
 0x2ba   : > { %1437 = vmatprep.mubr.f32.mxu1 %v1317_v60 }
 0x2bd   : > { %1438 = vmatmul.mubr.f32.gmra.mxu1 %v1316_v39 }
 0x2be   : > { %1508 = vmatprep.mubr.f32.mxu1 %v5476_v16 }
 0x2c0   : > { %v1341_v47 = vpop.permute.xlu1 %1340 }
 0x2c1   : > { %2965 = vmatmul.mubr.msk.f32.vlgmr.msra.gmra.mxu1 %vm860_vm15, %v1309_v45 }
 0x2c2   : > { %1514 = vmatprep.mubr.f32.mxu1 %v5476_v16  ;;  %v1336_v8 = vpop.permute.xlu0 %1335 }
 0x2c4   : > { %v1331_v2 = vpop.permute.xlu1 %1330 }
 0x2c5   : > { %2966 = vmatmul.mubr.msk.f32.gmra.mxu1 %vm860_vm15, %v1312_v61 }
 0x2c6   : > { %1520 = vmatprep.mubr.f32.mxu1 %v5476_v16  ;;  %v1326_v32 = vpop.permute.xlu0 %1325 }
 0x2c9   : > { %2967 = vmatmul.mubr.msk.f32.gmra.mxu1 %vm860_vm15, %v1315_v59 }
 0x2ca   : > { %1526 = vmatprep.mubr.f32.mxu1 %v5476_v16 }
 0x2cd   : > { %2968 = vmatmul.mubr.msk.f32.gmra.mxu1 %vm860_vm15, %v1318_v62 }
 0x371   : > { %v1421_v15 = vpop.f32.mrf.mxu1 }
 0x372   : > { %v1422_v36 = vadd.f32 %v1421_v15, %v1326_v32 }
 0x373   : > { %v1423_v18 = vpop.f32.mrf.mxu1 }
 0x374   : > { %v1424_v25 = vadd.f32 %v1423_v18, %v1326_v32 }
 0x375   : > { %v1427_v21 = vpop.f32.mrf.mxu1 }
 0x376   : > { %v1428_v27 = vadd.f32 %v1427_v21, %v1331_v2 }
 0x377   : > { %v1429_v63 = vpop.f32.mrf.mxu1 }
 0x378   : > { %v1430_v0 = vadd.f32 %v1429_v63, %v1331_v2  ;;  %v1825_v2 = vld [vmem:[%s5460_s6] sm:$0xff] }
 0x379   : > { %v1433_v22 = vpop.f32.mrf.mxu1 }
 0x37a   : > { %v1434_v54 = vadd.f32 %v1433_v22, %v1336_v8 }
 0x37b   : > { %v1435_v51 = vpop.f32.mrf.mxu1 }
 0x37c   : > { %v1436_v5 = vadd.f32 %v1435_v51, %v1336_v8 }
 0x37d   : > { %v4299_v52 = vpop.f32.mrf.mxu1 }
 0x37e   : > { %v1440_v59 = vadd.f32 %v4299_v52, %v1341_v47  ;;  %v1814_v52 = vld [vmem:[%s5459_s5 + $0x8] sm:$0xff] }
 0x37f   : > { %v4301_v34 = vpop.f32.mrf.mxu1  ;;  %1925 = vmatprep.mubr.f32.mxu1 %v1814_v52 }
 0x380   : > { %v1442_v15 = vadd.f32 %v4301_v34, %v1341_v47  ;;  %v1826_v47 = vld [vmem:[%s5460_s6 + $0x8] sm:$0xff] }
 0x381   : > { %v1510_v38 = vpop.f32.mrf.mxu1 }
 0x382   : > { %v1511_v26 = vadd.f32 %v1510_v38, %v1422_v36 }
 0x383   : > { %v1512_v41 = vpop.f32.mrf.mxu1 }
 0x384   : > { %vm1533_vm8 = vcmp.ge.f32.partialorder %v1511_v26, 0.0  ;;  %v1541_v10 = vmul.f32 0.1, %v1511_v26  ;;  %v1513_v12 = vadd.f32 %v1512_v41, %v1424_v25  ;;  %v1828_v41 = vld [vmem:[%s5460_s6 + $0x18] sm:$0xff] }
 0x385   : > { %v1516_v48 = vpop.f32.mrf.mxu1 }
 0x386   : > { %v4303_v42 = vsel %vm1533_vm8, %v1511_v26, %v1541_v10  ;;  %vm1534_vm5 = vcmp.ge.f32.partialorder %v1513_v12, 0.0  ;;  %v1542_v7 = vmul.f32 0.1, %v1513_v12  ;;  %v1517_v49 = vadd.f32 %v1516_v48, %v1428_v27 }
 0x387   : > { %1653 = vrot.lane.b32.xlu1 %v4303_v42, %s3172_s14  ;;  %v1518_v28 = vpop.f32.mrf.mxu1 }
 0x388   : > { %v4307_v53 = vsel %vm1534_vm5, %v1513_v12, %v1542_v7  ;;  %v1519_v13 = vadd.f32 %v1518_v28, %v1430_v0  ;;  %v1543_v14 = vmul.f32 0.1, %v1517_v49  ;;  %vm1535_vm9 = vcmp.ge.f32.partialorder %v1517_v49, 0.0  ;;  %v1827_v12 = vld [vmem:[%s5460_s6 + $0x10] sm:$0xff] }
 0x389   : > { %1661 = vrot.lane.b32.xlu0 %v4307_v53, %s3172_s14  ;;  %v1522_v4 = vpop.f32.mrf.mxu1 }
 0x38a   : > { %v1544_v3 = vmul.f32 0.1, %v1519_v13  ;;  %vm1536_vm0 = vcmp.ge.f32.partialorder %v1519_v13, 0.0  ;;  %v4327_v55 = vsel %vm1535_vm9, %v1517_v49, %v1543_v14  ;;  %v1523_v30 = vadd.f32 %v1522_v4, %v1434_v54 }
 0x38b   : > { %1621 = vrot.lane.b32.xlu1 %v4303_v42, %s3173_s15  ;;  %v1524_v56 = vpop.f32.mrf.mxu1 }
 0x38c   : > { %v4331_v57 = vsel %vm1536_vm0, %v1519_v13, %v1544_v3  ;;  %v1525_v31 = vadd.f32 %v1524_v56, %v1436_v5  ;;  %v1545_v6 = vmul.f32 0.1, %v1523_v30  ;;  %vm1537_vm4 = vcmp.ge.f32.partialorder %v1523_v30, 0.0 }
 0x38d   : > { %1629 = vrot.lane.b32.xlu0 %v4307_v53, %s3173_s15  ;;  %v1528_v61 = vpop.f32.mrf.mxu1  ;;  %vm5517_vm0 = vcmp.lt.s32.totalorder %v3393_v9, 1 }
 0x38e   : > { %v1546_v60 = vmul.f32 0.1, %v1525_v31  ;;  %vm1538_vm8 = vcmp.ge.f32.partialorder %v1525_v31, 0.0  ;;  %v4351_v39 = vsel %vm1537_vm4, %v1523_v30, %v1545_v6  ;;  %v1529_v18 = vadd.f32 %v1528_v61, %v1440_v59  ;;  %vm5518_vm4 = vmmov %vm5517_vm0 }
 0x38f   : > { %1589 = vrot.lane.b32.xlu1 %v4303_v42, %s3174_s16  ;;  %v1530_v62 = vpop.f32.mrf.mxu1 }
 0x390   : > { %v4355_v45 = vsel %vm1538_vm8, %v1525_v31, %v1546_v60  ;;  %v1531_v21 = vadd.f32 %v1530_v62, %v1442_v15  ;;  %v1547_v63 = vmul.f32 0.1, %v1529_v18  ;;  %vm1539_vm5 = vcmp.ge.f32.partialorder %v1529_v18, 0.0  ;;  %vm5519_vm8 = vmmov %vm5517_vm0 }
 0x391   : > { %1597 = vrot.lane.b32.xlu0 %v4307_v53, %s3174_s16 }
 0x392   : > { %v1548_v8 = vmul.f32 0.1, %v1531_v21  ;;  %vm1540_vm9 = vcmp.ge.f32.partialorder %v1531_v21, 0.0  ;;  %v4377_v22 = vsel %vm1539_vm5, %v1529_v18, %v1547_v63  ;;  %vm5520_vm5 = vmmov %vm5517_vm0 }
 0x393   : > { %1557 = vrot.lane.b32.xlu1 %v4303_v42, %s3175_s17 }
 0x394   : > { %v4381_v51 = vsel %vm1540_vm9, %v1531_v21, %v1548_v8  ;;  %vm5521_vm9 = vmmov %vm5517_vm0 }
 0x395   : > { %1565 = vrot.lane.b32.xlu0 %v4307_v53, %s3175_s17 }
 0x397   : > { %1749 = vrot.lane.b32.xlu1 %v4303_v42, %s3176_s18 }
 0x399   : > { %1757 = vrot.lane.b32.xlu0 %v4307_v53, %s3176_s18 }
 0x39b   : > { %1655 = vrot.lane.b32.xlu1 %v4327_v55, %s3172_s14 }
 0x39d   : > { %1663 = vrot.lane.b32.xlu0 %v4331_v57, %s3172_s14 }
 0x39f   : > { %1623 = vrot.lane.b32.xlu1 %v4327_v55, %s3173_s15 }
 0x3a1   : > { %1631 = vrot.lane.b32.xlu0 %v4331_v57, %s3173_s15 }
 0x3a3   : > { %1591 = vrot.lane.b32.xlu1 %v4327_v55, %s3174_s16 }
 0x3a5   : > { %1599 = vrot.lane.b32.xlu0 %v4331_v57, %s3174_s16 }
 0x3a7   : > { %1559 = vrot.lane.b32.xlu1 %v4327_v55, %s3175_s17 }
 0x3a9   : > { %1567 = vrot.lane.b32.xlu0 %v4331_v57, %s3175_s17 }
 0x3ab   : > { %1751 = vrot.lane.b32.xlu1 %v4327_v55, %s3176_s18 }
 0x3ad   : > { %1759 = vrot.lane.b32.xlu0 %v4331_v57, %s3176_s18 }
 0x3af   : > { %1657 = vrot.lane.b32.xlu1 %v4351_v39, %s3172_s14 }
 0x3b1   : > { %1665 = vrot.lane.b32.xlu0 %v4355_v45, %s3172_s14 }
 0x3b3   : > { %1625 = vrot.lane.b32.xlu1 %v4351_v39, %s3173_s15 }
 0x3b5   : > { %1633 = vrot.lane.b32.xlu0 %v4355_v45, %s3173_s15 }
 0x3b7   : > { %1593 = vrot.lane.b32.xlu1 %v4351_v39, %s3174_s16 }
 0x3b9   : > { %1601 = vrot.lane.b32.xlu0 %v4355_v45, %s3174_s16 }
 0x3bb   : > { %1561 = vrot.lane.b32.xlu1 %v4351_v39, %s3175_s17 }
 0x3bd   : > { %1569 = vrot.lane.b32.xlu0 %v4355_v45, %s3175_s17 }
 0x3bf   : > { %1753 = vrot.lane.b32.xlu1 %v4351_v39, %s3176_s18 }
 0x3c1   : > { %1761 = vrot.lane.b32.xlu0 %v4355_v45, %s3176_s18 }
 0x3c3   : > { %1659 = vrot.lane.b32.xlu1 %v4377_v22, %s3172_s14 }
 0x3c5   : > { %1667 = vrot.lane.b32.xlu0 %v4381_v51, %s3172_s14 }
 0x3c7   : > { %1721 = vrot.lane.b32.xlu1 %v4351_v39, %s3177_s19 }
 0x3c9   : > { %1729 = vrot.lane.b32.xlu0 %v4355_v45, %s3177_s19 }
 0x3cb   : > { %1627 = vrot.lane.b32.xlu1 %v4377_v22, %s3173_s15 }
 0x3cd   : > { %1635 = vrot.lane.b32.xlu0 %v4381_v51, %s3173_s15 }
 0x3cf   : > { %1595 = vrot.lane.b32.xlu1 %v4377_v22, %s3174_s16 }
 0x3d1   : > { %1727 = vrot.lane.b32.xlu0 %v4331_v57, %s3177_s19 }
 0x3d3   : > { %1563 = vrot.lane.b32.xlu1 %v4377_v22, %s3175_s17 }
 0x3d5   : > { %1603 = vrot.lane.b32.xlu0 %v4381_v51, %s3174_s16 }
 0x3d7   : > { %1755 = vrot.lane.b32.xlu1 %v4377_v22, %s3176_s18 }
 0x3d9   : > { %1725 = vrot.lane.b32.xlu0 %v4307_v53, %s3177_s19 }
 0x3db   : > { %1723 = vrot.lane.b32.xlu1 %v4377_v22, %s3177_s19 }
 0x3dd   : > { %1571 = vrot.lane.b32.xlu0 %v4381_v51, %s3175_s17 }
 0x3df   : > { %1719 = vrot.lane.b32.xlu1 %v4327_v55, %s3177_s19 }
 0x3e1   : > { %1697 = vrot.lane.b32.xlu0 %v4355_v45, %s3178_s20 }
 0x3e3   : > { %1717 = vrot.lane.b32.xlu1 %v4303_v42, %s3177_s19 }
 0x3e5   : > { %1763 = vrot.lane.b32.xlu0 %v4381_v51, %s3176_s18 }
 0x3e7   : > { %1691 = vrot.lane.b32.xlu1 %v4377_v22, %s3178_s20 }
 0x3e9   : > { %1695 = vrot.lane.b32.xlu0 %v4331_v57, %s3178_s20 }
 0x3eb   : > { %1689 = vrot.lane.b32.xlu1 %v4351_v39, %s3178_s20 }
 0x3ed   : > { %1731 = vrot.lane.b32.xlu0 %v4381_v51, %s3177_s19 }
 0x3ef   : > { %1687 = vrot.lane.b32.xlu1 %v4327_v55, %s3178_s20 }
 0x3f1   : > { %1693 = vrot.lane.b32.xlu0 %v4307_v53, %s3178_s20 }
 0x3f3   : > { %1685 = vrot.lane.b32.xlu1 %v4303_v42, %s3178_s20 }
 0x3f5   : > { %1699 = vrot.lane.b32.xlu0 %v4381_v51, %s3178_s20 }
 0x3f7   : > { %1787 = vrot.lane.b32.xlu1 %v4377_v22, %s5479_s23 }
 0x3f9   : > { %1793 = vrot.lane.b32.xlu0 %v4355_v45, %s5479_s23  ;;  %v4440_v32 = vpop.permute.xlu1 %1653 }
 0x3fb   : > { %v1662_v34 = vpop.permute.xlu0 %1661  ;;  %1785 = vrot.lane.b32.xlu1 %v4351_v39, %s5479_s23 }
 0x3fd   : > { %1795 = vrot.lane.b32.xlu0 %v4381_v51, %s5479_s23  ;;  %v4446_v36 = vpop.permute.xlu1 %1621 }
 0x3ff   : > { %v4448_v38 = vpop.permute.xlu0 %1629  ;;  %1783 = vrot.lane.b32.xlu1 %v4327_v55, %s5479_s23 }
 0x401   : > { %1791 = vrot.lane.b32.xlu0 %v4331_v57, %s5479_s23  ;;  %v4454_v25 = vpop.permute.xlu1 %1589 }
 0x403   : > { %v4456_v26 = vpop.permute.xlu0 %1597  ;;  %1781 = vrot.lane.b32.xlu1 %v4303_v42, %s5479_s23 }
 0x405   : > { %1789 = vrot.lane.b32.xlu0 %v4307_v53, %s5479_s23  ;;  %v4465_v10 = vpop.permute.xlu1 %1557 }
 0x407   : > { %v4470_v7 = vpop.permute.xlu0 %1565  ;;  %1846 = vperm.xlu1 %3147, %v1828_v41  }
 0x409   : > { %1841 = vperm.xlu0 %3146, %v1827_v12   ;;  %v4475_v48 = vpop.permute.xlu1 %1749 }
 0x40b   : > { %v4480_v27 = vpop.permute.xlu0 %1757  ;;  %1836 = vperm.xlu1 %3147, %v1826_v47  }
 0x40d   : > { %1831 = vperm.xlu0 %3146, %v1825_v2   ;;  %v1656_v28 = vpop.permute.xlu1 %1655 }
 0x40f   : > { %v1664_v0 = vpop.permute.xlu0 %1663 }
 0x411   : > { %v1624_v49 = vpop.permute.xlu1 %1623 }
 0x413   : > { %v1632_v13 = vpop.permute.xlu0 %1631 }
 0x415   : > { %v4482_v14 = vpop.permute.xlu1 %1591 }
 0x417   : > { %v4484_v3 = vpop.permute.xlu0 %1599 }
 0x419   : > { %v4486_v4 = vpop.permute.xlu1 %1559 }
 0x41b   : > { %v4488_v54 = vpop.permute.xlu0 %1567 }
 0x41d   : > { %v4490_v56 = vpop.permute.xlu1 %1751 }
 0x41f   : > { %v4492_v5 = vpop.permute.xlu0 %1759 }
 0x421   : > { %v1658_v30 = vpop.permute.xlu1 %1657 }
 0x423   : > { %v1666_v31 = vpop.permute.xlu0 %1665 }
 0x424   : > { %v1671_v47 = vsel %vm5519_vm8, %v1658_v30, %v1666_v31  ;;  %v1675_v2 = vsel %vm5520_vm5, %v1666_v31, %v1658_v30  ;;  %vm5523_vm8 = vmmov %vm5517_vm0  ;;  %vm5524_vm5 = vcmp.lt.s32.totalorder %v3393_v9, 15 }
 0x425   : > { %v1626_v6 = vpop.permute.xlu1 %1625  ;;  %v1673_v31 = vsel %vm5523_vm8, %v1662_v34, %v4440_v32 }
 0x427   : > { %v1634_v60 = vpop.permute.xlu0 %1633 }
 0x429   : > { %v1594_v61 = vpop.permute.xlu1 %1593 }
 0x42b   : > { %v1602_v59 = vpop.permute.xlu0 %1601 }
 0x42d   : > { %v4494_v62 = vpop.permute.xlu1 %1561 }
 0x42f   : > { %v4496_v15 = vpop.permute.xlu0 %1569 }
 0x431   : > { %v4498_v18 = vpop.permute.xlu1 %1753 }
 0x433   : > { %v4500_v21 = vpop.permute.xlu0 %1761 }
 0x435   : > { %v1660_v63 = vpop.permute.xlu1 %1659 }
 0x437   : > { %v1668_v8 = vpop.permute.xlu0 %1667 }
 0x438   : > { %v1676_v52 = vsel %vm5517_vm0, %v1668_v8, %v1660_v63  ;;  %v1672_v41 = vsel %vm5518_vm4, %v1660_v63, %v1668_v8  ;;  %v1670_v63 = vsel %vm5521_vm9, %v1656_v28, %v1664_v0  ;;  %v1674_v8 = vsel %vm5517_vm0, %v1664_v0, %v1656_v28  ;;  %vm5522_vm4 = vmmov %vm5517_vm0 }
 0x439   : > { %2969 = vmatprep.subr.msk.mxu1 %vm3417_vm1, %v1672_v41  ;;  %v4508_v12 = vpop.permute.xlu1 %1721  ;;  %v1669_v30 = vsel %vm5522_vm4, %v4440_v32, %v1662_v34  ;;  %vm5525_vm9 = vmmov %vm5524_vm5 }
 0x43a   : > { %2970 = vmatpush1.msk.msra.mxu1 %vm3421_vm2, %v1676_v52  ;;  %vm5526_vm0 = vmmov %vm5524_vm5 }
 0x43b   : > { %v4516_v16 = vpop.permute.xlu0 %1729  ;;  %2971 = vmatprep.subr.msk.mxu1 %vm3417_vm1, %v1671_v47  ;;  %v1639_v32 = vsel %vm5526_vm0, %v1626_v6, %v1634_v60  ;;  %vm5527_vm4 = vmmov %vm5526_vm0 }
 0x43c   : > { %2972 = vmatpush1.msk.msra.mxu1 %vm3421_vm2, %v1675_v2  ;;  %v1643_v34 = vsel %vm5527_vm4, %v1634_v60, %v1626_v6  ;;  %vm5528_vm8 = vmmov %vm5526_vm0  ;;  %v1641_v60 = vsel %vm5526_vm0, %v4448_v38, %v4446_v36  ;;  %vm5531_vm4 = vcmp.lt.s32.totalorder %v3393_v9, 16 }
 0x43d   : > { %2973 = vmatprep.subr.msk.mxu1 %vm3417_vm1, %v1670_v63  ;;  %v1628_v52 = vpop.permute.xlu1 %1627  ;;  %v1638_v63 = vsel %vm5528_vm8, %v1624_v49, %v1632_v13  ;;  %vm5532_vm8 = vmmov %vm5531_vm4 }
 0x43e   : > { %2974 = vmatpush1.msk.msra.mxu1 %vm3421_vm2, %v1674_v8 }
 0x43f   : > { %v1636_v41 = vpop.permute.xlu0 %1635  ;;  %2975 = vmatprep.subr.msk.mxu1 %vm3417_vm1, %v1669_v30 }
 0x440   : > { %v1644_v28 = vsel %vm5524_vm5, %v1636_v41, %v1628_v52  ;;  %2976 = vmatpush1.msk.msra.mxu1 %vm3421_vm2, %v1673_v31  ;;  %v1640_v0 = vsel %vm5525_vm9, %v1628_v52, %v1636_v41  ;;  %vm5529_vm5 = vmmov %vm5526_vm0 }
 0x441   : > { %2977 = vmatprep.subr.msk.mxu1 %vm3477_vm6, %v1640_v0  ;;  %v1596_v47 = vpop.permute.xlu1 %1595  ;;  %v1642_v8 = vsel %vm5529_vm5, %v1632_v13, %v1624_v49  ;;  %vm5530_vm9 = vmmov %vm5526_vm0  ;;  %vm5533_vm5 = vcmp.ge.s32.totalorder %v3393_v9, 16 }
 0x442   : > { %2978 = vmatpush1.msk.msra.mxu1 %vm3485_vm7, %v1644_v28  ;;  %v1637_v6 = vsel %vm5530_vm9, %v4446_v36, %v4448_v38  ;;  %vm5534_vm9 = vmmov %vm5531_vm4 }
 0x443   : > { %v4552_v2 = vpop.permute.xlu0 %1727  ;;  %2979 = vmatprep.subr.msk.mxu1 %vm3477_vm6, %v1639_v32  ;;  %v1607_v36 = vsel %vm5534_vm9, %v1594_v61, %v1602_v59  ;;  %vm5535_vm0 = vmmov %vm5531_vm4 }
 0x444   : > { %2980 = vmatpush1.msk.msra.mxu1 %vm3485_vm7, %v1643_v34  ;;  %v1611_v38 = vsel %vm5535_vm0, %v1602_v59, %v1594_v61  ;;  %v1605_v61 = vsel %vm5535_vm0, %v4454_v25, %v4456_v26 }
 0x445   : > { %2981 = vmatprep.subr.msk.mxu1 %vm3477_vm6, %v1638_v63  ;;  %v1564_v52 = vpop.permute.xlu1 %1563 }
 0x446   : > { %2982 = vmatpush1.msk.msra.mxu1 %vm3485_vm7, %v1642_v8 }
 0x447   : > { %v1604_v30 = vpop.permute.xlu0 %1603  ;;  %2983 = vmatprep.subr.msk.mxu1 %vm3477_vm6, %v1637_v6 }
 0x448   : > { %v1612_v49 = vsel %vm5531_vm4, %v1604_v30, %v1596_v47  ;;  %2984 = vmatpush1.msk.msra.mxu1 %vm3485_vm7, %v1641_v60  ;;  %v1608_v13 = vsel %vm5532_vm8, %v1596_v47, %v1604_v30  ;;  %vm5536_vm4 = vmmov %vm5533_vm5 }
 0x449   : > { %1877 = vmatprep.subr.mxu1 %v1608_v13  ;;  %v1756_v31 = vpop.permute.xlu1 %1755  ;;  %vm5537_vm8 = vmmov %vm5535_vm0 }
 0x44a   : > { %2985 = vmatpush1.msk.msra.mxu1 %vm5533_vm5, %v1612_v49  ;;  %v1606_v28 = vsel %vm5537_vm8, %v4482_v14, %v4484_v3  ;;  %vm5538_vm5 = vmmov %vm5535_vm0  ;;  %vm5541_vm8 = vcmp.lt.s32.totalorder %v3393_v9, 17 }
 0x44b   : > { %v4588_v41 = vpop.permute.xlu0 %1725  ;;  %1879 = vmatprep.subr.mxu1 %v1607_v36  ;;  %v1610_v0 = vsel %vm5538_vm5, %v4484_v3, %v4482_v14  ;;  %vm5539_vm9 = vmmov %vm5536_vm4 }
 0x44c   : > { %2986 = vmatpush1.msk.msra.mxu1 %vm5536_vm4, %v1611_v38  ;;  %vm5540_vm4 = vmmov %vm5535_vm0 }
 0x44d   : > { %1881 = vmatprep.subr.mxu1 %v1606_v28  ;;  %v1724_v47 = vpop.permute.xlu1 %1723  ;;  %v1609_v59 = vsel %vm5540_vm4, %v4456_v26, %v4454_v25  ;;  %vm5542_vm5 = vmmov %vm5539_vm9 }
 0x44e   : > { %2987 = vmatpush1.msk.msra.mxu1 %vm5539_vm9, %v1610_v0  ;;  %vm5543_vm9 = vmmov %vm5541_vm8 }
 0x44f   : > { %v1572_v32 = vpop.permute.xlu0 %1571  ;;  %1883 = vmatprep.subr.mxu1 %v1605_v61  ;;  %vm5544_vm0 = vmmov %vm5541_vm8 }
 0x450   : > { %v1580_v14 = vsel %vm5541_vm8, %v1572_v32, %v1564_v52  ;;  %2988 = vmatpush1.msk.msra.mxu1 %vm5542_vm5, %v1609_v59  ;;  %v1576_v3 = vsel %vm5543_vm9, %v1564_v52, %v1572_v32  ;;  %v1575_v25 = vsel %vm5544_vm0, %v4494_v62, %v4496_v15  ;;  %vm5545_vm4 = vmmov %vm5544_vm0  ;;  %v1577_v6 = vsel %vm5544_vm0, %v4470_v7, %v4465_v10 }
 0x451   : > { %2989 = vmatprep.subr.msk.mxu1 %vm3417_vm1, %v1576_v3  ;;  %v1720_v34 = vpop.permute.xlu1 %1719  ;;  %v1579_v26 = vsel %vm5545_vm4, %v4496_v15, %v4494_v62  ;;  %vm5546_vm8 = vmmov %vm5544_vm0  ;;  %vm5549_vm4 = vcmp.lt.s32.totalorder %v3393_v9, 112 }
 0x452   : > { %2990 = vmatpush1.msk.msra.mxu1 %vm3557_vm10, %v1580_v14  ;;  %v1574_v8 = vsel %vm5546_vm8, %v4486_v4, %v4488_v54  ;;  %vm5547_vm5 = vmmov %vm5544_vm0 }
 0x453   : > { %v1698_v63 = vpop.permute.xlu0 %1697  ;;  %2991 = vmatprep.subr.msk.mxu1 %vm3417_vm1, %v1575_v25  ;;  %v1578_v52 = vsel %vm5547_vm5, %v4488_v54, %v4486_v4  ;;  %vm5548_vm9 = vmmov %vm5544_vm0 }
 0x454   : > { %2992 = vmatpush1.msk.msra.mxu1 %vm3557_vm10, %v1579_v26  ;;  %v1573_v15 = vsel %vm5548_vm9, %v4465_v10, %v4470_v7  ;;  %vm5550_vm8 = vmmov %vm5549_vm4 }
 0x455   : > { %2993 = vmatprep.subr.msk.mxu1 %vm3417_vm1, %v1574_v8  ;;  %v1718_v62 = vpop.permute.xlu1 %1717  ;;  %vm5551_vm5 = vmmov %vm5549_vm4 }
 0x456   : > { %2994 = vmatpush1.msk.msra.mxu1 %vm3557_vm10, %v1578_v52  ;;  %v1771_v10 = vsel %vm5551_vm5, %v4500_v21, %v4498_v18  ;;  %vm5552_vm9 = vmmov %vm5549_vm4 }
 0x457   : > { %v1764_v60 = vpop.permute.xlu0 %1763  ;;  %2995 = vmatprep.subr.msk.mxu1 %vm3417_vm1, %v1573_v15  ;;  %v1767_v49 = vsel %vm5552_vm9, %v4498_v18, %v4500_v21  ;;  %vm5553_vm0 = vmmov %vm5549_vm4  ;;  %vm5557_vm9 = vcmp.lt.s32.totalorder %v3393_v9, 113 }
 0x458   : > { %v1768_v4 = vsel %vm5549_vm4, %v1756_v31, %v1764_v60  ;;  %v1772_v54 = vsel %vm5550_vm8, %v1764_v60, %v1756_v31  ;;  %2996 = vmatpush1.msk.msra.mxu1 %vm3557_vm10, %v1577_v6  ;;  %v1770_v13 = vsel %vm5553_vm0, %v4492_v5, %v4490_v56  ;;  %vm5554_vm4 = vmmov %vm5553_vm0 }
 0x459   : > { %2997 = vmatprep.subr.msk.mxu1 %vm519_vm12, %v1772_v54  ;;  %v1692_v30 = vpop.permute.xlu1 %1691  ;;  %v1766_v36 = vsel %vm5554_vm4, %v4490_v56, %v4492_v5  ;;  %vm5555_vm8 = vmmov %vm5553_vm0 }
 0x45a   : > { %1894 = vmatpush2.msra.mxu1 %v1768_v4  ;;  %v1769_v18 = vsel %vm5555_vm8, %v4480_v27, %v4475_v48  ;;  %vm5556_vm5 = vmmov %vm5553_vm0 }
 0x45b   : > { %v1696_v7 = vpop.permute.xlu0 %1695  ;;  %2998 = vmatprep.subr.msk.mxu1 %vm519_vm12, %v1771_v10  ;;  %v1765_v38 = vsel %vm5556_vm5, %v4475_v48, %v4480_v27  ;;  %vm5558_vm0 = vmmov %vm5557_vm9 }
 0x45c   : > { %1896 = vmatpush2.msra.mxu1 %v1767_v49  ;;  %vm5559_vm4 = vmmov %vm5558_vm0 }
 0x45d   : > { %2999 = vmatprep.subr.msk.mxu1 %vm519_vm12, %v1770_v13  ;;  %v1690_v31 = vpop.permute.xlu1 %1689  ;;  %v1739_v0 = vsel %vm5559_vm4, %v4516_v16, %v4508_v12  ;;  %vm5560_vm8 = vmmov %vm5558_vm0  ;;  %v1815_v13 = vld [vmem:[%s5459_s5 + $0x10] sm:$0xff] }
 0x45e   : > { %1898 = vmatpush2.msra.mxu1 %v1766_v36  ;;  %v1735_v48 = vsel %vm5560_vm8, %v4508_v12, %v4516_v16  ;;  %vm5561_vm5 = vmmov %vm5558_vm0  ;;  %v1737_v16 = vsel %vm5558_vm0, %v4588_v41, %v1718_v62  ;;  %vm5564_vm8 = vcmp.lt.s32.totalorder %v3393_v9, 127  ;;  %v1818_v36 = vld [vmem:[%s5459_s5 + $0x28] sm:$0xff] }
 0x45f   : > { %v1732_v21 = vpop.permute.xlu0 %1731  ;;  %3000 = vmatprep.subr.msk.mxu1 %vm519_vm12, %v1769_v18  ;;  %vm5563_vm4 = vmmov %vm5558_vm0  ;;  %v1819_v18 = vld [vmem:[%s5459_s5 + $0x30] sm:$0xff] }
 0x460   : > { %v1736_v28 = vsel %vm5557_vm9, %v1724_v47, %v1732_v21  ;;  %v1740_v56 = vsel %vm5558_vm0, %v1732_v21, %v1724_v47  ;;  %1900 = vmatpush2.msra.mxu1 %v1765_v38  ;;  %v1738_v47 = vsel %vm5561_vm5, %v4552_v2, %v1720_v34  ;;  %vm5562_vm9 = vmmov %vm5558_vm0  ;;  %v1733_v12 = vsel %vm5563_vm4, %v1718_v62, %v4588_v41  ;;  %v1823_v21 = vld [vmem:[%s5459_s5 + $0x50] sm:$0xff]  ;;  %v1821_v38 = vld [vmem:[%s5459_s5 + $0x40] sm:$0xff] }
 0x461   : > { %3001 = vmatprep.subr.msk.mxu1 %vm3624_vm14, %v1740_v56  ;;  %v1688_v5 = vpop.permute.xlu1 %1687  ;;  %v1734_v61 = vsel %vm5562_vm9, %v1720_v34, %v4552_v2  ;;  %vm5565_vm5 = vmmov %vm5564_vm8  ;;  %v1824_v56 = vld [vmem:[%s5459_s5 + $0x58] sm:$0xff] }
 0x462   : > { %3002 = vmatpush2.msk.msra.mxu1 %vm3421_vm2, %v1736_v28  ;;  %vm5566_vm9 = vmmov %vm5565_vm5  ;;  %v1822_v28 = vld [vmem:[%s5459_s5 + $0x48] sm:$0xff] }
 0x463   : > { %v1694_v27 = vpop.permute.xlu0 %1693  ;;  %3003 = vmatprep.subr.msk.mxu1 %vm3624_vm14, %v1739_v0  ;;  %v1707_v41 = vsel %vm5566_vm9, %v1698_v63, %v1690_v31  ;;  %vm5567_vm0 = vmmov %vm5565_vm5 }
 0x464   : > { %3004 = vmatpush2.msk.msra.mxu1 %vm3421_vm2, %v1735_v48  ;;  %v1703_v34 = vsel %vm5567_vm0, %v1690_v31, %v1698_v63  ;;  %vm5568_vm4 = vmmov %vm5567_vm0  ;;  %v5572_v31 = vmov 0.0  }
 0x465   : > { %3005 = vmatprep.subr.msk.mxu1 %vm3624_vm14, %v1738_v47  ;;  %v1686_v59 = vpop.permute.xlu1 %1685  ;;  %v1706_v26 = vsel %vm5568_vm4, %v1696_v7, %v1688_v5  ;;  %vm5571_vm9 = vmmov %vm5567_vm0  ;;  %vm2141_vm4 = vcmask 64512  }
 0x466   : > { %3006 = vmatpush2.msk.msra.mxu1 %vm3421_vm2, %v1734_v61  ;;  %v1701_v62 = vsel %vm5571_vm9, %v1686_v59, %v1694_v27 }
 0x467   : > { %v1700_v32 = vpop.permute.xlu0 %1699  ;;  %3007 = vmatprep.subr.msk.mxu1 %vm3624_vm14, %v1737_v16 }
 0x468   : > { %v1704_v2 = vsel %vm5564_vm8, %v1692_v30, %v1700_v32  ;;  %v1708_v14 = vsel %vm5565_vm5, %v1700_v32, %v1692_v30  ;;  %3008 = vmatpush2.msk.msra.mxu1 %vm3421_vm2, %v1733_v12  ;;  %vm5569_vm8 = vmmov %vm5567_vm0 }
 0x469   : > { %3009 = vmatprep.subr.msk.mxu1 %vm3477_vm6, %v1708_v14  ;;  %v1788_v3 = vpop.permute.xlu1 %1787  ;;  %v1702_v8 = vsel %vm5569_vm8, %v1688_v5, %v1696_v7  ;;  %vm5570_vm5 = vmmov %vm5567_vm0  ;;  %vm3182_vm0 = vmmov 0  }
 0x46a   : > { %3010 = vmatpush2.msk.msra.mxu1 %vm3457_vm3, %v1704_v2  ;;  %v1705_v63 = vsel %vm5570_vm5, %v1694_v27, %v1686_v59  ;;  %vm5574_vm5 = vcmp.lt.s32.totalorder %v3393_v9, 15 }
 0x46b   : > { %v1794_v25 = vpop.permute.xlu0 %1793  ;;  %3011 = vmatprep.subr.msk.mxu1 %vm3477_vm6, %v1707_v41  ;;  %vm5575_vm9 = vmmov %vm5574_vm5 }
 0x46c   : > { %3012 = vmatpush2.msk.msra.mxu1 %vm3457_vm3, %v1703_v34 }
 0x46d   : > { %3013 = vmatprep.subr.msk.mxu1 %vm3477_vm6, %v1706_v26  ;;  %v1786_v52 = vpop.permute.xlu1 %1785 }
 0x46e   : > { %3014 = vmatpush2.msk.msra.mxu1 %vm3457_vm3, %v1702_v8  ;;  %v1803_v54 = vsel %vm803_vm13, %v1794_v25, %v1786_v52  ;;  %v1799_v30 = vsel %vm803_vm13, %v1786_v52, %v1794_v25 }
 0x46f   : > { %v1796_v15 = vpop.permute.xlu0 %1795  ;;  %3015 = vmatprep.subr.msk.mxu1 %vm3477_vm6, %v1705_v63 }
 0x470   : > { %v1800_v6 = vsel %vm803_vm13, %v1788_v3, %v1796_v15  ;;  %v1804_v60 = vsel %vm803_vm13, %v1796_v15, %v1788_v3  ;;  %3016 = vmatpush2.msk.msra.mxu1 %vm3457_vm3, %v1701_v62 }
 0x471   : > { %1917 = vmatprep.subr.mxu1 %v4381_v51  ;;  %3017 = vmatprep.subr.msk.mxu0 %vm3698_vm11, %v1804_v60  ;;  %v1784_v4 = vpop.permute.xlu1 %1783 }
 0x472   : > { %1918 = vmatpush2.msra.mxu1 %v4377_v22  ;;  %3018 = vmatpush1.msk.msra.mxu0 %vm3457_vm3, %v1800_v6 }
 0x473   : > { %v1792_v10 = vpop.permute.xlu0 %1791  ;;  %1919 = vmatprep.subr.mxu1 %v4355_v45  ;;  %3019 = vmatprep.subr.msk.mxu0 %vm3698_vm11, %v1803_v54  ;;  %v1813_v45 = vld [vmem:[%s5459_s5] sm:$0xff] }
 0x474   : > { %v1798_v51 = vsel %vm803_vm13, %v1784_v4, %v1792_v10  ;;  %v1802_v7 = vsel %vm803_vm13, %v1792_v10, %v1784_v4  ;;  %1920 = vmatpush2.msra.mxu1 %v4351_v39  ;;  %3020 = vmatpush1.msk.msra.mxu0 %vm3457_vm3, %v1799_v30 }
 0x475   : > { %1921 = vmatprep.subr.mxu1 %v4331_v57  ;;  %3021 = vmatprep.subr.msk.mxu0 %vm3698_vm11, %v1802_v7  ;;  %v1782_v22 = vpop.permute.xlu1 %1781  ;;  %v1817_v57 = vld [vmem:[%s5459_s5 + $0x20] sm:$0xff] }
 0x476   : > { %1922 = vmatpush2.msra.mxu1 %v4327_v55  ;;  %3022 = vmatpush1.msk.msra.mxu0 %vm3457_vm3, %v1798_v51 }
 0x477   : > { %v1790_v49 = vpop.permute.xlu0 %1789  ;;  %1923 = vmatprep.subr.mxu1 %v4307_v53  ;;  %v1816_v53 = vld [vmem:[%s5459_s5 + $0x18] sm:$0xff] }
 0x478   : > { %v1797_v39 = vsel %vm803_vm13, %v1782_v22, %v1790_v49  ;;  %v1801_v55 = vsel %vm803_vm13, %v1790_v49, %v1782_v22  ;;  %1924 = vmatpush2.msra.mxu1 %v4303_v42  ;;  %v1820_v42 = vld [vmem:[%s5459_s5 + $0x38] sm:$0xff] }
 0x479   : > { %1926 = vmatmul.mubr.f32.vlgmr.msra.gmra.mxu1 %v1813_v45  ;;  %3023 = vmatprep.subr.msk.mxu0 %vm3698_vm11, %v1801_v55 }
 0x47a   : > { %3024 = vmatpush1.msk.msra.mxu0 %vm3457_vm3, %v1797_v39  ;;  %1931 = vmatprep.mubr.f32.mxu1 %v1817_v57 }
 0x47b   : > { %3025 = vmatmul.mubr.msk.f32.vlgmr.msra.gmra.mxu0 %vm860_vm15, %v1815_v13  ;;  %3108 = vmatprep.subr.mxu0 %v5572_v31 }
 0x47c   : > { %2020 = vmatprep.mubr.f32.mxu0 %v5572_v31 }
 0x47d   : > { %1932 = vmatmul.mubr.f32.gmra.mxu1 %v1816_v53 }
 0x47e   : > { %1937 = vmatprep.mubr.f32.mxu1 %v1820_v42 }
 0x47f   : > { %3026 = vmatmul.mubr.msk.f32.gmra.mxu0 %vm860_vm15, %v1818_v36 }
 0x480   : > { %2026 = vmatprep.mubr.f32.mxu0 %v5572_v31 }
 0x481   : > { %1938 = vmatmul.mubr.f32.gmra.mxu1 %v1819_v18 }
 0x482   : > { %1943 = vmatprep.mubr.f32.mxu1 %v1823_v21  ;;  %v1847_v27 = vpop.permute.xlu1 %1846 }
 0x483   : > { %3027 = vmatmul.mubr.msk.f32.gmra.mxu0 %vm860_vm15, %v1821_v38 }
 0x484   : > { %2032 = vmatprep.mubr.f32.mxu0 %v5572_v31  ;;  %v1842_v12 = vpop.permute.xlu0 %1841 }
 0x485   : > { %1944 = vmatmul.mubr.f32.gmra.mxu1 %v1822_v28 }
 0x486   : > { %2752 = vmatprep.mubr.f32.mxu1 %v5572_v31  ;;  %v1837_v14 = vpop.permute.xlu1 %1836 }
 0x487   : > { %3028 = vmatmul.mubr.msk.f32.gmra.mxu0 %vm860_vm15, %v1824_v56 }
 0x488   : > { %v1832_v63 = vpop.permute.xlu0 %1831  ;;  %3116 = vmatprep.mubr.msk.f32.mxu0 %vm3182_vm0, %v5572_v31  ;;  %vm5576_vm0 = vcmp.lt.s32.totalorder %v3393_v9, 16 }
 0x539   : > { %v1927_v5 = vpop.f32.mrf.mxu1 }
 0x53a   : > { %v1928_v22 = vadd.f32 %v1927_v5, %v1832_v63 }
 0x53b   : > { %v1929_v0 = vpop.f32.mrf.mxu1  ;;  %v2016_v48 = vpop.f32.mrf.mxu0 }
 0x53c   : > { %v1930_v30 = vadd.f32 %v1929_v0, %v1832_v63  ;;  %v2017_v42 = vadd.f32 %v2016_v48, %v1928_v22  ;;  %v2140_v63 = vld [vmem:[%s5464_s10 + $0x18] sm:$0xff] }
 0x53d   : > { %v1933_v47 = vpop.f32.mrf.mxu1  ;;  %v2018_v61 = vpop.f32.mrf.mxu0 }
 0x53e   : > { %v1934_v62 = vadd.f32 %v1933_v47, %v1837_v14  ;;  %v2019_v55 = vadd.f32 %v2018_v61, %v1930_v30  ;;  %v2133_v47 = vld [vmem:[%s5463_s9] sm:$0xff] }
 0x53f   : > { %v1935_v59 = vpop.f32.mrf.mxu1  ;;  %v2022_v16 = vpop.f32.mrf.mxu0  ;;  %v2056_v61 = vld [vmem:[%s5462_s8] sm:$0xff] }
 0x540   : > { %v1936_v25 = vadd.f32 %v1935_v59, %v1837_v14  ;;  %v2023_v49 = vadd.f32 %v2022_v16, %v1934_v62  ;;  %v2039_v36 = vadd.f32 %v2019_v55, %v2017_v42  ;;  %v2134_v14 = vld [vmem:[%s5463_s9 + $0x8] sm:$0xff] }
 0x541   : > { %v1939_v32 = vpop.f32.mrf.mxu1  ;;  %v2024_v2 = vpop.f32.mrf.mxu0 }
 0x542   : > { %v1940_v3 = vadd.f32 %v1939_v32, %v1842_v12  ;;  %v2025_v10 = vadd.f32 %v2024_v2, %v1936_v25 }
 0x543   : > { %v1941_v41 = vpop.f32.mrf.mxu1  ;;  %v2028_v34 = vpop.f32.mrf.mxu0 }
 0x544   : > { %v1942_v26 = vadd.f32 %v1941_v41, %v1842_v12  ;;  %v2029_v15 = vadd.f32 %v2028_v34, %v1940_v3  ;;  %v2042_v13 = vadd.f32 %v2025_v10, %v2023_v49  ;;  %v2135_v3 = vld [vmem:[%s5463_s9 + $0x10] sm:$0xff]  ;;  %v2136_v41 = vld [vmem:[%s5463_s9 + $0x18] sm:$0xff]  ;;  %v2138_v34 = vld [vmem:[%s5464_s10 + $0x8] sm:$0xff] }
 0x545   : > { %v1945_v8 = vpop.f32.mrf.mxu1  ;;  %v2030_v52 = vpop.f32.mrf.mxu0 }
 0x546   : > { %v1946_v6 = vadd.f32 %v1945_v8, %v1847_v27  ;;  %v2031_v60 = vadd.f32 %v2030_v52, %v1942_v26  ;;  %v2137_v26 = vld [vmem:[%s5464_s10] sm:$0xff] }
 0x547   : > { %v1947_v4 = vpop.f32.mrf.mxu1  ;;  %v2034_v54 = vpop.f32.mrf.mxu0 }
 0x548   : > { %v2045_v51 = vadd.f32 %v2031_v60, %v2029_v15  ;;  %v1948_v7 = vadd.f32 %v1947_v4, %v1847_v27  ;;  %v2035_v57 = vadd.f32 %v2034_v54, %v1946_v6  ;;  %v2055_v27 = vld [vmem:[%s5461_s7] sm:$0xff]  ;;  %v2139_v60 = vld [vmem:[%s5464_s10 + $0x10] sm:$0xff] }
 0x549   : > { %v2036_v45 = vpop.f32.mrf.mxu0 }
 0x54a   : > { %v2037_v39 = vadd.f32 %v2036_v45, %v1948_v7  ;;  %2046 = vadd.xlane.f32.xlu0 %v2045_v51 }
 0x54c   : > { %v2048_v53 = vadd.f32 %v2037_v39, %v2035_v57 }
 0x54e   : > { %2049 = vadd.xlane.f32.xlu1 %v2048_v53  ;;  %2043 = vadd.xlane.f32.xlu0 %v2042_v13 }
 0x552   : > { %2040 = vadd.xlane.f32.xlu1 %v2039_v36 }
 0x5d3   : > { %v2047_v18 = vpop.xlane.xlu0 %2046 }
 0x5d4   : > { %v4849_v56 = vmul.f32 0.00390625, %v2047_v18 }
 0x5d7   : > { %v2050_v21 = vpop.xlane.xlu1 %2049  ;;  %v2044_v28 = vpop.xlane.xlu0 %2043 }
 0x5d8   : > { %v4847_v38 = vmul.f32 0.00390625, %v2050_v21  ;;  %v4853_v0 = vmul.f32 0.00390625, %v2044_v28 }
 0x5da   : > { %3109 = vmatpush3.msra.mxu0 %v4847_v38 }
 0x5db   : > { %3110 = vmatprep.subr.mxu0 %v5572_v31  ;;  %v2041_v5 = vpop.xlane.xlu1 %2040 }
 0x5dc   : > { %3111 = vmatpush3.msra.mxu0 %v4849_v56  ;;  %v4857_v48 = vmul.f32 0.00390625, %v2041_v5 }
 0x5dd   : > { %3112 = vmatprep.subr.mxu0 %v5572_v31 }
 0x5de   : > { %3113 = vmatpush3.msra.mxu0 %v4853_v0 }
 0x5df   : > { %3114 = vmatprep.subr.mxu0 %v5572_v31 }
 0x5e0   : > { %3115 = vmatpush3.msra.mxu0 %v4857_v48 }
 0x5e1   : > { %3117 = vmatmul.mubr.msk.f32.vlgmr.msra.gmra.mxu0 %vm860_vm15, %v2055_v27 }
 0x5e2   : > { %3121 = vmatprep.mubr.msk.f32.mxu0 %vm2141_vm4, %v2133_v47 }
 0x6a1   : > { %v2126_v59 = vpop.f32.mrf.mxu0 }
 0x6a2   : > { %v2127_v16 = vadd.f32 %v2126_v59, %v2056_v61 }
 0x6a3   : > { %v3118_v12 = vpop.f32.mrf.mxu0 }
 0x6a4   : > { %v2131_v32 = vmul.f32 0.1, %v2127_v16  ;;  %vm2130_vm8 = vcmp.ge.f32.partialorder %v2127_v16, 0.0 }
 0x6a6   : > { %v2132_v2 = vsel %vm2130_vm8, %v2127_v16, %v2131_v32  ;;  %vm5578_vm8 = vcmp.lt.s32.totalorder %v3393_v9, 17 }
 0x6a7   : > { %3119 = vmatprep.subr.mxu0 %v2132_v2 }
 0x6a8   : > { %3120 = vmatpush3.msra.mxu0 %v2132_v2 }
 0x6a9   : > { %3122 = vmatmul.mubr.msk.f32.vlgmr.msra.gmra.mxu0 %vm2141_vm4, %v2134_v14 }
 0x6aa   : > { %3124 = vmatprep.mubr.msk.f32.mxu0 %vm2141_vm4, %v2135_v3 }
 0x6ad   : > { %3125 = vmatmul.mubr.msk.f32.gmra.mxu0 %vm2141_vm4, %v2136_v41  ;;  %vm5577_vm4 = vmmov %vm5576_vm0 }
 0x769   : > { %v3123_v25 = vpop.f32.mrf.mxu0 }
 0x76a   : > { %v2226_v8 = vadd.f32 %v3123_v25, %v2138_v34 }
 0x76b   : > { %v2220_v52 = vpop.f32.mrf.mxu0 }
 0x76c   : > { %v2240_v62 = vsub.f32 0.0, %v2226_v8  ;;  %v2221_v15 = vadd.f32 %v2220_v52, %v2137_v26 }
 0x76d   : > { %v3126_v6 = vpop.f32.mrf.mxu0 }
 0x76e   : > { %v2245_v4 = vmul.f32 1.442695, %v2240_v62  ;;  %v2239_v54 = vsub.f32 0.0, %v2221_v15  ;;  %v2236_v30 = vadd.f32 %v3126_v6, %v2140_v63  ;;  %v2564_v62 = vld [vmem:[%s5466_s12 + $0x8] sm:$0xff]  ;;  %v2563_v15 = vld [vmem:[%s5466_s12] sm:$0xff] }
 0x76f   : > { %v2230_v10 = vpop.f32.mrf.mxu0 }
 0x770   : > { %3148 = vpow2.f32 %v2245_v4  ;;  %v2243_v51 = vmul.f32 1.442695, %v2239_v54  ;;  %v2242_v7 = vsub.f32 0.0, %v2236_v30  ;;  %v2231_v45 = vadd.f32 %v2230_v10, %v2139_v60  ;;  %v2566_v30 = vld [vmem:[%s5466_s12 + $0x18] sm:$0xff]  ;;  %v2565_v10 = vld [vmem:[%s5466_s12 + $0x10] sm:$0xff] }
 0x772   : > { %3150 = vpow2.f32 %v2243_v51  ;;  %v2249_v22 = vmul.f32 1.442695, %v2242_v7  ;;  %v2241_v49 = vsub.f32 0.0, %v2231_v45 }
 0x774   : > { %3152 = vpow2.f32 %v2249_v22  ;;  %v2247_v57 = vmul.f32 1.442695, %v2241_v49 }
 0x776   : > { %3154 = vpow2.f32 %v2247_v57 }
 0x77d   : > { %v3149_v39 = vpop.eup %3148 }
 0x77e   : > { %v2252_v55 = vadd.f32 1.0, %v3149_v39 }
 0x77f   : > { %v3151_v13 = vpop.eup %3150 }
 0x780   : > { %3156 = vrcp.f32 %v2252_v55  ;;  %v2251_v42 = vadd.f32 1.0, %v3151_v13 }
 0x781   : > { %v3153_v53 = vpop.eup %3152 }
 0x782   : > { %v2254_v36 = vadd.f32 1.0, %v3153_v53 }
 0x783   : > { %v3155_v18 = vpop.eup %3154 }
 0x784   : > { %3158 = vrcp.f32 %v2254_v36  ;;  %v2253_v21 = vadd.f32 1.0, %v3155_v18 }
 0x785   : > { %3160 = vrcp.f32 %v2251_v42 }
 0x786   : > { %3162 = vrcp.f32 %v2253_v21 }
 0x78d   : > { %v3157_v28 = vpop.eup %3156 }
 0x78e   : > { %v2264_v5 = vmul.f32 %v3157_v28, %v4853_v0 }
 0x790   : > { %2274 = vperm.xlu1 %3147, %v2264_v5  }
 0x791   : > { %v3159_v27 = vpop.eup %3158 }
 0x792   : > { %v3161_v47 = vpop.eup %3160  ;;  %v2266_v61 = vmul.f32 %v3159_v27, %v4847_v38 }
 0x793   : > { %v3163_v59 = vpop.eup %3162  ;;  %v2263_v12 = vmul.f32 %v3161_v47, %v4857_v48 }
 0x794   : > { %2284 = vperm.xlu0 %3146, %v2266_v61   ;;  %v2265_v16 = vmul.f32 %v3163_v59, %v4849_v56 }
 0x796   : > { %2279 = vperm.xlu1 %3147, %v2265_v16  }
 0x798   : > { %2269 = vperm.xlu0 %3146, %v2263_v12  }
 0x80b   : > { %v2275_v32 = vpop.permute.xlu1 %2274 }
 0x80c   : > { %v4902_v2 = vadd.f32 %v2275_v32, %v3801_v33  ;;  %v4905_v14 = vadd.f32 %v2275_v32, %v3805_v35 }
 0x80e   : > { %2393 = vrot.lane.b32.xlu1 %v4902_v2, %s3172_s14  ;;  %2401 = vrot.lane.b32.xlu0 %v4905_v14, %s3172_s14 }
 0x80f   : > { %v2285_v33 = vpop.permute.xlu0 %2284 }
 0x812   : > { %2361 = vrot.lane.b32.xlu1 %v4902_v2, %s3173_s15  ;;  %2369 = vrot.lane.b32.xlu0 %v4905_v14, %s3173_s15 }
 0x813   : > { %v2270_v35 = vpop.permute.xlu0 %2269 }
 0x814   : > { %v4928_v38 = vadd.f32 %v2270_v35, %v3783_v19  ;;  %v4931_v56 = vadd.f32 %v2270_v35, %v3785_v23  ;;  %v4954_v19 = vadd.f32 %v2285_v33, %v3845_v50  ;;  %v4957_v23 = vadd.f32 %v2285_v33, %v3849_v1  ;;  %v2280_v50 = vpop.permute.xlu1 %2279 }
 0x815   : > { %v4980_v1 = vadd.f32 %v2280_v50, %v3821_v43  ;;  %v4983_v0 = vadd.f32 %v2280_v50, %v3825_v46  ;;  %v2552_v43 = vld [vmem:[%s5465_s11 + $0x8] sm:$0xff] }
 0x816   : > { %2329 = vrot.lane.b32.xlu1 %v4902_v2, %s3174_s16  ;;  %2337 = vrot.lane.b32.xlu0 %v4905_v14, %s3174_s16 }
 0x817   : > { %2663 = vmatprep.mubr.f32.mxu0 %v2552_v43 }
 0x81a   : > { %2297 = vrot.lane.b32.xlu1 %v4902_v2, %s3175_s17  ;;  %2305 = vrot.lane.b32.xlu0 %v4905_v14, %s3175_s17 }
 0x81e   : > { %2489 = vrot.lane.b32.xlu1 %v4902_v2, %s3176_s18  ;;  %2497 = vrot.lane.b32.xlu0 %v4905_v14, %s3176_s18 }
 0x822   : > { %2399 = vrot.lane.b32.xlu0 %v4931_v56, %s3172_s14  ;;  %2391 = vrot.lane.b32.xlu1 %v4928_v38, %s3172_s14 }
 0x826   : > { %2367 = vrot.lane.b32.xlu0 %v4931_v56, %s3173_s15  ;;  %2359 = vrot.lane.b32.xlu1 %v4928_v38, %s3173_s15 }
 0x82a   : > { %2335 = vrot.lane.b32.xlu0 %v4931_v56, %s3174_s16  ;;  %2327 = vrot.lane.b32.xlu1 %v4928_v38, %s3174_s16 }
 0x82e   : > { %2303 = vrot.lane.b32.xlu0 %v4931_v56, %s3175_s17  ;;  %2295 = vrot.lane.b32.xlu1 %v4928_v38, %s3175_s17 }
 0x832   : > { %2495 = vrot.lane.b32.xlu0 %v4931_v56, %s3176_s18  ;;  %2487 = vrot.lane.b32.xlu1 %v4928_v38, %s3176_s18 }
 0x836   : > { %2405 = vrot.lane.b32.xlu0 %v4957_v23, %s3172_s14  ;;  %2397 = vrot.lane.b32.xlu1 %v4954_v19, %s3172_s14 }
 0x83a   : > { %2373 = vrot.lane.b32.xlu0 %v4957_v23, %s3173_s15  ;;  %2365 = vrot.lane.b32.xlu1 %v4954_v19, %s3173_s15 }
 0x83e   : > { %2341 = vrot.lane.b32.xlu0 %v4957_v23, %s3174_s16  ;;  %2333 = vrot.lane.b32.xlu1 %v4954_v19, %s3174_s16 }
 0x842   : > { %2309 = vrot.lane.b32.xlu0 %v4957_v23, %s3175_s17  ;;  %2301 = vrot.lane.b32.xlu1 %v4954_v19, %s3175_s17 }
 0x846   : > { %2501 = vrot.lane.b32.xlu0 %v4957_v23, %s3176_s18  ;;  %2493 = vrot.lane.b32.xlu1 %v4954_v19, %s3176_s18 }
 0x84a   : > { %2403 = vrot.lane.b32.xlu0 %v4983_v0, %s3172_s14  ;;  %2395 = vrot.lane.b32.xlu1 %v4980_v1, %s3172_s14 }
 0x84e   : > { %2469 = vrot.lane.b32.xlu0 %v4957_v23, %s3177_s19  ;;  %2461 = vrot.lane.b32.xlu1 %v4954_v19, %s3177_s19 }
 0x852   : > { %2371 = vrot.lane.b32.xlu0 %v4983_v0, %s3173_s15  ;;  %2363 = vrot.lane.b32.xlu1 %v4980_v1, %s3173_s15 }
 0x856   : > { %2465 = vrot.lane.b32.xlu0 %v4905_v14, %s3177_s19  ;;  %2457 = vrot.lane.b32.xlu1 %v4902_v2, %s3177_s19 }
 0x85a   : > { %2339 = vrot.lane.b32.xlu0 %v4983_v0, %s3174_s16  ;;  %2331 = vrot.lane.b32.xlu1 %v4980_v1, %s3174_s16  ;;  %s5573_s16 = smov 111  }
 0x85e   : > { %2463 = vrot.lane.b32.xlu0 %v4931_v56, %s3177_s19  ;;  %2455 = vrot.lane.b32.xlu1 %v4928_v38, %s3177_s19 }
 0x862   : > { %2307 = vrot.lane.b32.xlu0 %v4983_v0, %s3175_s17  ;;  %2299 = vrot.lane.b32.xlu1 %v4980_v1, %s3175_s17  ;;  %s5633_s17 = sshll.u32 %s5635_s26, 6 }
 0x866   : > { %2437 = vrot.lane.b32.xlu0 %v4957_v23, %s3178_s20  ;;  %2429 = vrot.lane.b32.xlu1 %v4954_v19, %s3178_s20 }
 0x86a   : > { %2499 = vrot.lane.b32.xlu0 %v4983_v0, %s3176_s18  ;;  %2491 = vrot.lane.b32.xlu1 %v4980_v1, %s3176_s18 }
 0x86e   : > { %2433 = vrot.lane.b32.xlu0 %v4905_v14, %s3178_s20  ;;  %2425 = vrot.lane.b32.xlu1 %v4902_v2, %s3178_s20 }
 0x872   : > { %2467 = vrot.lane.b32.xlu0 %v4983_v0, %s3177_s19  ;;  %2459 = vrot.lane.b32.xlu1 %v4980_v1, %s3177_s19 }
 0x876   : > { %2431 = vrot.lane.b32.xlu0 %v4931_v56, %s3178_s20  ;;  %2423 = vrot.lane.b32.xlu1 %v4928_v38, %s3178_s20 }
 0x87a   : > { %2435 = vrot.lane.b32.xlu0 %v4983_v0, %s3178_s20  ;;  %2427 = vrot.lane.b32.xlu1 %v4980_v1, %s3178_s20  ;;  %s5441_s20 = scalar_lea.vmem %s5467_s13, %s5633_s17 }
 0x87e   : > { %2533 = vrot.lane.b32.xlu0 %v4957_v23, %s5573_s16  ;;  %2525 = vrot.lane.b32.xlu1 %v4954_v19, %s5573_s16 }
 0x880   : > { %v5044_v46 = vpop.permute.xlu1 %2393  ;;  %v5046_v48 = vpop.permute.xlu0 %2401 }
 0x882   : > { %2529 = vrot.lane.b32.xlu0 %v4905_v14, %s5573_s16  ;;  %2521 = vrot.lane.b32.xlu1 %v4902_v2, %s5573_s16 }
 0x884   : > { %v2362_v3 = vpop.permute.xlu1 %2361  ;;  %v2370_v41 = vpop.permute.xlu0 %2369 }
 0x885   : > { %v5054_v34 = vsel %vm5574_vm5, %v2362_v3, %v2370_v41  ;;  %v5058_v25 = vsel %vm5575_vm9, %v2370_v41, %v2362_v3  ;;  %vm5579_vm5 = vmmov %vm5578_vm8  ;;  %vm5580_vm9 = vcmp.lt.s32.totalorder %v3393_v9, 112 }
 0x886   : > { %2531 = vrot.lane.b32.xlu0 %v4983_v0, %s5573_s16  ;;  %2523 = vrot.lane.b32.xlu1 %v4980_v1, %s5573_s16 }
 0x888   : > { %v2330_v26 = vpop.permute.xlu1 %2329  ;;  %v2338_v8 = vpop.permute.xlu0 %2337 }
 0x889   : > { %v5066_v52 = vsel %vm5576_vm0, %v2338_v8, %v2330_v26  ;;  %v5070_v63 = vsel %vm5577_vm4, %v2330_v26, %v2338_v8  ;;  %vm5581_vm0 = vmmov %vm5580_vm9  ;;  %vm5582_vm4 = vcmp.lt.s32.totalorder %v3393_v9, 1 }
 0x88a   : > { %2527 = vrot.lane.b32.xlu0 %v4931_v56, %s5573_s16  ;;  %2519 = vrot.lane.b32.xlu1 %v4928_v38, %s5573_s16 }
 0x88c   : > { %v2298_v6 = vpop.permute.xlu1 %2297  ;;  %v2306_v60 = vpop.permute.xlu0 %2305 }
 0x88d   : > { %v5084_v4 = vsel %vm5578_vm8, %v2298_v6, %v2306_v60  ;;  %v5088_v54 = vsel %vm5579_vm5, %v2306_v60, %v2298_v6  ;;  %vm5583_vm8 = vmmov %vm5582_vm4 }
 0x88e   : > { %2574 = vperm.xlu0 %3146, %v2564_v62   ;;  %2569 = vperm.xlu1 %3147, %v2563_v15   ;;  %vm5584_vm5 = vmmov %vm5582_vm4 }
 0x890   : > { %v2490_v51 = vpop.permute.xlu1 %2489  ;;  %v2498_v7 = vpop.permute.xlu0 %2497 }
 0x891   : > { %v5098_v45 = vsel %vm5580_vm9, %v2490_v51, %v2498_v7  ;;  %v5102_v22 = vsel %vm5581_vm0, %v2498_v7, %v2490_v51  ;;  %vm5585_vm9 = vmmov %vm5582_vm4 }
 0x892   : > { %2584 = vperm.xlu0 %3146, %v2566_v30   ;;  %2579 = vperm.xlu1 %3147, %v2565_v10   ;;  %vm5586_vm0 = vmmov %vm5582_vm4 }
 0x893   : > { %v2408_v8 = vsel %vm5586_vm0, %v5044_v46, %v5046_v48 }
 0x894   : > { %v2392_v49 = vpop.permute.xlu1 %2391  ;;  %v2400_v57 = vpop.permute.xlu0 %2399 }
 0x898   : > { %v2360_v39 = vpop.permute.xlu1 %2359  ;;  %v2368_v55 = vpop.permute.xlu0 %2367 }
 0x89c   : > { %v5104_v13 = vpop.permute.xlu1 %2327  ;;  %v5106_v53 = vpop.permute.xlu0 %2335 }
 0x8a0   : > { %v5108_v42 = vpop.permute.xlu1 %2295  ;;  %v5110_v36 = vpop.permute.xlu0 %2303 }
 0x8a4   : > { %v5112_v18 = vpop.permute.xlu1 %2487  ;;  %v5114_v21 = vpop.permute.xlu0 %2495 }
 0x8a8   : > { %v2398_v28 = vpop.permute.xlu1 %2397  ;;  %v2406_v5 = vpop.permute.xlu0 %2405 }
 0x8a9   : > { %v2410_v27 = vsel %vm5582_vm4, %v2398_v28, %v2406_v5  ;;  %v2414_v47 = vsel %vm5583_vm8, %v2406_v5, %v2398_v28  ;;  %vm5587_vm4 = vmmov %vm5586_vm0 }
 0x8aa   : > { %3034 = vmatprep.subr.msk.mxu0 %vm3417_vm1, %v2410_v27  ;;  %v2412_v62 = vsel %vm5587_vm4, %v5046_v48, %v5044_v46  ;;  %vm5588_vm8 = vmmov %vm5586_vm0 }
 0x8ab   : > { %3035 = vmatpush1.msk.msra.mxu0 %vm3421_vm2, %v2414_v47  ;;  %v2407_v60 = vsel %vm5588_vm8, %v2392_v49, %v2400_v57 }
 0x8ac   : > { %v2366_v61 = vpop.permute.xlu1 %2365  ;;  %v2374_v59 = vpop.permute.xlu0 %2373 }
 0x8b0   : > { %v2334_v16 = vpop.permute.xlu1 %2333  ;;  %v2342_v12 = vpop.permute.xlu0 %2341 }
 0x8b4   : > { %v2302_v32 = vpop.permute.xlu1 %2301  ;;  %v2310_v33 = vpop.permute.xlu0 %2309 }
 0x8b8   : > { %v5124_v35 = vpop.permute.xlu1 %2493  ;;  %v5126_v50 = vpop.permute.xlu0 %2501 }
 0x8bc   : > { %v2396_v43 = vpop.permute.xlu1 %2395  ;;  %v2404_v3 = vpop.permute.xlu0 %2403 }
 0x8bd   : > { %v2409_v41 = vsel %vm5584_vm5, %v2396_v43, %v2404_v3  ;;  %v2413_v26 = vsel %vm5585_vm9, %v2404_v3, %v2396_v43  ;;  %vm5589_vm5 = vmmov %vm5586_vm0  ;;  %vm5590_vm9 = vcmp.lt.s32.totalorder %v3393_v9, 15 }
 0x8be   : > { %3036 = vmatprep.subr.msk.mxu0 %vm3417_vm1, %v2409_v41  ;;  %v2411_v30 = vsel %vm5589_vm5, %v2400_v57, %v2392_v49  ;;  %v2378_v46 = vsel %vm5590_vm9, %v2366_v61, %v2374_v59  ;;  %vm5591_vm0 = vmmov %vm5590_vm9 }
 0x8bf   : > { %3037 = vmatpush1.msk.msra.mxu0 %vm3421_vm2, %v2413_v26  ;;  %v2382_v48 = vsel %vm5591_vm0, %v2374_v59, %v2366_v61  ;;  %vm5592_vm4 = vmmov %vm5591_vm0 }
 0x8c0   : > { %v5144_v15 = vpop.permute.xlu1 %2461  ;;  %3038 = vmatprep.subr.msk.mxu0 %vm3417_vm1, %v2408_v8  ;;  %v5148_v6 = vpop.permute.xlu0 %2469  ;;  %vm5593_vm8 = vmmov %vm5591_vm0 }
 0x8c1   : > { %3039 = vmatpush1.msk.msra.mxu0 %vm3421_vm2, %v2412_v62  ;;  %vm5594_vm5 = vmmov %vm5591_vm0 }
 0x8c2   : > { %3040 = vmatprep.subr.msk.mxu0 %vm3417_vm1, %v2407_v60  ;;  %v2375_v5 = vsel %vm5594_vm5, %v2360_v39, %v2368_v55  ;;  %vm5595_vm9 = vmmov %vm5591_vm0  ;;  %vm5596_vm0 = vcmp.lt.s32.totalorder %v3393_v9, 16  ;;  %vm5599_vm5 = vcmp.ge.s32.totalorder %v3393_v9, 16 }
 0x8c3   : > { %3041 = vmatpush1.msk.msra.mxu0 %vm3421_vm2, %v2411_v30  ;;  %v2379_v27 = vsel %vm5595_vm9, %v2368_v55, %v2360_v39  ;;  %vm5600_vm9 = vmmov %vm5596_vm0 }
 0x8c4   : > { %v2364_v10 = vpop.permute.xlu1 %2363  ;;  %3042 = vmatprep.subr.msk.mxu0 %vm3477_vm6, %v2378_v46  ;;  %v2372_v51 = vpop.permute.xlu0 %2371 }
 0x8c5   : > { %v2377_v7 = vsel %vm5592_vm4, %v2364_v10, %v2372_v51  ;;  %v2381_v49 = vsel %vm5593_vm8, %v2372_v51, %v2364_v10  ;;  %3043 = vmatpush1.msk.msra.mxu0 %vm3485_vm7, %v2382_v48  ;;  %vm5597_vm4 = vmmov %vm5596_vm0 }
 0x8c6   : > { %3044 = vmatprep.subr.msk.mxu0 %vm3477_vm6, %v2377_v7  ;;  %v2350_v47 = vsel %vm5597_vm4, %v2342_v12, %v2334_v16  ;;  %vm5598_vm8 = vmmov %vm5596_vm0 }
 0x8c7   : > { %3045 = vmatpush1.msk.msra.mxu0 %vm3485_vm7, %v2381_v49 }
 0x8c8   : > { %v5176_v57 = vpop.permute.xlu1 %2457  ;;  %3046 = vmatprep.subr.msk.mxu0 %vm3477_vm6, %v5054_v34  ;;  %v5181_v28 = vpop.permute.xlu0 %2465  ;;  %v2346_v34 = vsel %vm5596_vm0, %v2334_v16, %v2342_v12  ;;  %vm5602_vm0 = vmmov %vm5599_vm5  ;;  %v2343_v16 = vsel %vm5597_vm4, %v5104_v13, %v5106_v53 }
 0x8c9   : > { %3047 = vmatpush1.msk.msra.mxu0 %vm3485_vm7, %v5058_v25 }
 0x8ca   : > { %3048 = vmatprep.subr.msk.mxu0 %vm3477_vm6, %v2375_v5 }
 0x8cb   : > { %3049 = vmatpush1.msk.msra.mxu0 %vm3485_vm7, %v2379_v27  ;;  %vm5601_vm7 = vmmov %vm5599_vm5 }
 0x8cc   : > { %v2332_v61 = vpop.permute.xlu1 %2331  ;;  %2615 = vmatprep.subr.mxu0 %v2346_v34  ;;  %v2340_v59 = vpop.permute.xlu0 %2339 }
 0x8cd   : > { %v2349_v25 = vsel %vm5598_vm8, %v2340_v59, %v2332_v61  ;;  %3050 = vmatpush1.msk.msra.mxu0 %vm5599_vm5, %v2350_v47  ;;  %v2345_v39 = vsel %vm5600_vm9, %v2332_v61, %v2340_v59  ;;  %vm5603_vm8 = vmmov %vm5597_vm4  ;;  %vm5604_vm5 = vcmp.lt.s32.totalorder %v3393_v9, 17 }
 0x8ce   : > { %2617 = vmatprep.subr.mxu0 %v2345_v39  ;;  %v2347_v12 = vsel %vm5603_vm8, %v5106_v53, %v5104_v13  ;;  %v2314_v43 = vsel %vm5604_vm5, %v2302_v32, %v2310_v33  ;;  %vm5605_vm9 = vmmov %vm5602_vm0 }
 0x8cf   : > { %3051 = vmatpush1.msk.msra.mxu0 %vm5601_vm7, %v2349_v25  ;;  %vm5606_vm7 = vmmov %vm5604_vm5 }
 0x8d0   : > { %v2456_v40 = vpop.permute.xlu1 %2455  ;;  %2619 = vmatprep.subr.mxu0 %v5070_v63  ;;  %v2464_v55 = vpop.permute.xlu0 %2463 }
 0x8d1   : > { %3052 = vmatpush1.msk.msra.mxu0 %vm5602_vm0, %v5066_v52  ;;  %v2318_v52 = vsel %vm5606_vm7, %v2310_v33, %v2302_v32  ;;  %vm5607_vm0 = vmmov %vm5604_vm5 }
 0x8d2   : > { %2621 = vmatprep.subr.mxu0 %v2343_v16  ;;  %vm5608_vm4 = vmmov %vm5607_vm0 }
 0x8d3   : > { %3053 = vmatpush1.msk.msra.mxu0 %vm5605_vm9, %v2347_v12  ;;  %vm5609_vm8 = vmmov %vm5607_vm0  ;;  %vm5611_vm9 = vcmp.lt.s32.totalorder %v3393_v9, 112 }
 0x8d4   : > { %v2300_v63 = vpop.permute.xlu1 %2299  ;;  %3054 = vmatprep.subr.msk.mxu0 %vm3417_vm1, %v2314_v43  ;;  %v2308_v3 = vpop.permute.xlu0 %2307  ;;  %v2311_v33 = vsel %vm5609_vm8, %v5108_v42, %v5110_v36  ;;  %vm5610_vm5 = vmmov %vm5607_vm0  ;;  %vm5617_vm8 = vcmp.lt.s32.totalorder %v3393_v9, 113 }
 0x8d5   : > { %v2313_v41 = vsel %vm5607_vm0, %v2300_v63, %v2308_v3  ;;  %v2317_v13 = vsel %vm5608_vm4, %v2308_v3, %v2300_v63  ;;  %3055 = vmatpush1.msk.msra.mxu0 %vm3557_vm10, %v2318_v52  ;;  %v2315_v26 = vsel %vm5610_vm5, %v5110_v36, %v5108_v42  ;;  %vm5612_vm7 = vmmov %vm5611_vm9  ;;  %v2553_v52 = vld [vmem:[%s5465_s11 + $0x10] sm:$0xff] }
 0x8d6   : > { %3056 = vmatprep.subr.msk.mxu0 %vm3417_vm1, %v2313_v41  ;;  %vm5618_vm5 = vmmov %vm5617_vm8  ;;  %v2557_v63 = vld [vmem:[%s5465_s11 + $0x30] sm:$0xff]  ;;  %v2559_v41 = vld [vmem:[%s5465_s11 + $0x40] sm:$0xff] }
 0x8d7   : > { %3057 = vmatpush1.msk.msra.mxu0 %vm3557_vm10, %v2317_v13  ;;  %v2474_v60 = vsel %vm5618_vm5, %v5144_v15, %v5148_v6  ;;  %v2561_v3 = vld [vmem:[%s5465_s11 + $0x50] sm:$0xff]  ;;  %v2562_v13 = vld [vmem:[%s5465_s11 + $0x58] sm:$0xff] }
 0x8d8   : > { %v2430_v53 = vpop.permute.xlu1 %2429  ;;  %3058 = vmatprep.subr.msk.mxu0 %vm3417_vm1, %v5084_v4  ;;  %v2438_v32 = vpop.permute.xlu0 %2437  ;;  %v2510_v4 = vsel %vm5611_vm9, %v5126_v50, %v5124_v35  ;;  %vm5619_vm9 = vmmov %vm5618_vm5 }
 0x8d9   : > { %3059 = vmatpush1.msk.msra.mxu0 %vm3557_vm10, %v5088_v54  ;;  %v2506_v54 = vsel %vm5612_vm7, %v5124_v35, %v5126_v50 }
 0x8da   : > { %3060 = vmatprep.subr.msk.mxu0 %vm3417_vm1, %v2311_v33  ;;  %vm5613_vm1 = vmmov %vm5612_vm7 }
 0x8db   : > { %3061 = vmatpush1.msk.msra.mxu0 %vm3557_vm10, %v2315_v26  ;;  %vm5614_vm0 = vmmov %vm5613_vm1 }
 0x8dc   : > { %v2492_v8 = vpop.permute.xlu1 %2491  ;;  %3062 = vmatprep.subr.msk.mxu0 %vm519_vm12, %v2510_v4  ;;  %v2500_v42 = vpop.permute.xlu0 %2499  ;;  %vm5615_vm10 = vmmov %vm5614_vm0 }
 0x8dd   : > { %v2505_v17 = vsel %vm5613_vm1, %v2492_v8, %v2500_v42  ;;  %v2509_v36 = vsel %vm5614_vm0, %v2500_v42, %v2492_v8  ;;  %2632 = vmatpush2.msra.mxu0 %v2506_v54  ;;  %v2507_v50 = vsel %vm5615_vm10, %v5114_v21, %v5112_v18  ;;  %vm5616_vm4 = vmmov %vm5614_vm0 }
 0x8de   : > { %3063 = vmatprep.subr.msk.mxu0 %vm519_vm12, %v2509_v36  ;;  %v2503_v62 = vsel %vm5616_vm4, %v5112_v18, %v5114_v21  ;;  %vm5621_vm7 = vmmov %vm5618_vm5  ;;  %vm5625_vm4 = vcmp.lt.s32.totalorder %v3393_v9, 127  ;;  %v2558_v9 = vld [vmem:[%s5465_s11 + $0x38] sm:$0xff] }
 0x8df   : > { %2634 = vmatpush2.msra.mxu0 %v2505_v17  ;;  %v2476_v21 = vsel %vm5621_vm7, %v5181_v28, %v5176_v57  ;;  %vm5622_vm1 = vmmov %vm5618_vm5  ;;  %v2446_v51 = vsel %vm5625_vm4, %v2438_v32, %v2430_v53 }
 0x8e0   : > { %v2426_v24 = vpop.permute.xlu1 %2425  ;;  %3064 = vmatprep.subr.msk.mxu0 %vm519_vm12, %v5102_v22  ;;  %v2434_v35 = vpop.permute.xlu0 %2433  ;;  %v2478_v22 = vsel %vm5617_vm8, %v5148_v6, %v5144_v15  ;;  %v2472_v15 = vsel %vm5622_vm1, %v5176_v57, %v5181_v28  ;;  %vm5623_vm0 = vmmov %vm5622_vm1 }
 0x8e1   : > { %2636 = vmatpush2.msra.mxu0 %v5098_v45  ;;  %v2475_v48 = vsel %vm5623_vm0, %v2464_v55, %v2456_v40  ;;  %vm5624_vm10 = vmmov %vm5623_vm0 }
 0x8e2   : > { %3065 = vmatprep.subr.msk.mxu0 %vm519_vm12, %v2507_v50  ;;  %vm5620_vm12 = vmmov %vm5618_vm5  ;;  %v2471_v10 = vsel %vm5624_vm10, %v2456_v40, %v2464_v55 }
 0x8e3   : > { %2638 = vmatpush2.msra.mxu0 %v2503_v62  ;;  %vm5626_vm8 = vmmov %vm5625_vm4 }
 0x8e4   : > { %v2460_v45 = vpop.permute.xlu1 %2459  ;;  %3066 = vmatprep.subr.msk.mxu0 %vm3624_vm14, %v2478_v22  ;;  %v2468_v30 = vpop.permute.xlu0 %2467  ;;  %v2442_v7 = vsel %vm5626_vm8, %v2430_v53, %v2438_v32  ;;  %vm5627_vm5 = vmmov %vm5625_vm4 }
 0x8e5   : > { %v2473_v11 = vsel %vm5619_vm9, %v2460_v45, %v2468_v30  ;;  %v2477_v18 = vsel %vm5620_vm12, %v2468_v30, %v2460_v45  ;;  %3067 = vmatpush2.msk.msra.mxu0 %vm3421_vm2, %v2474_v60  ;;  %vm5628_vm9 = vmmov %vm5625_vm4 }
 0x8e6   : > { %3068 = vmatprep.subr.msk.mxu0 %vm3624_vm14, %v2477_v18 }
 0x8e7   : > { %3069 = vmatpush2.msk.msra.mxu0 %vm3421_vm2, %v2473_v11 }
 0x8e8   : > { %v2424_v6 = vpop.permute.xlu1 %2423  ;;  %3070 = vmatprep.subr.msk.mxu0 %vm3624_vm14, %v2476_v21  ;;  %v2432_v46 = vpop.permute.xlu0 %2431 }
 0x8e9   : > { %3071 = vmatpush2.msk.msra.mxu0 %vm3421_vm2, %v2472_v15 }
 0x8ea   : > { %3072 = vmatprep.subr.msk.mxu0 %vm3624_vm14, %v2475_v48 }
 0x8eb   : > { %3073 = vmatpush2.msk.msra.mxu0 %vm3421_vm2, %v2471_v10  ;;  %vm5629_vm2 = vmmov %vm5625_vm4 }
 0x8ec   : > { %v2428_v49 = vpop.permute.xlu1 %2427  ;;  %3074 = vmatprep.subr.msk.mxu0 %vm3477_vm6, %v2446_v51  ;;  %v2436_v57 = vpop.permute.xlu0 %2435  ;;  %v2444_v20 = vsel %vm5629_vm2, %v2434_v35, %v2426_v24  ;;  %vm5630_vm14 = vmmov %vm5629_vm2 }
 0x8ed   : > { %v2441_v28 = vsel %vm5627_vm5, %v2428_v49, %v2436_v57  ;;  %v2445_v58 = vsel %vm5628_vm9, %v2436_v57, %v2428_v49  ;;  %3075 = vmatpush2.msk.msra.mxu0 %vm3457_vm3, %v2442_v7  ;;  %v2440_v5 = vsel %vm5630_vm14, %v2426_v24, %v2434_v35  ;;  %vm5631_vm12 = vmmov %vm5629_vm2 }
 0x8ee   : > { %3076 = vmatprep.subr.msk.mxu0 %vm3477_vm6, %v2445_v58  ;;  %v2443_v47 = vsel %vm5631_vm12, %v2432_v46, %v2424_v6  ;;  %vm5632_vm7 = vmmov %vm5629_vm2 }
 0x8ef   : > { %3077 = vmatpush2.msk.msra.mxu0 %vm3457_vm3, %v2441_v28  ;;  %v2439_v25 = vsel %vm5632_vm7, %v2424_v6, %v2432_v46 }
 0x8f0   : > { %v2526_v27 = vpop.permute.xlu1 %2525  ;;  %3078 = vmatprep.subr.msk.mxu0 %vm3477_vm6, %v2444_v20  ;;  %v2534_v34 = vpop.permute.xlu0 %2533 }
 0x8f1   : > { %v2538_v61 = vsel %vm803_vm13, %v2526_v27, %v2534_v34  ;;  %v2542_v59 = vsel %vm803_vm13, %v2534_v34, %v2526_v27  ;;  %3079 = vmatpush2.msk.msra.mxu0 %vm3457_vm3, %v2440_v5 }
 0x8f2   : > { %3080 = vmatprep.subr.msk.mxu0 %vm3477_vm6, %v2443_v47  ;;  %3082 = vmatprep.subr.msk.mxu1 %vm3698_vm11, %v2542_v59 }
 0x8f3   : > { %3081 = vmatpush2.msk.msra.mxu0 %vm3457_vm3, %v2439_v25  ;;  %3083 = vmatpush1.msk.msra.mxu1 %vm3457_vm3, %v2538_v61 }
 0x8f4   : > { %v2522_v39 = vpop.permute.xlu1 %2521  ;;  %2655 = vmatprep.subr.mxu0 %v4957_v23  ;;  %v2530_v40 = vpop.permute.xlu0 %2529 }
 0x8f5   : > { %2656 = vmatpush2.msra.mxu0 %v4954_v19  ;;  %v2551_v19 = vld [vmem:[%s5465_s11] sm:$0xff]  ;;  %v2540_v23 = vsel %vm803_vm13, %v2530_v40, %v2522_v39 }
 0x8f6   : > { %2657 = vmatprep.subr.mxu0 %v4983_v0 }
 0x8f7   : > { %2658 = vmatpush2.msra.mxu0 %v4980_v1 }
 0x8f8   : > { %v2524_v37 = vpop.permute.xlu1 %2523  ;;  %2659 = vmatprep.subr.mxu0 %v4905_v14  ;;  %v2532_v55 = vpop.permute.xlu0 %2531  ;;  %v2555_v14 = vld [vmem:[%s5465_s11 + $0x20] sm:$0xff] }
 0x8f9   : > { %v2537_v16 = vsel %vm803_vm13, %v2524_v37, %v2532_v55  ;;  %v2541_v12 = vsel %vm803_vm13, %v2532_v55, %v2524_v37  ;;  %2660 = vmatpush2.msra.mxu0 %v4902_v2  ;;  %v2536_v2 = vsel %vm803_vm13, %v2522_v39, %v2530_v40 }
 0x8fa   : > { %2661 = vmatprep.subr.mxu0 %v4931_v56  ;;  %3084 = vmatprep.subr.msk.mxu1 %vm3698_vm11, %v2541_v12 }
 0x8fb   : > { %2662 = vmatpush2.msra.mxu0 %v4928_v38  ;;  %3085 = vmatpush1.msk.msra.mxu1 %vm3457_vm3, %v2537_v16  ;;  %v2554_v38 = vld [vmem:[%s5465_s11 + $0x18] sm:$0xff] }
 0x8fc   : > { %v2520_v1 = vpop.permute.xlu1 %2519  ;;  %2664 = vmatmul.mubr.f32.vlgmr.msra.gmra.mxu0 %v2551_v19  ;;  %3086 = vmatprep.subr.msk.mxu1 %vm3698_vm11, %v2540_v23  ;;  %v2528_v56 = vpop.permute.xlu0 %2527 }
 0x8fd   : > { %v2535_v0 = vsel %vm803_vm13, %v2520_v1, %v2528_v56  ;;  %v2539_v43 = vsel %vm803_vm13, %v2528_v56, %v2520_v1  ;;  %3087 = vmatpush1.msk.msra.mxu1 %vm3457_vm3, %v2536_v2  ;;  %2669 = vmatprep.mubr.f32.mxu0 %v2555_v14 }
 0x8fe   : > { %3088 = vmatprep.subr.msk.mxu1 %vm3698_vm11, %v2539_v43 }
 0x8ff   : > { %3089 = vmatpush1.msk.msra.mxu1 %vm3457_vm3, %v2535_v0 }
 0x900   : > { %2670 = vmatmul.mubr.f32.gmra.mxu0 %v2554_v38  ;;  %3090 = vmatmul.mubr.msk.f32.vlgmr.msra.gmra.mxu1 %vm860_vm15, %v2553_v52 }
 0x901   : > { %2675 = vmatprep.mubr.f32.mxu0 %v2558_v9  ;;  %2758 = vmatprep.mubr.f32.mxu1 %v5572_v31 }
 0x904   : > { %2676 = vmatmul.mubr.f32.gmra.mxu0 %v2557_v63  ;;  %3091 = vmatmul.mubr.msk.f32.gmra.mxu1 %vm860_vm15, %v2556_v44 }
 0x905   : > { %2681 = vmatprep.mubr.f32.mxu0 %v2561_v3  ;;  %2764 = vmatprep.mubr.f32.mxu1 %v5572_v31 }
 0x908   : > { %2682 = vmatmul.mubr.f32.gmra.mxu0 %v2560_v29  ;;  %3092 = vmatmul.mubr.msk.f32.gmra.mxu1 %vm860_vm15, %v2559_v41 }
 0x909   : > { %2770 = vmatprep.mubr.f32.mxu1 %v5572_v31  ;;  %v2570_v32 = vpop.permute.xlu1 %2569  ;;  %v2575_v54 = vpop.permute.xlu0 %2574 }
 0x90c   : > { %3093 = vmatmul.mubr.msk.f32.gmra.mxu1 %vm860_vm15, %v2562_v13 }
 0x90d   : > { %v2580_v22 = vpop.permute.xlu1 %2579  ;;  %v2585_v46 = vpop.permute.xlu0 %2584 }
 0x9bc   : > { %v2665_v53 = vpop.f32.mrf.mxu0 }
 0x9bd   : > { %v2666_v26 = vadd.f32 %v2665_v53, %v2570_v32 }
 0x9be   : > { %v2667_v33 = vpop.f32.mrf.mxu0 }
 0x9bf   : > { %v2668_v8 = vadd.f32 %v2667_v33, %v2570_v32 }
 0x9c0   : > { %v2671_v4 = vpop.f32.mrf.mxu0  ;;  %v2754_v31 = vpop.f32.mrf.mxu1 }
 0x9c1   : > { %v2755_v42 = vadd.f32 %v2754_v31, %v2666_v26  ;;  %v2672_v24 = vadd.f32 %v2671_v4, %v2575_v54 }
 0x9c2   : > { %v2673_v17 = vpop.f32.mrf.mxu0  ;;  %v2756_v36 = vpop.f32.mrf.mxu1 }
 0x9c3   : > { %2777 = vst [vmem:[%s5441_s20] sm:$0xff] %v2755_v42  ;;  %v2757_v35 = vadd.f32 %v2756_v36, %v2668_v8  ;;  %v2674_v60 = vadd.f32 %v2673_v17, %v2575_v54 }
 0x9c4   : > { %v2677_v50 = vpop.f32.mrf.mxu0  ;;  %v2760_v62 = vpop.f32.mrf.mxu1 }
 0x9c5   : > { %2778 = vst [vmem:[%s5441_s20 + $0x8] sm:$0xff] %v2757_v35  ;;  %v2761_v45 = vadd.f32 %v2760_v62, %v2672_v24  ;;  %v2678_v18 = vadd.f32 %v2677_v50, %v2580_v22 }
 0x9c6   : > { %v2679_v30 = vpop.f32.mrf.mxu0  ;;  %v2762_v11 = vpop.f32.mrf.mxu1 }
 0x9c7   : > { %2779 = vst [vmem:[%s5441_s20 + $0x10] sm:$0xff] %v2761_v45  ;;  %v2763_v21 = vadd.f32 %v2762_v11, %v2674_v60  ;;  %v2680_v48 = vadd.f32 %v2679_v30, %v2580_v22 }
 0x9c8   : > { %v2683_v15 = vpop.f32.mrf.mxu0  ;;  %v2766_v6 = vpop.f32.mrf.mxu1 }
 0x9c9   : > { %2780 = vst [vmem:[%s5441_s20 + $0x18] sm:$0xff] %v2763_v21  ;;  %v2767_v10 = vadd.f32 %v2766_v6, %v2678_v18  ;;  %v2684_v49 = vadd.f32 %v2683_v15, %v2585_v46 }
 0x9ca   : > { %v2685_v51 = vpop.f32.mrf.mxu0  ;;  %v2768_v7 = vpop.f32.mrf.mxu1 }
 0x9cb   : > { %2781 = vst [vmem:[%s5441_s20 + $0x20] sm:$0xff] %v2767_v10  ;;  %v2769_v57 = vadd.f32 %v2768_v7, %v2680_v48  ;;  %v2686_v58 = vadd.f32 %v2685_v51, %v2585_v46 }
 0x9cc   : > { %v2772_v28 = vpop.f32.mrf.mxu1 }
 0x9cd   : > { %2782 = vst [vmem:[%s5441_s20 + $0x28] sm:$0xff] %v2769_v57  ;;  %v2773_v20 = vadd.f32 %v2772_v28, %v2684_v49 }
 0x9ce   : > { %v2774_v5 = vpop.f32.mrf.mxu1 }
 0x9cf   : > { %2783 = vst [vmem:[%s5441_s20 + $0x30] sm:$0xff] %v2773_v20  ;;  %v2775_v27 = vadd.f32 %v2774_v5, %v2686_v58 }
 0x9d1   : > { %2784 = vst [vmem:[%s5441_s20 + $0x38] sm:$0xff] %v2775_v27 }
 0x9d2 PF: > { %s23_s25 = sadd.s32 1, %s3170_s25  }
 0x9d3   : > { %p20_p4 = scmp.ge.s32.totalorder %s23_s25, 4  }
 0x9d5   :  { %22 = sbr.rel (!%p20_p4) target bundleno = 1 (0x1), region = 102 }

</bundles_post_ra>
